<compile_context>
chip_gen: v5e
topology: v5e:2x2
jax: 0.10.0
libtpu: 0.0.40
codegen_flags: <defaults>
</compile_context>

<pallas_src>
import functools
import math

import jax
import jax.numpy as jnp
from jax.experimental import pallas as pl
from jax.experimental.pallas import tpu as pltpu


def pitch_predictor_kernel(alpha_ref, xs_ref, pos_ref, freq_ref, sinm_ref,
                           w_ref, convb_ref, lng_ref, lnb_ref,
                           linwT_ref, linbT_ref, out_ref, *, T):
    R, C = xs_ref.shape                      # R = whole sequences * T rows
    L, K = w_ref.shape[0], w_ref.shape[1]
    pad = K // 2

    # --- sinusoidal positional embedding, alpha-scale, residual add ---
    pos = pos_ref[...]                                   # (R, 1) float positions
    arg = pos * freq_ref[...]                            # (R, 1) * (1, C) -> (R, C)
    sin_sel = sinm_ref[...]                              # (1, C): 1 -> sin half, 0 -> cos half
    emb = sin_sel * jnp.sin(arg) + (1.0 - sin_sel) * jnp.cos(arg)
    emb = emb * (pos > 0.5).astype(jnp.float32)          # padding rows (pos==0) -> 0
    cur = xs_ref[...] + alpha_ref[0] * emb               # (R, C) f32

    # --- boundary masks for the K time shifts (hoisted out of the layer loop) ---
    # Rows whose source t+off falls outside [0, T) (sequence edge / seam between
    # flattened sequences inside the block) are zeroed -> exact SAME padding.
    row = jax.lax.broadcasted_iota(jnp.int32, (R, 1), 0)
    t_in_seq = row % T
    masks = []
    for k in range(K):
        off = k - pad
        t_src = t_in_seq + off
        valid = jnp.logical_and(t_src >= 0, t_src < T)
        masks.append(valid.astype(jnp.float32))          # (R, 1) f32

    inv_c = 1.0 / C

    # --- conv stack: Conv1d(SAME) -> ReLU -> LayerNorm(channel dim) ---
    for l in range(L):
        x_b = cur.astype(jnp.bfloat16)                   # one MXU-operand cast / layer
        # Center tap needs no roll and no mask.
        acc = jnp.dot(x_b, w_ref[l, pad],
                      preferred_element_type=jnp.float32)  # (R, C) f32
        # Remaining taps: roll-after-matmul identity, mask applied on the f32
        # output (no im2col concat, no bf16 elementwise, contraction stays C).
        for k in range(K):
            off = k - pad
            if off == 0:
                continue
            y = jnp.dot(x_b, w_ref[l, k],
                        preferred_element_type=jnp.float32)
            y = pltpu.roll(y, shift=(-off) % R, axis=0)    # y[t] = (x @ W_k)[t+off]
            acc = acc + masks[k] * y
        acc = jnp.maximum(acc + convb_ref[l][None, :], 0.0)   # bias + ReLU

        # Two-pass LayerNorm over channels (matches torch.nn.LayerNorm, eps=1e-12).
        mu = jnp.sum(acc, axis=-1, keepdims=True) * inv_c
        d = acc - mu
        var = jnp.sum(d * d, axis=-1, keepdims=True) * inv_c
        cur = d * jax.lax.rsqrt(var + 1e-12)
        cur = cur * lng_ref[l][None, :] + lnb_ref[l][None, :]
        # TODO(synk): Dropout is identity at inference; not implemented.

    # --- final Linear(n_chans -> odim), emitted transposed: odim on sublanes,
    # time on lanes. Only 8*R*4 bytes stored per block (vs a 128-wide pad). ---
    outT = jnp.einsum('oc,tc->ot', linwT_ref[...], cur.astype(jnp.bfloat16),
                      preferred_element_type=jnp.float32)   # (OSUB, R)
    out_ref[...] = (outT + linbT_ref[...]).astype(out_ref.dtype)


def make_positions(tok, padding_idx=0):
    """JAX glue: positions = cumsum(non-pad mask) * mask + padding_idx."""
    mask = (tok != padding_idx).astype(jnp.int32)
    return jnp.cumsum(mask, axis=1) * mask + padding_idx


def _choose_seqs_per_block(B, T):
    """Whole sequences per grid step.

    Keeps rolls+masks correct (blocks contain whole sequences) and, when the
    problem is big enough, picks blocks that are >=512 rows and a multiple of
    128 so the transposed output stays lane-tile aligned; the axis is marked
    "parallel" so v7x can shard blocks across its two TensorCores.
    """
    BT = B * T
    if BT < 1024:
        return B                       # single block: tiny problem, no tiling win
    for s in range(1, B):
        rows = s * T
        if B % s == 0 and rows % 128 == 0 and rows >= 512:
            return s
    return B


def pitch_predictor(xs, params):
    (alpha, freq, sinm, convw, convb, lng, lnb, linw, linb) = params
    B, T, C = xs.shape
    L, K = convw.shape[:2]
    odim = linw.shape[1]
    BT = B * T
    OSUB = 8                                   # one sublane tile for the transposed output

    # glue: integer position bookkeeping from channel 0 (padding_idx = 0)
    pos = make_positions(xs[..., 0], 0).astype(jnp.float32).reshape(BT, 1)
    xs_flat = xs.reshape(BT, C)

    # bf16 MXU operands (accumulation stays f32 in-kernel)
    w_b = convw.astype(jnp.bfloat16)                                   # (L, K, C, C)
    linwT = jnp.zeros((OSUB, C), jnp.bfloat16).at[:odim, :].set(
        linw.T.astype(jnp.bfloat16))                                   # (OSUB, C)
    linbT = jnp.zeros((OSUB, 1), jnp.float32).at[:odim, 0].set(linb[0])

    seqs_per_block = _choose_seqs_per_block(B, T)
    R = seqs_per_block * T
    grid = (B // seqs_per_block,)

    cost = pl.CostEstimate(
        flops=2 * BT * C * C * K * L + 2 * BT * C * OSUB + 12 * L * BT * C,
        transcendentals=2 * BT * C + L * BT,
        bytes_accessed=(xs_flat.size + pos.size) * 4 + w_b.size * 2
                       + (convb.size + lng.size + lnb.size) * 4
                       + linwT.size * 2 + linbT.size * 4 + OSUB * BT * 4)

    # Explicit scoped-VMEM request: activations + weights per block with
    # double-buffered I/O headroom, bounded so it stays inside v7x's 64 MiB.
    per_block = R * (C * 4 * 4 + 4 + OSUB * 4) + w_b.size * 2 + 4096
    vmem_limit = int(min(48 * 2**20, max(32 * 2**20, 4 * per_block)))

    kernel = pl.pallas_call(
        functools.partial(pitch_predictor_kernel, T=T),
        out_shape=jax.ShapeDtypeStruct((OSUB, BT), jnp.float32),
        grid=grid,
        in_specs=[
            pl.BlockSpec(memory_space=pltpu.MemorySpace.SMEM),    # alpha (1,)
            pl.BlockSpec((R, C), lambda i: (i, 0)),               # xs rows (whole seqs)
            pl.BlockSpec((R, 1), lambda i: (i, 0)),               # positions
            pl.BlockSpec((1, C), lambda i: (0, 0)),               # sinus freqs
            pl.BlockSpec((1, C), lambda i: (0, 0)),               # sin/cos select mask
            pl.BlockSpec((L, K, C, C), lambda i: (0, 0, 0, 0)),   # conv weights (bf16)
            pl.BlockSpec((L, C), lambda i: (0, 0)),               # conv biases
            pl.BlockSpec((L, C), lambda i: (0, 0)),               # LayerNorm gamma
            pl.BlockSpec((L, C), lambda i: (0, 0)),               # LayerNorm beta
            pl.BlockSpec((OSUB, C), lambda i: (0, 0)),            # linear W^T (bf16, sublane-padded)
            pl.BlockSpec((OSUB, 1), lambda i: (0, 0)),            # linear b^T (sublane-padded)
        ],
        out_specs=pl.BlockSpec((OSUB, R), lambda i: (0, i)),      # transposed, lane-dense in time
        compiler_params=pltpu.CompilerParams(
            dimension_semantics=("parallel",),
            vmem_limit_bytes=vmem_limit),
        cost_estimate=cost,
    )
    outT = kernel(alpha, xs_flat, pos, freq, sinm, w_b, convb, lng, lnb,
                  linwT, linbT)
    return outT[:odim, :].T.reshape(B, T, odim)


def init_params(C, odim, L, K):
    """Deterministic synthetic parameters (idim == n_chans == C)."""
    key = jax.random.PRNGKey(0)
    kw, kb, klw = jax.random.split(key, 3)
    half = C // 2
    base = jnp.exp(jnp.arange(half, dtype=jnp.float32)
                   * -(math.log(10000.0) / (half - 1)))
    freq = jnp.concatenate([base, base])[None, :]                        # (1, C)
    sinm = jnp.concatenate([jnp.ones((half,), jnp.float32),
                            jnp.zeros((half,), jnp.float32)])[None, :]   # (1, C)
    alpha = jnp.ones((1,), jnp.float32)              # nn.Parameter([1.0])
    convw = jax.random.normal(kw, (L, K, C, C), jnp.float32) / math.sqrt(K * C)
    convb = 0.02 * jax.random.normal(kb, (L, C), jnp.float32)
    lng = jnp.ones((L, C), jnp.float32)
    lnb = jnp.zeros((L, C), jnp.float32)
    linw = jax.random.normal(klw, (C, odim), jnp.float32) / math.sqrt(C)
    linb = jnp.zeros((1, odim), jnp.float32)
    return (alpha, freq, sinm, convw, convb, lng, lnb, linw, linb)


def reference_forward(xs, params, dot_dtype=jnp.float32):
    """Pure-JAX reference mirroring the PyTorch forward semantics.

    dot_dtype=jnp.bfloat16 mirrors the kernel's MXU operand precision
    (weights/activations rounded to bf16, f32 accumulation) for a tight check;
    dot_dtype=jnp.float32 is the full-precision module semantics.
    """
    (alpha, freq, sinm, convw, convb, lng, lnb, linw, linb) = params
    B, T, C = xs.shape
    L, K = convw.shape[:2]
    pad = K // 2
    pos = make_positions(xs[..., 0], 0)
    arg = pos[..., None].astype(jnp.float32) * freq[0]
    emb = jnp.where(sinm[0] > 0.5, jnp.sin(arg), jnp.cos(arg))
    emb = jnp.where(pos[..., None] > 0, emb, 0.0)
    x = xs + alpha[0] * emb
    for l in range(L):
        xp = jnp.pad(x, ((0, 0), (pad, pad), (0, 0)))
        y = jnp.broadcast_to(convb[l][None, None, :], (B, T, C)).astype(jnp.float32)
        for k in range(K):
            y = y + jnp.einsum('btc,cd->btd',
                               xp[:, k:k + T, :].astype(dot_dtype),
                               convw[l, k].astype(dot_dtype),
                               preferred_element_type=jnp.float32,
                               precision='highest')
        y = jnp.maximum(y, 0.0)
        mu = y.mean(-1, keepdims=True)
        var = ((y - mu) ** 2).mean(-1, keepdims=True)
        x = (y - mu) / jnp.sqrt(var + 1e-12) * lng[l] + lnb[l]
    out = jnp.einsum('btc,co->bto', x.astype(dot_dtype), linw.astype(dot_dtype),
                     preferred_element_type=jnp.float32, precision='highest')
    return out + linb[0]


if __name__ == "__main__":
    B, T, C, ODIM, L, K = 2, 16, 32, 2, 5, 5   # idim = n_chans = 32, kernel 5, 5 layers

    key = jax.random.PRNGKey(0)
    xs = jax.random.normal(key, (B, T, C), jnp.float32)
    # make the trailing frames "padding" (channel 0 == padding_idx = 0)
    xs = xs.at[:, -3:, 0].set(0.0)

    params = init_params(C, ODIM, L, K)

    out = jax.block_until_ready(pitch_predictor(xs, params))
    assert out.shape == (B, T, ODIM), out.shape

    # Tight check against a reference that matches the kernel's bf16 MXU
    # operand precision (verifies the roll-after-matmul / mask / transposed
    # output implementation).
    ref_matched = reference_forward(xs, params, dot_dtype=jnp.bfloat16)
    err_m = float(jnp.max(jnp.abs(out - ref_matched)))
    assert jnp.allclose(out, ref_matched, atol=5e-3, rtol=5e-3), (
        "precision-matched max abs err", err_m)

    # Looser sanity check against the full-f32 module semantics (bounds the
    # bf16 MXU-operand drift).
    ref_f32 = reference_forward(xs, params, dot_dtype=jnp.float32)
    err_f = float(jnp.max(jnp.abs(out - ref_f32)))
    assert jnp.allclose(out, ref_f32, atol=1e-1, rtol=5e-2), (
        "f32-reference max abs err", err_f)

    print("KERNEL_OK")
</pallas_src>

<mosaic_0001>
module attributes {stable_mosaic.version = 11 : i64} {
  func.func @pitch_predictor_kernel(%arg0: i32, %arg1: memref<1xf32, #tpu.memory_space<smem>>, %arg2: memref<32x32xf32, #tpu.memory_space<vmem>>, %arg3: memref<32x1xf32, #tpu.memory_space<vmem>>, %arg4: memref<1x32xf32, #tpu.memory_space<vmem>>, %arg5: memref<1x32xf32, #tpu.memory_space<vmem>>, %arg6: memref<5x5x32x32xbf16, #tpu.memory_space<vmem>>, %arg7: memref<5x32xf32, #tpu.memory_space<vmem>>, %arg8: memref<5x32xf32, #tpu.memory_space<vmem>>, %arg9: memref<5x32xf32, #tpu.memory_space<vmem>>, %arg10: memref<8x32xbf16, #tpu.memory_space<vmem>>, %arg11: memref<8x1xf32, #tpu.memory_space<vmem>>, %arg12: memref<8x32xf32, #tpu.memory_space<vmem>>) attributes {dimension_semantics = [#tpu.dimension_semantics<parallel>], iteration_bounds = array<i64: 1>, scalar_prefetch = 0 : i64, scratch_operands = 0 : i64, tpu.core_type = #tpu.core_type<tc>, window_params = [{transform_indices = @transform_0, window_bounds = array<i64: 1>}, {transform_indices = @transform_1, window_bounds = array<i64: 32, 32>}, {transform_indices = @transform_2, window_bounds = array<i64: 32, 1>}, {pipeline_mode = #tpu.pipeline_mode<synchronous>, transform_indices = @transform_3, window_bounds = array<i64: 1, 32>}, {pipeline_mode = #tpu.pipeline_mode<synchronous>, transform_indices = @transform_4, window_bounds = array<i64: 1, 32>}, {pipeline_mode = #tpu.pipeline_mode<synchronous>, transform_indices = @transform_5, window_bounds = array<i64: 5, 5, 32, 32>}, {pipeline_mode = #tpu.pipeline_mode<synchronous>, transform_indices = @transform_6, window_bounds = array<i64: 5, 32>}, {pipeline_mode = #tpu.pipeline_mode<synchronous>, transform_indices = @transform_7, window_bounds = array<i64: 5, 32>}, {pipeline_mode = #tpu.pipeline_mode<synchronous>, transform_indices = @transform_8, window_bounds = array<i64: 5, 32>}, {pipeline_mode = #tpu.pipeline_mode<synchronous>, transform_indices = @transform_9, window_bounds = array<i64: 8, 32>}, {pipeline_mode = #tpu.pipeline_mode<synchronous>, transform_indices = @transform_10, window_bounds = array<i64: 8, 1>}, {transform_indices = @transform_11, window_bounds = array<i64: 8, 32>}]} {
    %c0 = arith.constant 0 : index
    %c0_0 = arith.constant 0 : index
    %0 = vector.load %arg3[%c0, %c0_0] : memref<32x1xf32, #tpu.memory_space<vmem>>, vector<32x1xf32>
    %c0_1 = arith.constant 0 : index
    %c0_2 = arith.constant 0 : index
    %1 = vector.load %arg4[%c0_1, %c0_2] : memref<1x32xf32, #tpu.memory_space<vmem>>, vector<1x32xf32>
    %2 = vector.broadcast %0 : vector<32x1xf32> to vector<32x32xf32>
    %3 = vector.broadcast %1 : vector<1x32xf32> to vector<32x32xf32>
    %4 = arith.mulf %2, %3 : vector<32x32xf32>
    %c0_3 = arith.constant 0 : index
    %c0_4 = arith.constant 0 : index
    %5 = vector.load %arg5[%c0_3, %c0_4] : memref<1x32xf32, #tpu.memory_space<vmem>>, vector<1x32xf32>
    %6 = math.sin %4 : vector<32x32xf32>
    %7 = vector.broadcast %5 : vector<1x32xf32> to vector<32x32xf32>
    %8 = arith.mulf %7, %6 : vector<32x32xf32>
    %cst = arith.constant 1.000000e+00 : f32
    %9 = vector.broadcast %cst : f32 to vector<1x32xf32>
    %10 = arith.subf %9, %5 : vector<1x32xf32>
    %11 = math.cos %4 : vector<32x32xf32>
    %12 = vector.broadcast %10 : vector<1x32xf32> to vector<32x32xf32>
    %13 = arith.mulf %12, %11 : vector<32x32xf32>
    %14 = arith.addf %8, %13 : vector<32x32xf32>
    %cst_5 = arith.constant 5.000000e-01 : f32
    %15 = vector.broadcast %cst_5 : f32 to vector<32x1xf32>
    %16 = arith.cmpf ogt, %0, %15 : vector<32x1xf32>
    %17 = arith.extui %16 : vector<32x1xi1> to vector<32x1xi32>
    %18 = arith.sitofp %17 : vector<32x1xi32> to vector<32x1xf32>
    %19 = vector.broadcast %18 : vector<32x1xf32> to vector<32x32xf32>
    %20 = arith.mulf %14, %19 : vector<32x32xf32>
    %c0_6 = arith.constant 0 : index
    %c0_7 = arith.constant 0 : index
    %21 = vector.load %arg2[%c0_6, %c0_7] : memref<32x32xf32, #tpu.memory_space<vmem>>, vector<32x32xf32>
    %c0_8 = arith.constant 0 : index
    %22 = memref.load %arg1[%c0_8] : memref<1xf32, #tpu.memory_space<smem>>
    %23 = vector.broadcast %22 : f32 to vector<32x32xf32>
    %24 = arith.mulf %23, %20 : vector<32x32xf32>
    %25 = arith.addf %21, %24 : vector<32x32xf32>
    %26 = tpu.iota {dimensions = array<i32: 0>} : vector<32x1xi32>
    %c16_i32 = arith.constant 16 : i32
    %c0_i32 = arith.constant 0 : i32
    %27 = arith.cmpi eq, %c16_i32, %c0_i32 : i32
    %c1_i32 = arith.constant 1 : i32
    %28 = arith.select %27, %c1_i32, %c16_i32 : i32
    %29 = vector.broadcast %28 : i32 to vector<32x1xi32>
    %30 = arith.remsi %26, %29 : vector<32x1xi32>
    %c0_i32_9 = arith.constant 0 : i32
    %31 = vector.broadcast %c0_i32_9 : i32 to vector<32x1xi32>
    %32 = arith.cmpi ne, %30, %31 : vector<32x1xi32>
    %c0_i32_10 = arith.constant 0 : i32
    %33 = vector.broadcast %c0_i32_10 : i32 to vector<32x1xi32>
    %34 = arith.cmpi slt, %30, %33 : vector<32x1xi32>
    %c0_i32_11 = arith.constant 0 : i32
    %35 = arith.cmpi slt, %28, %c0_i32_11 : i32
    %36 = vector.broadcast %35 : i1 to vector<32x1xi1>
    %37 = vector.broadcast %36 : vector<32x1xi1> to vector<32x1xi1>
    %38 = arith.xori %34, %37 : vector<32x1xi1>
    %39 = arith.andi %38, %32 : vector<32x1xi1>
    %40 = vector.broadcast %28 : i32 to vector<32x1xi32>
    %41 = arith.addi %30, %40 : vector<32x1xi32>
    %42 = arith.select %39, %41, %30 : vector<32x1xi1>, vector<32x1xi32>
    %c-2_i32 = arith.constant -2 : i32
    %43 = vector.broadcast %c-2_i32 : i32 to vector<32x1xi32>
    %44 = arith.addi %42, %43 : vector<32x1xi32>
    %c0_i32_12 = arith.constant 0 : i32
    %45 = vector.broadcast %c0_i32_12 : i32 to vector<32x1xi32>
    %46 = arith.cmpi sge, %44, %45 : vector<32x1xi32>
    %c16_i32_13 = arith.constant 16 : i32
    %47 = vector.broadcast %c16_i32_13 : i32 to vector<32x1xi32>
    %48 = arith.cmpi slt, %44, %47 : vector<32x1xi32>
    %49 = arith.andi %46, %48 : vector<32x1xi1>
    %50 = arith.extui %49 : vector<32x1xi1> to vector<32x1xi32>
    %51 = arith.sitofp %50 : vector<32x1xi32> to vector<32x1xf32>
    %c-1_i32 = arith.constant -1 : i32
    %52 = vector.broadcast %c-1_i32 : i32 to vector<32x1xi32>
    %53 = arith.addi %42, %52 : vector<32x1xi32>
    %c0_i32_14 = arith.constant 0 : i32
    %54 = vector.broadcast %c0_i32_14 : i32 to vector<32x1xi32>
    %55 = arith.cmpi sge, %53, %54 : vector<32x1xi32>
    %c16_i32_15 = arith.constant 16 : i32
    %56 = vector.broadcast %c16_i32_15 : i32 to vector<32x1xi32>
    %57 = arith.cmpi slt, %53, %56 : vector<32x1xi32>
    %58 = arith.andi %55, %57 : vector<32x1xi1>
    %59 = arith.extui %58 : vector<32x1xi1> to vector<32x1xi32>
    %60 = arith.sitofp %59 : vector<32x1xi32> to vector<32x1xf32>
    %c1_i32_16 = arith.constant 1 : i32
    %61 = vector.broadcast %c1_i32_16 : i32 to vector<32x1xi32>
    %62 = arith.addi %42, %61 : vector<32x1xi32>
    %c0_i32_17 = arith.constant 0 : i32
    %63 = vector.broadcast %c0_i32_17 : i32 to vector<32x1xi32>
    %64 = arith.cmpi sge, %62, %63 : vector<32x1xi32>
    %c16_i32_18 = arith.constant 16 : i32
    %65 = vector.broadcast %c16_i32_18 : i32 to vector<32x1xi32>
    %66 = arith.cmpi slt, %62, %65 : vector<32x1xi32>
    %67 = arith.andi %64, %66 : vector<32x1xi1>
    %68 = arith.extui %67 : vector<32x1xi1> to vector<32x1xi32>
    %69 = arith.sitofp %68 : vector<32x1xi32> to vector<32x1xf32>
    %c2_i32 = arith.constant 2 : i32
    %70 = vector.broadcast %c2_i32 : i32 to vector<32x1xi32>
    %71 = arith.addi %42, %70 : vector<32x1xi32>
    %c0_i32_19 = arith.constant 0 : i32
    %72 = vector.broadcast %c0_i32_19 : i32 to vector<32x1xi32>
    %73 = arith.cmpi sge, %71, %72 : vector<32x1xi32>
    %c16_i32_20 = arith.constant 16 : i32
    %74 = vector.broadcast %c16_i32_20 : i32 to vector<32x1xi32>
    %75 = arith.cmpi slt, %71, %74 : vector<32x1xi32>
    %76 = arith.andi %73, %75 : vector<32x1xi1>
    %77 = arith.extui %76 : vector<32x1xi1> to vector<32x1xi32>
    %78 = arith.sitofp %77 : vector<32x1xi32> to vector<32x1xf32>
    %79 = arith.truncf %25 : vector<32x32xf32> to vector<32x32xbf16>
    %c0_21 = arith.constant 0 : index
    %c2 = arith.constant 2 : index
    %c0_22 = arith.constant 0 : index
    %c0_23 = arith.constant 0 : index
    %80 = vector.load %arg6[%c0_21, %c2, %c0_22, %c0_23] : memref<5x5x32x32xbf16, #tpu.memory_space<vmem>>, vector<1x1x32x32xbf16>
    %81 = vector.shape_cast %80 : vector<1x1x32x32xbf16> to vector<32x32xbf16>
    %cst_24 = arith.constant dense<0.000000e+00> : vector<32x32xf32>
    %82 = tpu.matmul %79, %81, %cst_24 {dimension_numbers = #tpu.dot_dimension_numbers<[1], [0], [0], [1], [0, 0, 1, 1], [], []>} : vector<32x32xbf16>, vector<32x32xbf16>, vector<32x32xf32> -> vector<32x32xf32>
    %c0_25 = arith.constant 0 : index
    %c0_26 = arith.constant 0 : index
    %c0_27 = arith.constant 0 : index
    %c0_28 = arith.constant 0 : index
    %83 = vector.load %arg6[%c0_25, %c0_26, %c0_27, %c0_28] : memref<5x5x32x32xbf16, #tpu.memory_space<vmem>>, vector<1x1x32x32xbf16>
    %84 = vector.shape_cast %83 : vector<1x1x32x32xbf16> to vector<32x32xbf16>
    %cst_29 = arith.constant dense<0.000000e+00> : vector<32x32xf32>
    %85 = tpu.matmul %79, %84, %cst_29 {dimension_numbers = #tpu.dot_dimension_numbers<[1], [0], [0], [1], [0, 0, 1, 1], [], []>} : vector<32x32xbf16>, vector<32x32xbf16>, vector<32x32xf32> -> vector<32x32xf32>
    %c2_i32_30 = arith.constant 2 : i32
    %86 = tpu.dynamic_rotate %85 by %c2_i32_30 dim 0 : vector<32x32xf32>, i32 -> vector<32x32xf32>
    %87 = vector.broadcast %51 : vector<32x1xf32> to vector<32x32xf32>
    %88 = arith.mulf %87, %86 : vector<32x32xf32>
    %89 = arith.addf %82, %88 : vector<32x32xf32>
    %c0_31 = arith.constant 0 : index
    %c1 = arith.constant 1 : index
    %c0_32 = arith.constant 0 : index
    %c0_33 = arith.constant 0 : index
    %90 = vector.load %arg6[%c0_31, %c1, %c0_32, %c0_33] : memref<5x5x32x32xbf16, #tpu.memory_space<vmem>>, vector<1x1x32x32xbf16>
    %91 = vector.shape_cast %90 : vector<1x1x32x32xbf16> to vector<32x32xbf16>
    %cst_34 = arith.constant dense<0.000000e+00> : vector<32x32xf32>
    %92 = tpu.matmul %79, %91, %cst_34 {dimension_numbers = #tpu.dot_dimension_numbers<[1], [0], [0], [1], [0, 0, 1, 1], [], []>} : vector<32x32xbf16>, vector<32x32xbf16>, vector<32x32xf32> -> vector<32x32xf32>
    %c1_i32_35 = arith.constant 1 : i32
    %93 = tpu.dynamic_rotate %92 by %c1_i32_35 dim 0 : vector<32x32xf32>, i32 -> vector<32x32xf32>
    %94 = vector.broadcast %60 : vector<32x1xf32> to vector<32x32xf32>
    %95 = arith.mulf %94, %93 : vector<32x32xf32>
    %96 = arith.addf %89, %95 : vector<32x32xf32>
    %c0_36 = arith.constant 0 : index
    %c3 = arith.constant 3 : index
    %c0_37 = arith.constant 0 : index
    %c0_38 = arith.constant 0 : index
    %97 = vector.load %arg6[%c0_36, %c3, %c0_37, %c0_38] : memref<5x5x32x32xbf16, #tpu.memory_space<vmem>>, vector<1x1x32x32xbf16>
    %98 = vector.shape_cast %97 : vector<1x1x32x32xbf16> to vector<32x32xbf16>
    %cst_39 = arith.constant dense<0.000000e+00> : vector<32x32xf32>
    %99 = tpu.matmul %79, %98, %cst_39 {dimension_numbers = #tpu.dot_dimension_numbers<[1], [0], [0], [1], [0, 0, 1, 1], [], []>} : vector<32x32xbf16>, vector<32x32xbf16>, vector<32x32xf32> -> vector<32x32xf32>
    %c31_i32 = arith.constant 31 : i32
    %100 = tpu.dynamic_rotate %99 by %c31_i32 dim 0 : vector<32x32xf32>, i32 -> vector<32x32xf32>
    %101 = vector.broadcast %69 : vector<32x1xf32> to vector<32x32xf32>
    %102 = arith.mulf %101, %100 : vector<32x32xf32>
    %103 = arith.addf %96, %102 : vector<32x32xf32>
    %c0_40 = arith.constant 0 : index
    %c4 = arith.constant 4 : index
    %c0_41 = arith.constant 0 : index
    %c0_42 = arith.constant 0 : index
    %104 = vector.load %arg6[%c0_40, %c4, %c0_41, %c0_42] : memref<5x5x32x32xbf16, #tpu.memory_space<vmem>>, vector<1x1x32x32xbf16>
    %105 = vector.shape_cast %104 : vector<1x1x32x32xbf16> to vector<32x32xbf16>
    %cst_43 = arith.constant dense<0.000000e+00> : vector<32x32xf32>
    %106 = tpu.matmul %79, %105, %cst_43 {dimension_numbers = #tpu.dot_dimension_numbers<[1], [0], [0], [1], [0, 0, 1, 1], [], []>} : vector<32x32xbf16>, vector<32x32xbf16>, vector<32x32xf32> -> vector<32x32xf32>
    %c30_i32 = arith.constant 30 : i32
    %107 = tpu.dynamic_rotate %106 by %c30_i32 dim 0 : vector<32x32xf32>, i32 -> vector<32x32xf32>
    %108 = vector.broadcast %78 : vector<32x1xf32> to vector<32x32xf32>
    %109 = arith.mulf %108, %107 : vector<32x32xf32>
    %110 = arith.addf %103, %109 : vector<32x32xf32>
    %c0_44 = arith.constant 0 : index
    %c0_45 = arith.constant 0 : index
    %111 = vector.load %arg7[%c0_44, %c0_45] : memref<5x32xf32, #tpu.memory_space<vmem>>, vector<1x32xf32>
    %112 = vector.shape_cast %111 : vector<1x32xf32> to vector<32xf32>
    %113 = vector.shape_cast %112 : vector<32xf32> to vector<1x32xf32>
    %114 = vector.broadcast %113 : vector<1x32xf32> to vector<32x32xf32>
    %115 = arith.addf %110, %114 : vector<32x32xf32>
    %cst_46 = arith.constant 0.000000e+00 : f32
    %116 = vector.broadcast %cst_46 : f32 to vector<32x32xf32>
    %117 = arith.maximumf %115, %116 : vector<32x32xf32>
    %cst_47 = arith.constant dense<0.000000e+00> : vector<32xf32>
    %118 = vector.multi_reduction <add>, %117, %cst_47 [1] : vector<32x32xf32> to vector<32xf32>
    %119 = vector.shape_cast %118 : vector<32xf32> to vector<32x1xf32>
    %cst_48 = arith.constant 3.125000e-02 : f32
    %120 = vector.broadcast %cst_48 : f32 to vector<32x1xf32>
    %121 = arith.mulf %119, %120 : vector<32x1xf32>
    %122 = vector.broadcast %121 : vector<32x1xf32> to vector<32x32xf32>
    %123 = arith.subf %117, %122 : vector<32x32xf32>
    %124 = arith.mulf %123, %123 : vector<32x32xf32>
    %cst_49 = arith.constant dense<0.000000e+00> : vector<32xf32>
    %125 = vector.multi_reduction <add>, %124, %cst_49 [1] : vector<32x32xf32> to vector<32xf32>
    %126 = vector.shape_cast %125 : vector<32xf32> to vector<32x1xf32>
    %cst_50 = arith.constant 3.125000e-02 : f32
    %127 = vector.broadcast %cst_50 : f32 to vector<32x1xf32>
    %128 = arith.mulf %126, %127 : vector<32x1xf32>
    %cst_51 = arith.constant 9.99999996E-13 : f32
    %129 = vector.broadcast %cst_51 : f32 to vector<32x1xf32>
    %130 = arith.addf %128, %129 : vector<32x1xf32>
    %131 = math.rsqrt %130 : vector<32x1xf32>
    %132 = vector.broadcast %131 : vector<32x1xf32> to vector<32x32xf32>
    %133 = arith.mulf %123, %132 : vector<32x32xf32>
    %c0_52 = arith.constant 0 : index
    %c0_53 = arith.constant 0 : index
    %134 = vector.load %arg8[%c0_52, %c0_53] : memref<5x32xf32, #tpu.memory_space<vmem>>, vector<1x32xf32>
    %135 = vector.shape_cast %134 : vector<1x32xf32> to vector<32xf32>
    %136 = vector.shape_cast %135 : vector<32xf32> to vector<1x32xf32>
    %137 = vector.broadcast %136 : vector<1x32xf32> to vector<32x32xf32>
    %138 = arith.mulf %133, %137 : vector<32x32xf32>
    %c0_54 = arith.constant 0 : index
    %c0_55 = arith.constant 0 : index
    %139 = vector.load %arg9[%c0_54, %c0_55] : memref<5x32xf32, #tpu.memory_space<vmem>>, vector<1x32xf32>
    %140 = vector.shape_cast %139 : vector<1x32xf32> to vector<32xf32>
    %141 = vector.shape_cast %140 : vector<32xf32> to vector<1x32xf32>
    %142 = vector.broadcast %141 : vector<1x32xf32> to vector<32x32xf32>
    %143 = arith.addf %138, %142 : vector<32x32xf32>
    %144 = arith.truncf %143 : vector<32x32xf32> to vector<32x32xbf16>
    %c1_56 = arith.constant 1 : index
    %c2_57 = arith.constant 2 : index
    %c0_58 = arith.constant 0 : index
    %c0_59 = arith.constant 0 : index
    %145 = vector.load %arg6[%c1_56, %c2_57, %c0_58, %c0_59] : memref<5x5x32x32xbf16, #tpu.memory_space<vmem>>, vector<1x1x32x32xbf16>
    %146 = vector.shape_cast %145 : vector<1x1x32x32xbf16> to vector<32x32xbf16>
    %cst_60 = arith.constant dense<0.000000e+00> : vector<32x32xf32>
    %147 = tpu.matmul %144, %146, %cst_60 {dimension_numbers = #tpu.dot_dimension_numbers<[1], [0], [0], [1], [0, 0, 1, 1], [], []>} : vector<32x32xbf16>, vector<32x32xbf16>, vector<32x32xf32> -> vector<32x32xf32>
    %c1_61 = arith.constant 1 : index
    %c0_62 = arith.constant 0 : index
    %c0_63 = arith.constant 0 : index
    %c0_64 = arith.constant 0 : index
    %148 = vector.load %arg6[%c1_61, %c0_62, %c0_63, %c0_64] : memref<5x5x32x32xbf16, #tpu.memory_space<vmem>>, vector<1x1x32x32xbf16>
    %149 = vector.shape_cast %148 : vector<1x1x32x32xbf16> to vector<32x32xbf16>
    %cst_65 = arith.constant dense<0.000000e+00> : vector<32x32xf32>
    %150 = tpu.matmul %144, %149, %cst_65 {dimension_numbers = #tpu.dot_dimension_numbers<[1], [0], [0], [1], [0, 0, 1, 1], [], []>} : vector<32x32xbf16>, vector<32x32xbf16>, vector<32x32xf32> -> vector<32x32xf32>
    %c2_i32_66 = arith.constant 2 : i32
    %151 = tpu.dynamic_rotate %150 by %c2_i32_66 dim 0 : vector<32x32xf32>, i32 -> vector<32x32xf32>
    %152 = vector.broadcast %51 : vector<32x1xf32> to vector<32x32xf32>
    %153 = arith.mulf %152, %151 : vector<32x32xf32>
    %154 = arith.addf %147, %153 : vector<32x32xf32>
    %c1_67 = arith.constant 1 : index
    %c1_68 = arith.constant 1 : index
    %c0_69 = arith.constant 0 : index
    %c0_70 = arith.constant 0 : index
    %155 = vector.load %arg6[%c1_67, %c1_68, %c0_69, %c0_70] : memref<5x5x32x32xbf16, #tpu.memory_space<vmem>>, vector<1x1x32x32xbf16>
    %156 = vector.shape_cast %155 : vector<1x1x32x32xbf16> to vector<32x32xbf16>
    %cst_71 = arith.constant dense<0.000000e+00> : vector<32x32xf32>
    %157 = tpu.matmul %144, %156, %cst_71 {dimension_numbers = #tpu.dot_dimension_numbers<[1], [0], [0], [1], [0, 0, 1, 1], [], []>} : vector<32x32xbf16>, vector<32x32xbf16>, vector<32x32xf32> -> vector<32x32xf32>
    %c1_i32_72 = arith.constant 1 : i32
    %158 = tpu.dynamic_rotate %157 by %c1_i32_72 dim 0 : vector<32x32xf32>, i32 -> vector<32x32xf32>
    %159 = vector.broadcast %60 : vector<32x1xf32> to vector<32x32xf32>
    %160 = arith.mulf %159, %158 : vector<32x32xf32>
    %161 = arith.addf %154, %160 : vector<32x32xf32>
    %c1_73 = arith.constant 1 : index
    %c3_74 = arith.constant 3 : index
    %c0_75 = arith.constant 0 : index
    %c0_76 = arith.constant 0 : index
    %162 = vector.load %arg6[%c1_73, %c3_74, %c0_75, %c0_76] : memref<5x5x32x32xbf16, #tpu.memory_space<vmem>>, vector<1x1x32x32xbf16>
    %163 = vector.shape_cast %162 : vector<1x1x32x32xbf16> to vector<32x32xbf16>
    %cst_77 = arith.constant dense<0.000000e+00> : vector<32x32xf32>
    %164 = tpu.matmul %144, %163, %cst_77 {dimension_numbers = #tpu.dot_dimension_numbers<[1], [0], [0], [1], [0, 0, 1, 1], [], []>} : vector<32x32xbf16>, vector<32x32xbf16>, vector<32x32xf32> -> vector<32x32xf32>
    %c31_i32_78 = arith.constant 31 : i32
    %165 = tpu.dynamic_rotate %164 by %c31_i32_78 dim 0 : vector<32x32xf32>, i32 -> vector<32x32xf32>
    %166 = vector.broadcast %69 : vector<32x1xf32> to vector<32x32xf32>
    %167 = arith.mulf %166, %165 : vector<32x32xf32>
    %168 = arith.addf %161, %167 : vector<32x32xf32>
    %c1_79 = arith.constant 1 : index
    %c4_80 = arith.constant 4 : index
    %c0_81 = arith.constant 0 : index
    %c0_82 = arith.constant 0 : index
    %169 = vector.load %arg6[%c1_79, %c4_80, %c0_81, %c0_82] : memref<5x5x32x32xbf16, #tpu.memory_space<vmem>>, vector<1x1x32x32xbf16>
    %170 = vector.shape_cast %169 : vector<1x1x32x32xbf16> to vector<32x32xbf16>
    %cst_83 = arith.constant dense<0.000000e+00> : vector<32x32xf32>
    %171 = tpu.matmul %144, %170, %cst_83 {dimension_numbers = #tpu.dot_dimension_numbers<[1], [0], [0], [1], [0, 0, 1, 1], [], []>} : vector<32x32xbf16>, vector<32x32xbf16>, vector<32x32xf32> -> vector<32x32xf32>
    %c30_i32_84 = arith.constant 30 : i32
    %172 = tpu.dynamic_rotate %171 by %c30_i32_84 dim 0 : vector<32x32xf32>, i32 -> vector<32x32xf32>
    %173 = vector.broadcast %78 : vector<32x1xf32> to vector<32x32xf32>
    %174 = arith.mulf %173, %172 : vector<32x32xf32>
    %175 = arith.addf %168, %174 : vector<32x32xf32>
    %c1_85 = arith.constant 1 : index
    %c0_86 = arith.constant 0 : index
    %176 = vector.load %arg7[%c1_85, %c0_86] : memref<5x32xf32, #tpu.memory_space<vmem>>, vector<1x32xf32>
    %177 = vector.shape_cast %176 : vector<1x32xf32> to vector<32xf32>
    %178 = vector.shape_cast %177 : vector<32xf32> to vector<1x32xf32>
    %179 = vector.broadcast %178 : vector<1x32xf32> to vector<32x32xf32>
    %180 = arith.addf %175, %179 : vector<32x32xf32>
    %cst_87 = arith.constant 0.000000e+00 : f32
    %181 = vector.broadcast %cst_87 : f32 to vector<32x32xf32>
    %182 = arith.maximumf %180, %181 : vector<32x32xf32>
    %cst_88 = arith.constant dense<0.000000e+00> : vector<32xf32>
    %183 = vector.multi_reduction <add>, %182, %cst_88 [1] : vector<32x32xf32> to vector<32xf32>
    %184 = vector.shape_cast %183 : vector<32xf32> to vector<32x1xf32>
    %cst_89 = arith.constant 3.125000e-02 : f32
    %185 = vector.broadcast %cst_89 : f32 to vector<32x1xf32>
    %186 = arith.mulf %184, %185 : vector<32x1xf32>
    %187 = vector.broadcast %186 : vector<32x1xf32> to vector<32x32xf32>
    %188 = arith.subf %182, %187 : vector<32x32xf32>
    %189 = arith.mulf %188, %188 : vector<32x32xf32>
    %cst_90 = arith.constant dense<0.000000e+00> : vector<32xf32>
    %190 = vector.multi_reduction <add>, %189, %cst_90 [1] : vector<32x32xf32> to vector<32xf32>
    %191 = vector.shape_cast %190 : vector<32xf32> to vector<32x1xf32>
    %cst_91 = arith.constant 3.125000e-02 : f32
    %192 = vector.broadcast %cst_91 : f32 to vector<32x1xf32>
    %193 = arith.mulf %191, %192 : vector<32x1xf32>
    %cst_92 = arith.constant 9.99999996E-13 : f32
    %194 = vector.broadcast %cst_92 : f32 to vector<32x1xf32>
    %195 = arith.addf %193, %194 : vector<32x1xf32>
    %196 = math.rsqrt %195 : vector<32x1xf32>
    %197 = vector.broadcast %196 : vector<32x1xf32> to vector<32x32xf32>
    %198 = arith.mulf %188, %197 : vector<32x32xf32>
    %c1_93 = arith.constant 1 : index
    %c0_94 = arith.constant 0 : index
    %199 = vector.load %arg8[%c1_93, %c0_94] : memref<5x32xf32, #tpu.memory_space<vmem>>, vector<1x32xf32>
    %200 = vector.shape_cast %199 : vector<1x32xf32> to vector<32xf32>
    %201 = vector.shape_cast %200 : vector<32xf32> to vector<1x32xf32>
    %202 = vector.broadcast %201 : vector<1x32xf32> to vector<32x32xf32>
    %203 = arith.mulf %198, %202 : vector<32x32xf32>
    %c1_95 = arith.constant 1 : index
    %c0_96 = arith.constant 0 : index
    %204 = vector.load %arg9[%c1_95, %c0_96] : memref<5x32xf32, #tpu.memory_space<vmem>>, vector<1x32xf32>
    %205 = vector.shape_cast %204 : vector<1x32xf32> to vector<32xf32>
    %206 = vector.shape_cast %205 : vector<32xf32> to vector<1x32xf32>
    %207 = vector.broadcast %206 : vector<1x32xf32> to vector<32x32xf32>
    %208 = arith.addf %203, %207 : vector<32x32xf32>
    %209 = arith.truncf %208 : vector<32x32xf32> to vector<32x32xbf16>
    %c2_97 = arith.constant 2 : index
    %c2_98 = arith.constant 2 : index
    %c0_99 = arith.constant 0 : index
    %c0_100 = arith.constant 0 : index
    %210 = vector.load %arg6[%c2_97, %c2_98, %c0_99, %c0_100] : memref<5x5x32x32xbf16, #tpu.memory_space<vmem>>, vector<1x1x32x32xbf16>
    %211 = vector.shape_cast %210 : vector<1x1x32x32xbf16> to vector<32x32xbf16>
    %cst_101 = arith.constant dense<0.000000e+00> : vector<32x32xf32>
    %212 = tpu.matmul %209, %211, %cst_101 {dimension_numbers = #tpu.dot_dimension_numbers<[1], [0], [0], [1], [0, 0, 1, 1], [], []>} : vector<32x32xbf16>, vector<32x32xbf16>, vector<32x32xf32> -> vector<32x32xf32>
    %c2_102 = arith.constant 2 : index
    %c0_103 = arith.constant 0 : index
    %c0_104 = arith.constant 0 : index
    %c0_105 = arith.constant 0 : index
    %213 = vector.load %arg6[%c2_102, %c0_103, %c0_104, %c0_105] : memref<5x5x32x32xbf16, #tpu.memory_space<vmem>>, vector<1x1x32x32xbf16>
    %214 = vector.shape_cast %213 : vector<1x1x32x32xbf16> to vector<32x32xbf16>
    %cst_106 = arith.constant dense<0.000000e+00> : vector<32x32xf32>
    %215 = tpu.matmul %209, %214, %cst_106 {dimension_numbers = #tpu.dot_dimension_numbers<[1], [0], [0], [1], [0, 0, 1, 1], [], []>} : vector<32x32xbf16>, vector<32x32xbf16>, vector<32x32xf32> -> vector<32x32xf32>
    %c2_i32_107 = arith.constant 2 : i32
    %216 = tpu.dynamic_rotate %215 by %c2_i32_107 dim 0 : vector<32x32xf32>, i32 -> vector<32x32xf32>
    %217 = vector.broadcast %51 : vector<32x1xf32> to vector<32x32xf32>
    %218 = arith.mulf %217, %216 : vector<32x32xf32>
    %219 = arith.addf %212, %218 : vector<32x32xf32>
    %c2_108 = arith.constant 2 : index
    %c1_109 = arith.constant 1 : index
    %c0_110 = arith.constant 0 : index
    %c0_111 = arith.constant 0 : index
    %220 = vector.load %arg6[%c2_108, %c1_109, %c0_110, %c0_111] : memref<5x5x32x32xbf16, #tpu.memory_space<vmem>>, vector<1x1x32x32xbf16>
    %221 = vector.shape_cast %220 : vector<1x1x32x32xbf16> to vector<32x32xbf16>
    %cst_112 = arith.constant dense<0.000000e+00> : vector<32x32xf32>
    %222 = tpu.matmul %209, %221, %cst_112 {dimension_numbers = #tpu.dot_dimension_numbers<[1], [0], [0], [1], [0, 0, 1, 1], [], []>} : vector<32x32xbf16>, vector<32x32xbf16>, vector<32x32xf32> -> vector<32x32xf32>
    %c1_i32_113 = arith.constant 1 : i32
    %223 = tpu.dynamic_rotate %222 by %c1_i32_113 dim 0 : vector<32x32xf32>, i32 -> vector<32x32xf32>
    %224 = vector.broadcast %60 : vector<32x1xf32> to vector<32x32xf32>
    %225 = arith.mulf %224, %223 : vector<32x32xf32>
    %226 = arith.addf %219, %225 : vector<32x32xf32>
    %c2_114 = arith.constant 2 : index
    %c3_115 = arith.constant 3 : index
    %c0_116 = arith.constant 0 : index
    %c0_117 = arith.constant 0 : index
    %227 = vector.load %arg6[%c2_114, %c3_115, %c0_116, %c0_117] : memref<5x5x32x32xbf16, #tpu.memory_space<vmem>>, vector<1x1x32x32xbf16>
    %228 = vector.shape_cast %227 : vector<1x1x32x32xbf16> to vector<32x32xbf16>
    %cst_118 = arith.constant dense<0.000000e+00> : vector<32x32xf32>
    %229 = tpu.matmul %209, %228, %cst_118 {dimension_numbers = #tpu.dot_dimension_numbers<[1], [0], [0], [1], [0, 0, 1, 1], [], []>} : vector<32x32xbf16>, vector<32x32xbf16>, vector<32x32xf32> -> vector<32x32xf32>
    %c31_i32_119 = arith.constant 31 : i32
    %230 = tpu.dynamic_rotate %229 by %c31_i32_119 dim 0 : vector<32x32xf32>, i32 -> vector<32x32xf32>
    %231 = vector.broadcast %69 : vector<32x1xf32> to vector<32x32xf32>
    %232 = arith.mulf %231, %230 : vector<32x32xf32>
    %233 = arith.addf %226, %232 : vector<32x32xf32>
    %c2_120 = arith.constant 2 : index
    %c4_121 = arith.constant 4 : index
    %c0_122 = arith.constant 0 : index
    %c0_123 = arith.constant 0 : index
    %234 = vector.load %arg6[%c2_120, %c4_121, %c0_122, %c0_123] : memref<5x5x32x32xbf16, #tpu.memory_space<vmem>>, vector<1x1x32x32xbf16>
    %235 = vector.shape_cast %234 : vector<1x1x32x32xbf16> to vector<32x32xbf16>
    %cst_124 = arith.constant dense<0.000000e+00> : vector<32x32xf32>
    %236 = tpu.matmul %209, %235, %cst_124 {dimension_numbers = #tpu.dot_dimension_numbers<[1], [0], [0], [1], [0, 0, 1, 1], [], []>} : vector<32x32xbf16>, vector<32x32xbf16>, vector<32x32xf32> -> vector<32x32xf32>
    %c30_i32_125 = arith.constant 30 : i32
    %237 = tpu.dynamic_rotate %236 by %c30_i32_125 dim 0 : vector<32x32xf32>, i32 -> vector<32x32xf32>
    %238 = vector.broadcast %78 : vector<32x1xf32> to vector<32x32xf32>
    %239 = arith.mulf %238, %237 : vector<32x32xf32>
    %240 = arith.addf %233, %239 : vector<32x32xf32>
    %c2_126 = arith.constant 2 : index
    %c0_127 = arith.constant 0 : index
    %241 = vector.load %arg7[%c2_126, %c0_127] : memref<5x32xf32, #tpu.memory_space<vmem>>, vector<1x32xf32>
    %242 = vector.shape_cast %241 : vector<1x32xf32> to vector<32xf32>
    %243 = vector.shape_cast %242 : vector<32xf32> to vector<1x32xf32>
    %244 = vector.broadcast %243 : vector<1x32xf32> to vector<32x32xf32>
    %245 = arith.addf %240, %244 : vector<32x32xf32>
    %cst_128 = arith.constant 0.000000e+00 : f32
    %246 = vector.broadcast %cst_128 : f32 to vector<32x32xf32>
    %247 = arith.maximumf %245, %246 : vector<32x32xf32>
    %cst_129 = arith.constant dense<0.000000e+00> : vector<32xf32>
    %248 = vector.multi_reduction <add>, %247, %cst_129 [1] : vector<32x32xf32> to vector<32xf32>
    %249 = vector.shape_cast %248 : vector<32xf32> to vector<32x1xf32>
    %cst_130 = arith.constant 3.125000e-02 : f32
    %250 = vector.broadcast %cst_130 : f32 to vector<32x1xf32>
    %251 = arith.mulf %249, %250 : vector<32x1xf32>
    %252 = vector.broadcast %251 : vector<32x1xf32> to vector<32x32xf32>
    %253 = arith.subf %247, %252 : vector<32x32xf32>
    %254 = arith.mulf %253, %253 : vector<32x32xf32>
    %cst_131 = arith.constant dense<0.000000e+00> : vector<32xf32>
    %255 = vector.multi_reduction <add>, %254, %cst_131 [1] : vector<32x32xf32> to vector<32xf32>
    %256 = vector.shape_cast %255 : vector<32xf32> to vector<32x1xf32>
    %cst_132 = arith.constant 3.125000e-02 : f32
    %257 = vector.broadcast %cst_132 : f32 to vector<32x1xf32>
    %258 = arith.mulf %256, %257 : vector<32x1xf32>
    %cst_133 = arith.constant 9.99999996E-13 : f32
    %259 = vector.broadcast %cst_133 : f32 to vector<32x1xf32>
    %260 = arith.addf %258, %259 : vector<32x1xf32>
    %261 = math.rsqrt %260 : vector<32x1xf32>
    %262 = vector.broadcast %261 : vector<32x1xf32> to vector<32x32xf32>
    %263 = arith.mulf %253, %262 : vector<32x32xf32>
    %c2_134 = arith.constant 2 : index
    %c0_135 = arith.constant 0 : index
    %264 = vector.load %arg8[%c2_134, %c0_135] : memref<5x32xf32, #tpu.memory_space<vmem>>, vector<1x32xf32>
    %265 = vector.shape_cast %264 : vector<1x32xf32> to vector<32xf32>
    %266 = vector.shape_cast %265 : vector<32xf32> to vector<1x32xf32>
    %267 = vector.broadcast %266 : vector<1x32xf32> to vector<32x32xf32>
    %268 = arith.mulf %263, %267 : vector<32x32xf32>
    %c2_136 = arith.constant 2 : index
    %c0_137 = arith.constant 0 : index
    %269 = vector.load %arg9[%c2_136, %c0_137] : memref<5x32xf32, #tpu.memory_space<vmem>>, vector<1x32xf32>
    %270 = vector.shape_cast %269 : vector<1x32xf32> to vector<32xf32>
    %271 = vector.shape_cast %270 : vector<32xf32> to vector<1x32xf32>
    %272 = vector.broadcast %271 : vector<1x32xf32> to vector<32x32xf32>
    %273 = arith.addf %268, %272 : vector<32x32xf32>
    %274 = arith.truncf %273 : vector<32x32xf32> to vector<32x32xbf16>
    %c3_138 = arith.constant 3 : index
    %c2_139 = arith.constant 2 : index
    %c0_140 = arith.constant 0 : index
    %c0_141 = arith.constant 0 : index
    %275 = vector.load %arg6[%c3_138, %c2_139, %c0_140, %c0_141] : memref<5x5x32x32xbf16, #tpu.memory_space<vmem>>, vector<1x1x32x32xbf16>
    %276 = vector.shape_cast %275 : vector<1x1x32x32xbf16> to vector<32x32xbf16>
    %cst_142 = arith.constant dense<0.000000e+00> : vector<32x32xf32>
    %277 = tpu.matmul %274, %276, %cst_142 {dimension_numbers = #tpu.dot_dimension_numbers<[1], [0], [0], [1], [0, 0, 1, 1], [], []>} : vector<32x32xbf16>, vector<32x32xbf16>, vector<32x32xf32> -> vector<32x32xf32>
    %c3_143 = arith.constant 3 : index
    %c0_144 = arith.constant 0 : index
    %c0_145 = arith.constant 0 : index
    %c0_146 = arith.constant 0 : index
    %278 = vector.load %arg6[%c3_143, %c0_144, %c0_145, %c0_146] : memref<5x5x32x32xbf16, #tpu.memory_space<vmem>>, vector<1x1x32x32xbf16>
    %279 = vector.shape_cast %278 : vector<1x1x32x32xbf16> to vector<32x32xbf16>
    %cst_147 = arith.constant dense<0.000000e+00> : vector<32x32xf32>
    %280 = tpu.matmul %274, %279, %cst_147 {dimension_numbers = #tpu.dot_dimension_numbers<[1], [0], [0], [1], [0, 0, 1, 1], [], []>} : vector<32x32xbf16>, vector<32x32xbf16>, vector<32x32xf32> -> vector<32x32xf32>
    %c2_i32_148 = arith.constant 2 : i32
    %281 = tpu.dynamic_rotate %280 by %c2_i32_148 dim 0 : vector<32x32xf32>, i32 -> vector<32x32xf32>
    %282 = vector.broadcast %51 : vector<32x1xf32> to vector<32x32xf32>
    %283 = arith.mulf %282, %281 : vector<32x32xf32>
    %284 = arith.addf %277, %283 : vector<32x32xf32>
    %c3_149 = arith.constant 3 : index
    %c1_150 = arith.constant 1 : index
    %c0_151 = arith.constant 0 : index
    %c0_152 = arith.constant 0 : index
    %285 = vector.load %arg6[%c3_149, %c1_150, %c0_151, %c0_152] : memref<5x5x32x32xbf16, #tpu.memory_space<vmem>>, vector<1x1x32x32xbf16>
    %286 = vector.shape_cast %285 : vector<1x1x32x32xbf16> to vector<32x32xbf16>
    %cst_153 = arith.constant dense<0.000000e+00> : vector<32x32xf32>
    %287 = tpu.matmul %274, %286, %cst_153 {dimension_numbers = #tpu.dot_dimension_numbers<[1], [0], [0], [1], [0, 0, 1, 1], [], []>} : vector<32x32xbf16>, vector<32x32xbf16>, vector<32x32xf32> -> vector<32x32xf32>
    %c1_i32_154 = arith.constant 1 : i32
    %288 = tpu.dynamic_rotate %287 by %c1_i32_154 dim 0 : vector<32x32xf32>, i32 -> vector<32x32xf32>
    %289 = vector.broadcast %60 : vector<32x1xf32> to vector<32x32xf32>
    %290 = arith.mulf %289, %288 : vector<32x32xf32>
    %291 = arith.addf %284, %290 : vector<32x32xf32>
    %c3_155 = arith.constant 3 : index
    %c3_156 = arith.constant 3 : index
    %c0_157 = arith.constant 0 : index
    %c0_158 = arith.constant 0 : index
    %292 = vector.load %arg6[%c3_155, %c3_156, %c0_157, %c0_158] : memref<5x5x32x32xbf16, #tpu.memory_space<vmem>>, vector<1x1x32x32xbf16>
    %293 = vector.shape_cast %292 : vector<1x1x32x32xbf16> to vector<32x32xbf16>
    %cst_159 = arith.constant dense<0.000000e+00> : vector<32x32xf32>
    %294 = tpu.matmul %274, %293, %cst_159 {dimension_numbers = #tpu.dot_dimension_numbers<[1], [0], [0], [1], [0, 0, 1, 1], [], []>} : vector<32x32xbf16>, vector<32x32xbf16>, vector<32x32xf32> -> vector<32x32xf32>
    %c31_i32_160 = arith.constant 31 : i32
    %295 = tpu.dynamic_rotate %294 by %c31_i32_160 dim 0 : vector<32x32xf32>, i32 -> vector<32x32xf32>
    %296 = vector.broadcast %69 : vector<32x1xf32> to vector<32x32xf32>
    %297 = arith.mulf %296, %295 : vector<32x32xf32>
    %298 = arith.addf %291, %297 : vector<32x32xf32>
    %c3_161 = arith.constant 3 : index
    %c4_162 = arith.constant 4 : index
    %c0_163 = arith.constant 0 : index
    %c0_164 = arith.constant 0 : index
    %299 = vector.load %arg6[%c3_161, %c4_162, %c0_163, %c0_164] : memref<5x5x32x32xbf16, #tpu.memory_space<vmem>>, vector<1x1x32x32xbf16>
    %300 = vector.shape_cast %299 : vector<1x1x32x32xbf16> to vector<32x32xbf16>
    %cst_165 = arith.constant dense<0.000000e+00> : vector<32x32xf32>
    %301 = tpu.matmul %274, %300, %cst_165 {dimension_numbers = #tpu.dot_dimension_numbers<[1], [0], [0], [1], [0, 0, 1, 1], [], []>} : vector<32x32xbf16>, vector<32x32xbf16>, vector<32x32xf32> -> vector<32x32xf32>
    %c30_i32_166 = arith.constant 30 : i32
    %302 = tpu.dynamic_rotate %301 by %c30_i32_166 dim 0 : vector<32x32xf32>, i32 -> vector<32x32xf32>
    %303 = vector.broadcast %78 : vector<32x1xf32> to vector<32x32xf32>
    %304 = arith.mulf %303, %302 : vector<32x32xf32>
    %305 = arith.addf %298, %304 : vector<32x32xf32>
    %c3_167 = arith.constant 3 : index
    %c0_168 = arith.constant 0 : index
    %306 = vector.load %arg7[%c3_167, %c0_168] : memref<5x32xf32, #tpu.memory_space<vmem>>, vector<1x32xf32>
    %307 = vector.shape_cast %306 : vector<1x32xf32> to vector<32xf32>
    %308 = vector.shape_cast %307 : vector<32xf32> to vector<1x32xf32>
    %309 = vector.broadcast %308 : vector<1x32xf32> to vector<32x32xf32>
    %310 = arith.addf %305, %309 : vector<32x32xf32>
    %cst_169 = arith.constant 0.000000e+00 : f32
    %311 = vector.broadcast %cst_169 : f32 to vector<32x32xf32>
    %312 = arith.maximumf %310, %311 : vector<32x32xf32>
    %cst_170 = arith.constant dense<0.000000e+00> : vector<32xf32>
    %313 = vector.multi_reduction <add>, %312, %cst_170 [1] : vector<32x32xf32> to vector<32xf32>
    %314 = vector.shape_cast %313 : vector<32xf32> to vector<32x1xf32>
    %cst_171 = arith.constant 3.125000e-02 : f32
    %315 = vector.broadcast %cst_171 : f32 to vector<32x1xf32>
    %316 = arith.mulf %314, %315 : vector<32x1xf32>
    %317 = vector.broadcast %316 : vector<32x1xf32> to vector<32x32xf32>
    %318 = arith.subf %312, %317 : vector<32x32xf32>
    %319 = arith.mulf %318, %318 : vector<32x32xf32>
    %cst_172 = arith.constant dense<0.000000e+00> : vector<32xf32>
    %320 = vector.multi_reduction <add>, %319, %cst_172 [1] : vector<32x32xf32> to vector<32xf32>
    %321 = vector.shape_cast %320 : vector<32xf32> to vector<32x1xf32>
    %cst_173 = arith.constant 3.125000e-02 : f32
    %322 = vector.broadcast %cst_173 : f32 to vector<32x1xf32>
    %323 = arith.mulf %321, %322 : vector<32x1xf32>
    %cst_174 = arith.constant 9.99999996E-13 : f32
    %324 = vector.broadcast %cst_174 : f32 to vector<32x1xf32>
    %325 = arith.addf %323, %324 : vector<32x1xf32>
    %326 = math.rsqrt %325 : vector<32x1xf32>
    %327 = vector.broadcast %326 : vector<32x1xf32> to vector<32x32xf32>
    %328 = arith.mulf %318, %327 : vector<32x32xf32>
    %c3_175 = arith.constant 3 : index
    %c0_176 = arith.constant 0 : index
    %329 = vector.load %arg8[%c3_175, %c0_176] : memref<5x32xf32, #tpu.memory_space<vmem>>, vector<1x32xf32>
    %330 = vector.shape_cast %329 : vector<1x32xf32> to vector<32xf32>
    %331 = vector.shape_cast %330 : vector<32xf32> to vector<1x32xf32>
    %332 = vector.broadcast %331 : vector<1x32xf32> to vector<32x32xf32>
    %333 = arith.mulf %328, %332 : vector<32x32xf32>
    %c3_177 = arith.constant 3 : index
    %c0_178 = arith.constant 0 : index
    %334 = vector.load %arg9[%c3_177, %c0_178] : memref<5x32xf32, #tpu.memory_space<vmem>>, vector<1x32xf32>
    %335 = vector.shape_cast %334 : vector<1x32xf32> to vector<32xf32>
    %336 = vector.shape_cast %335 : vector<32xf32> to vector<1x32xf32>
    %337 = vector.broadcast %336 : vector<1x32xf32> to vector<32x32xf32>
    %338 = arith.addf %333, %337 : vector<32x32xf32>
    %339 = arith.truncf %338 : vector<32x32xf32> to vector<32x32xbf16>
    %c4_179 = arith.constant 4 : index
    %c2_180 = arith.constant 2 : index
    %c0_181 = arith.constant 0 : index
    %c0_182 = arith.constant 0 : index
    %340 = vector.load %arg6[%c4_179, %c2_180, %c0_181, %c0_182] : memref<5x5x32x32xbf16, #tpu.memory_space<vmem>>, vector<1x1x32x32xbf16>
    %341 = vector.shape_cast %340 : vector<1x1x32x32xbf16> to vector<32x32xbf16>
    %cst_183 = arith.constant dense<0.000000e+00> : vector<32x32xf32>
    %342 = tpu.matmul %339, %341, %cst_183 {dimension_numbers = #tpu.dot_dimension_numbers<[1], [0], [0], [1], [0, 0, 1, 1], [], []>} : vector<32x32xbf16>, vector<32x32xbf16>, vector<32x32xf32> -> vector<32x32xf32>
    %c4_184 = arith.constant 4 : index
    %c0_185 = arith.constant 0 : index
    %c0_186 = arith.constant 0 : index
    %c0_187 = arith.constant 0 : index
    %343 = vector.load %arg6[%c4_184, %c0_185, %c0_186, %c0_187] : memref<5x5x32x32xbf16, #tpu.memory_space<vmem>>, vector<1x1x32x32xbf16>
    %344 = vector.shape_cast %343 : vector<1x1x32x32xbf16> to vector<32x32xbf16>
    %cst_188 = arith.constant dense<0.000000e+00> : vector<32x32xf32>
    %345 = tpu.matmul %339, %344, %cst_188 {dimension_numbers = #tpu.dot_dimension_numbers<[1], [0], [0], [1], [0, 0, 1, 1], [], []>} : vector<32x32xbf16>, vector<32x32xbf16>, vector<32x32xf32> -> vector<32x32xf32>
    %c2_i32_189 = arith.constant 2 : i32
    %346 = tpu.dynamic_rotate %345 by %c2_i32_189 dim 0 : vector<32x32xf32>, i32 -> vector<32x32xf32>
    %347 = vector.broadcast %51 : vector<32x1xf32> to vector<32x32xf32>
    %348 = arith.mulf %347, %346 : vector<32x32xf32>
    %349 = arith.addf %342, %348 : vector<32x32xf32>
    %c4_190 = arith.constant 4 : index
    %c1_191 = arith.constant 1 : index
    %c0_192 = arith.constant 0 : index
    %c0_193 = arith.constant 0 : index
    %350 = vector.load %arg6[%c4_190, %c1_191, %c0_192, %c0_193] : memref<5x5x32x32xbf16, #tpu.memory_space<vmem>>, vector<1x1x32x32xbf16>
    %351 = vector.shape_cast %350 : vector<1x1x32x32xbf16> to vector<32x32xbf16>
    %cst_194 = arith.constant dense<0.000000e+00> : vector<32x32xf32>
    %352 = tpu.matmul %339, %351, %cst_194 {dimension_numbers = #tpu.dot_dimension_numbers<[1], [0], [0], [1], [0, 0, 1, 1], [], []>} : vector<32x32xbf16>, vector<32x32xbf16>, vector<32x32xf32> -> vector<32x32xf32>
    %c1_i32_195 = arith.constant 1 : i32
    %353 = tpu.dynamic_rotate %352 by %c1_i32_195 dim 0 : vector<32x32xf32>, i32 -> vector<32x32xf32>
    %354 = vector.broadcast %60 : vector<32x1xf32> to vector<32x32xf32>
    %355 = arith.mulf %354, %353 : vector<32x32xf32>
    %356 = arith.addf %349, %355 : vector<32x32xf32>
    %c4_196 = arith.constant 4 : index
    %c3_197 = arith.constant 3 : index
    %c0_198 = arith.constant 0 : index
    %c0_199 = arith.constant 0 : index
    %357 = vector.load %arg6[%c4_196, %c3_197, %c0_198, %c0_199] : memref<5x5x32x32xbf16, #tpu.memory_space<vmem>>, vector<1x1x32x32xbf16>
    %358 = vector.shape_cast %357 : vector<1x1x32x32xbf16> to vector<32x32xbf16>
    %cst_200 = arith.constant dense<0.000000e+00> : vector<32x32xf32>
    %359 = tpu.matmul %339, %358, %cst_200 {dimension_numbers = #tpu.dot_dimension_numbers<[1], [0], [0], [1], [0, 0, 1, 1], [], []>} : vector<32x32xbf16>, vector<32x32xbf16>, vector<32x32xf32> -> vector<32x32xf32>
    %c31_i32_201 = arith.constant 31 : i32
    %360 = tpu.dynamic_rotate %359 by %c31_i32_201 dim 0 : vector<32x32xf32>, i32 -> vector<32x32xf32>
    %361 = vector.broadcast %69 : vector<32x1xf32> to vector<32x32xf32>
    %362 = arith.mulf %361, %360 : vector<32x32xf32>
    %363 = arith.addf %356, %362 : vector<32x32xf32>
    %c4_202 = arith.constant 4 : index
    %c4_203 = arith.constant 4 : index
    %c0_204 = arith.constant 0 : index
    %c0_205 = arith.constant 0 : index
    %364 = vector.load %arg6[%c4_202, %c4_203, %c0_204, %c0_205] : memref<5x5x32x32xbf16, #tpu.memory_space<vmem>>, vector<1x1x32x32xbf16>
    %365 = vector.shape_cast %364 : vector<1x1x32x32xbf16> to vector<32x32xbf16>
    %cst_206 = arith.constant dense<0.000000e+00> : vector<32x32xf32>
    %366 = tpu.matmul %339, %365, %cst_206 {dimension_numbers = #tpu.dot_dimension_numbers<[1], [0], [0], [1], [0, 0, 1, 1], [], []>} : vector<32x32xbf16>, vector<32x32xbf16>, vector<32x32xf32> -> vector<32x32xf32>
    %c30_i32_207 = arith.constant 30 : i32
    %367 = tpu.dynamic_rotate %366 by %c30_i32_207 dim 0 : vector<32x32xf32>, i32 -> vector<32x32xf32>
    %368 = vector.broadcast %78 : vector<32x1xf32> to vector<32x32xf32>
    %369 = arith.mulf %368, %367 : vector<32x32xf32>
    %370 = arith.addf %363, %369 : vector<32x32xf32>
    %c4_208 = arith.constant 4 : index
    %c0_209 = arith.constant 0 : index
    %371 = vector.load %arg7[%c4_208, %c0_209] : memref<5x32xf32, #tpu.memory_space<vmem>>, vector<1x32xf32>
    %372 = vector.shape_cast %371 : vector<1x32xf32> to vector<32xf32>
    %373 = vector.shape_cast %372 : vector<32xf32> to vector<1x32xf32>
    %374 = vector.broadcast %373 : vector<1x32xf32> to vector<32x32xf32>
    %375 = arith.addf %370, %374 : vector<32x32xf32>
    %cst_210 = arith.constant 0.000000e+00 : f32
    %376 = vector.broadcast %cst_210 : f32 to vector<32x32xf32>
    %377 = arith.maximumf %375, %376 : vector<32x32xf32>
    %cst_211 = arith.constant dense<0.000000e+00> : vector<32xf32>
    %378 = vector.multi_reduction <add>, %377, %cst_211 [1] : vector<32x32xf32> to vector<32xf32>
    %379 = vector.shape_cast %378 : vector<32xf32> to vector<32x1xf32>
    %cst_212 = arith.constant 3.125000e-02 : f32
    %380 = vector.broadcast %cst_212 : f32 to vector<32x1xf32>
    %381 = arith.mulf %379, %380 : vector<32x1xf32>
    %382 = vector.broadcast %381 : vector<32x1xf32> to vector<32x32xf32>
    %383 = arith.subf %377, %382 : vector<32x32xf32>
    %384 = arith.mulf %383, %383 : vector<32x32xf32>
    %cst_213 = arith.constant dense<0.000000e+00> : vector<32xf32>
    %385 = vector.multi_reduction <add>, %384, %cst_213 [1] : vector<32x32xf32> to vector<32xf32>
    %386 = vector.shape_cast %385 : vector<32xf32> to vector<32x1xf32>
    %cst_214 = arith.constant 3.125000e-02 : f32
    %387 = vector.broadcast %cst_214 : f32 to vector<32x1xf32>
    %388 = arith.mulf %386, %387 : vector<32x1xf32>
    %cst_215 = arith.constant 9.99999996E-13 : f32
    %389 = vector.broadcast %cst_215 : f32 to vector<32x1xf32>
    %390 = arith.addf %388, %389 : vector<32x1xf32>
    %391 = math.rsqrt %390 : vector<32x1xf32>
    %392 = vector.broadcast %391 : vector<32x1xf32> to vector<32x32xf32>
    %393 = arith.mulf %383, %392 : vector<32x32xf32>
    %c4_216 = arith.constant 4 : index
    %c0_217 = arith.constant 0 : index
    %394 = vector.load %arg8[%c4_216, %c0_217] : memref<5x32xf32, #tpu.memory_space<vmem>>, vector<1x32xf32>
    %395 = vector.shape_cast %394 : vector<1x32xf32> to vector<32xf32>
    %396 = vector.shape_cast %395 : vector<32xf32> to vector<1x32xf32>
    %397 = vector.broadcast %396 : vector<1x32xf32> to vector<32x32xf32>
    %398 = arith.mulf %393, %397 : vector<32x32xf32>
    %c4_218 = arith.constant 4 : index
    %c0_219 = arith.constant 0 : index
    %399 = vector.load %arg9[%c4_218, %c0_219] : memref<5x32xf32, #tpu.memory_space<vmem>>, vector<1x32xf32>
    %400 = vector.shape_cast %399 : vector<1x32xf32> to vector<32xf32>
    %401 = vector.shape_cast %400 : vector<32xf32> to vector<1x32xf32>
    %402 = vector.broadcast %401 : vector<1x32xf32> to vector<32x32xf32>
    %403 = arith.addf %398, %402 : vector<32x32xf32>
    %c0_220 = arith.constant 0 : index
    %c0_221 = arith.constant 0 : index
    %404 = vector.load %arg10[%c0_220, %c0_221] : memref<8x32xbf16, #tpu.memory_space<vmem>>, vector<8x32xbf16>
    %405 = arith.truncf %403 : vector<32x32xf32> to vector<32x32xbf16>
    "tpu.trace_start"() <{level = 10 : i32, message = "oc,tc->ot"}> : () -> ()
    %cst_222 = arith.constant dense<0.000000e+00> : vector<8x32xf32>
    %406 = tpu.matmul %404, %405, %cst_222 {dimension_numbers = #tpu.dot_dimension_numbers<[1], [1], [0], [0], [0, 0, 1, 0], [], []>} : vector<8x32xbf16>, vector<32x32xbf16>, vector<8x32xf32> -> vector<8x32xf32>
    "tpu.trace_stop"() : () -> ()
    %c0_223 = arith.constant 0 : index
    %c0_224 = arith.constant 0 : index
    %407 = vector.load %arg11[%c0_223, %c0_224] : memref<8x1xf32, #tpu.memory_space<vmem>>, vector<8x1xf32>
    %408 = vector.broadcast %407 : vector<8x1xf32> to vector<8x32xf32>
    %409 = arith.addf %406, %408 : vector<8x32xf32>
    %c0_225 = arith.constant 0 : index
    %c0_226 = arith.constant 0 : index
    %410 = vector.load %arg12[%c0_225, %c0_226] : memref<8x32xf32, #tpu.memory_space<vmem>>, vector<8x32xf32>
    tpu.vector_store %arg12[%c0_225, %c0_226], %409 {strides = array<i32>} : memref<8x32xf32, #tpu.memory_space<vmem>>, vector<8x32xf32>,
    return
  }
  func.func @transform_0(%arg0: i32) -> i32 {
    %c0_i32 = arith.constant 0 : i32
    %c0_i32_0 = arith.constant 0 : i32
    return %c0_i32 : i32
  }
  func.func @transform_1(%arg0: i32) -> (i32, i32) {
    %c0_i32 = arith.constant 0 : i32
    %c0_i32_0 = arith.constant 0 : i32
    return %arg0, %c0_i32 : i32, i32
  }
  func.func @transform_2(%arg0: i32) -> (i32, i32) {
    %c0_i32 = arith.constant 0 : i32
    %c0_i32_0 = arith.constant 0 : i32
    return %arg0, %c0_i32 : i32, i32
  }
  func.func @transform_3(%arg0: i32) -> (i32, i32) {
    %c0_i32 = arith.constant 0 : i32
    %c0_i32_0 = arith.constant 0 : i32
    %c0_i32_1 = arith.constant 0 : i32
    return %c0_i32, %c0_i32_0 : i32, i32
  }
  func.func @transform_4(%arg0: i32) -> (i32, i32) {
    %c0_i32 = arith.constant 0 : i32
    %c0_i32_0 = arith.constant 0 : i32
    %c0_i32_1 = arith.constant 0 : i32
    return %c0_i32, %c0_i32_0 : i32, i32
  }
  func.func @transform_5(%arg0: i32) -> (i32, i32, i32, i32) {
    %c0_i32 = arith.constant 0 : i32
    %c0_i32_0 = arith.constant 0 : i32
    %c0_i32_1 = arith.constant 0 : i32
    %c0_i32_2 = arith.constant 0 : i32
    %c0_i32_3 = arith.constant 0 : i32
    return %c0_i32, %c0_i32_0, %c0_i32_1, %c0_i32_2 : i32, i32, i32, i32
  }
  func.func @transform_6(%arg0: i32) -> (i32, i32) {
    %c0_i32 = arith.constant 0 : i32
    %c0_i32_0 = arith.constant 0 : i32
    %c0_i32_1 = arith.constant 0 : i32
    return %c0_i32, %c0_i32_0 : i32, i32
  }
  func.func @transform_7(%arg0: i32) -> (i32, i32) {
    %c0_i32 = arith.constant 0 : i32
    %c0_i32_0 = arith.constant 0 : i32
    %c0_i32_1 = arith.constant 0 : i32
    return %c0_i32, %c0_i32_0 : i32, i32
  }
  func.func @transform_8(%arg0: i32) -> (i32, i32) {
    %c0_i32 = arith.constant 0 : i32
    %c0_i32_0 = arith.constant 0 : i32
    %c0_i32_1 = arith.constant 0 : i32
    return %c0_i32, %c0_i32_0 : i32, i32
  }
  func.func @transform_9(%arg0: i32) -> (i32, i32) {
    %c0_i32 = arith.constant 0 : i32
    %c0_i32_0 = arith.constant 0 : i32
    %c0_i32_1 = arith.constant 0 : i32
    return %c0_i32, %c0_i32_0 : i32, i32
  }
  func.func @transform_10(%arg0: i32) -> (i32, i32) {
    %c0_i32 = arith.constant 0 : i32
    %c0_i32_0 = arith.constant 0 : i32
    %c0_i32_1 = arith.constant 0 : i32
    return %c0_i32, %c0_i32_0 : i32, i32
  }
  func.func @transform_11(%arg0: i32) -> (i32, i32) {
    %c0_i32 = arith.constant 0 : i32
    %c0_i32_0 = arith.constant 0 : i32
    return %c0_i32, %arg0 : i32, i32
  }
}

</mosaic_0001>

<bundles_post_ra>
// kernel: tpu_custom_call.1
= control target key start
LH: loop header
LB: loop body
LE: loop exit
PB: predicated region body
PF: predicated region fallthrough
CT: control target
= control target key end

     0   :  { %17 = vsyncpa [#allocation4], 0  ;;  %s5195_s0 = inlined_call_operand.<no memory space> [shape: f32[1], index: 0, kind: input, shape index: {}]   ;;  %s5196_s1 = inlined_call_operand.vmem [shape: f32[32,32], index: 1, kind: input, shape index: {}]   ;;  %s5197_s2 = inlined_call_operand.vmem [shape: f32[32,1], index: 2, kind: input, shape index: {}]   ;;  %s5198_s3 = inlined_call_operand.hbm [shape: f32[1,32], index: 3, kind: input, shape index: {}]   ;;  %s5199_s4 = inlined_call_operand.hbm [shape: f32[1,32], index: 4, kind: input, shape index: {}]   ;;  %s5200_s5 = inlined_call_operand.hbm [shape: bf16[5,5,32,32], index: 5, kind: input, shape index: {}]   ;;  %s5201_s6 = inlined_call_operand.vmem [shape: f32[5,32], index: 6, kind: input, shape index: {}]   ;;  %s5202_s7 = inlined_call_operand.vmem [shape: f32[5,32], index: 7, kind: input, shape index: {}]   ;;  %s5203_s8 = inlined_call_operand.hbm [shape: f32[5,32], index: 8, kind: input, shape index: {}]   ;;  %s5204_s9 = inlined_call_operand.hbm [shape: bf16[8,32], index: 9, kind: input, shape index: {}]   ;;  %s5205_s10 = inlined_call_operand.vmem [shape: f32[8,1], index: 10, kind: input, shape index: {}]   ;;  %s5206_s11 = inlined_call_operand.hbm [shape: f32[8,32], index: 11, kind: output, shape index: {}]  }
   0x1   :  { %18 = vsyncpa [#allocation7], 0 }
   0x2   :  { %19 = vsyncpa [#allocation10], 0  ;;  %s43_s19 = sshll.u32 %s5199_s4, 4  ;;  %s44_s19 = int_to_ptr.hbm [resolvable:$true] %s43_s19 }
   0x3   :  { %20 = vsyncpa [#allocation5], 0  ;;  %s4020_s20 = smov [#allocation6]   ;;  %s71_s24 = sshll.u32 %s5203_s8, 4  ;;  %s72_s24 = int_to_ptr.hbm [resolvable:$true] %s71_s24 }
   0x4   :  { %s45_s21 = sshll.u32 %s4020_s20, 4  ;;  %s4021_s25 = smov [#allocation9]   ;;  %s46_s21 = int_to_ptr.vmem [resolvable:$true] %s45_s21 }
   0x5   :  { %48 = dma.hbm_to_vmem [thread:$0]  %s44_s19, 16, %s46_s21, [#allocation7]  }
   0x6   :  { %s73_s26 = sshll.u32 %s4021_s25, 4  ;;  %s32_s29 = sshll.u32 %s5198_s3, 4  ;;  %s74_s26 = int_to_ptr.vmem [resolvable:$true] %s73_s26  ;;  %s33_s29 = int_to_ptr.hbm [resolvable:$true] %s32_s29 }
   0x7   :  { %76 = dma.hbm_to_vmem [thread:$0]  %s72_s24, 128, %s74_s26, [#allocation10]  }
   0x8   :  { %s53_s12 = sshll.u32 %s5200_s5, 4  ;;  %s4022_s13 = smov [#allocation3]   ;;  %s54_s12 = int_to_ptr.hbm [resolvable:$true] %s53_s12 }
   0x9   :  { %s34_s14 = sshll.u32 %s4022_s13, 4  ;;  %s4023_s8 = smov [#allocation8]   ;;  %s35_s14 = int_to_ptr.vmem [resolvable:$true] %s34_s14 }
   0xa   :  { %37 = dma.hbm_to_vmem [thread:$0]  %s33_s29, 16, %s35_s14, [#allocation4]  }
   0xb   :  { %s55_s15 = sshll.u32 %s4023_s8, 4  ;;  %s4024_s16 = smov 64   ;;  %s56_s15 = int_to_ptr.vmem [resolvable:$true] %s55_s15 }
   0xc   :  { %s4025_s17 = smov 4   ;;  %s82_s19 = sshll.u32 %s5204_s9, 4  ;;  %s83_s19 = int_to_ptr.hbm [resolvable:$true] %s82_s19 }
   0xd   :  { %61 = dma.hbm_to_vmem [thread:$0]  %s54_s12, 6400, %s56_s15, [#allocation7], %s4024_s16, %s4024_s16, %s4025_s17  }
   0xe   :  { %s4026_s20 = smov [#allocation11]  }
   0xf   :  { %s84_s21 = sshll.u32 %s4026_s20, 4  ;;  %s85_s21 = int_to_ptr.vmem [resolvable:$true] %s84_s21 }
  0x10   :  { %87 = dma.hbm_to_vmem [thread:$0]  %s83_s19, 64, %s85_s21, [#allocation10]  }
  0x11   :  { %4012 = dma.done.wait [#allocation4], 16  }
  0x12   :  { %4013 = vsyncadd [#allocation4], 4294967280 }
  0x13   :  { %4014 = dma.done.wait [#allocation7], 6416  }
  0x14   :  { %4015 = vsyncadd [#allocation7], 4294960880 }
  0x15   :  { %4016 = dma.done.wait [#allocation10], 192  }
  0x16   :  { %4017 = vsyncadd [#allocation10], 4294967104  ;;  %v4027_v0 = vmov 0   ;;  %v113_v1 = vld [vmem:[%s5197_s2 + $0x10] sm:$0xff]  ;;  %v4120_v2 = vld [vmem:[%s5197_s2] sm:$0xff]  ;;  %v4028_v5 = vmov 0.0  }
  0x17   :  { %3799 = vset.pattern.permute.xlu1 %v4027_v0  ;;  %3798 = vset.pattern.permute.xlu0 %v4027_v0  ;;  %v114_v3 = vld [vmem:[%s5197_s2 + $0x18] sm:$0xff]  ;;  %v4129_v4 = vld [vmem:[%s5197_s2 + $0x8] sm:$0xff]  ;;  %vm1401_vm0 = vcmp.gt.f32.partialorder %v113_v1, 0.5  ;;  %v4134_v9 = vld [vmem:[#allocation3] ss:$0 sm:$0xff]  ;;  %s3431_s12 = sshll.u32 %s5206_s11, 4  ;;  %s3432_s12 = int_to_ptr.hbm [resolvable:$true] %s3431_s12 }
  0x18   :  { %3800 = vset.pattern.permute.xlu2 %v4027_v0  ;;  %128 = vperm.xlu0 %3798, %v113_v1   ;;  %vm1402_vm1 = vcmp.gt.f32.partialorder %v114_v3, 0.5  ;;  %v3469_v6 = vsel %vm1401_vm0, 1.0, %v4028_v5  ;;  %v4029_v41 = vmov 683565275   ;;  %v4030_v43 = vmov 2475754826  }
  0x19   :  { %118 = vperm.xlu1 %3799, %v4120_v2   ;;  %v3470_v7 = vsel %vm1402_vm1, 1.0, %v4028_v5  ;;  %v4031_v47 = vmov 2131351028   ;;  %v4032_v50 = vmov 2102212464  }
  0x1a   :  { %v3801_v8 = vpack.i.bf16 %v3470_v7, %v3469_v6  ;;  %v4033_v53 = vmov 920167782   ;;  %v4034_v56 = vmov 1326507024  }
  0x1c   :  { %3802 = vperm.xlu2 %3800, %v3801_v8  }
  0x20   :  { %133 = vperm.xlu0 %3798, %v114_v3  }
  0x21   :  { %123 = vperm.xlu1 %3799, %v4129_v4  }
  0x8a   :  { %v129_v10 = vpop.permute.xlu0 %128 }
  0x8b   :  { %v119_v11 = vpop.permute.xlu1 %118  ;;  %v4137_v12 = vmul.f32 %v4134_v9, %v129_v10 }
  0x8c   :  { %v4140_v13 = vmul.f32 %v4134_v9, %v119_v11 }
  0x8d   :  { %v454_v14 = vand.u32 2147483647, %v4137_v12  ;;  %v457_v15 = vand.u32 2139095040, %v4137_v12 }
  0x8e   :  { %v144_v16 = vand.u32 2147483647, %v4140_v13  ;;  %v147_v17 = vand.u32 2139095040, %v4140_v13 }
  0x8f   :  { %v458_v18 = vshrl.u32 %v457_v15, 23  ;;  %v461_v19 = vand.u32 8388607, %v454_v14 }
  0x90   :  { %v148_v20 = vshrl.u32 %v147_v17, 23  ;;  %v151_v21 = vand.u32 8388607, %v144_v16 }
  0x91   :  { %v3449_v22 = vadd.s32 4294967169, %v458_v18  ;;  %v462_v23 = vor.u32 8388608, %v461_v19 }
  0x92   :  { %v3443_v24 = vadd.s32 4294967169, %v148_v20  ;;  %v152_v25 = vor.u32 8388608, %v151_v21  ;;  %v134_v30 = vpop.permute.xlu0 %133 }
  0x93   :  { %v464_v26 = vadd.s32 1, %v3449_v22  ;;  %v4150_v27 = vshll.u32 %v462_v23, 8  ;;  %v4158_v35 = vmul.f32 %v4134_v9, %v134_v30 }
  0x94   :  { %v154_v28 = vadd.s32 1, %v3443_v24  ;;  %v4152_v29 = vshll.u32 %v152_v25, 8 }
  0x95   :  { %vm465_vm2 = vcmp.gt.s32.totalorder %v464_v26, 0  ;;  %v4155_v34 = vand.u32 65535, %v4150_v27  ;;  %v4161_v37 = vshrl.u32 %v4150_v27, 16 }
  0x96   :  { %v466_v31 = vsel %vm465_vm2, %v464_v26, 0  ;;  %vm155_vm3 = vcmp.gt.s32.totalorder %v154_v28, 0  ;;  %v4166_v39 = vand.u32 65535, %v4152_v29  ;;  %v4173_v45 = vshrl.u32 %v4152_v29, 16 }
  0x97   :  { %v468_v32 = vand.u32 31, %v466_v31  ;;  %v156_v33 = vsel %vm155_vm3, %v154_v28, 0  ;;  %v4168_v40 = vshrl.u32 %v466_v31, 5 }
  0x98   :  { %v4163_v38 = vand.u32 31, %v156_v33  ;;  %v4215_v31 = vshrl.u32 %v156_v33, 5 }
  0x99   :  { %v469_v36 = vsub.s32 32, %v468_v32  ;;  %v471_v42 = vshll.u32 %v4029_v41, %v468_v32  ;;  %v474_v44 = vshll.u32 %v4030_v43, %v468_v32  ;;  %v477_v49 = vshll.u32 %v4031_v47, %v468_v32 }
  0x9a   :  { %v480_v52 = vshll.u32 %v4032_v50, %v468_v32  ;;  %v483_v55 = vshll.u32 %v4033_v53, %v468_v32  ;;  %v4184_v61 = vsub.s32 32, %v4163_v38  ;;  %vm486_vm4 = vcmp.lt.s32.totalorder %v4168_v40, 1 }
  0x9b   :  { %v472_v46 = vshrl.u32 %v4030_v43, %v469_v36  ;;  %v475_v48 = vshrl.u32 %v4031_v47, %v469_v36  ;;  %v478_v51 = vshrl.u32 %v4032_v50, %v469_v36  ;;  %v481_v54 = vshrl.u32 %v4033_v53, %v469_v36 }
  0x9c   :  { %v484_v57 = vshrl.u32 %v4034_v56, %v469_v36  ;;  %vm487_vm5 = vcmp.lt.s32.totalorder %v4168_v40, 2  ;;  %vm488_vm6 = vcmp.lt.s32.totalorder %v4168_v40, 3  ;;  %vm489_vm7 = vcmp.lt.s32.totalorder %v4168_v40, 4 }
  0x9d   :  { %v473_v58 = vor.u32 %v472_v46, %v471_v42  ;;  %v476_v59 = vor.u32 %v475_v48, %v474_v44  ;;  %v479_v60 = vor.u32 %v478_v51, %v477_v49  ;;  %v482_v62 = vor.u32 %v481_v54, %v480_v52 }
  0x9e   :  { %v485_v63 = vor.u32 %v484_v57, %v483_v55  ;;  %v161_v8 = vshll.u32 %v4029_v41, %v4163_v38  ;;  %v164_v10 = vshll.u32 %v4030_v43, %v4163_v38  ;;  %v162_v18 = vshrl.u32 %v4030_v43, %v4184_v61 }
  0x9f   :  { %v494_v1 = vsel %vm486_vm4, %v473_v58, %v476_v59  ;;  %v498_v3 = vsel %vm486_vm4, %v476_v59, %v479_v60  ;;  %v495_v6 = vsel %vm489_vm7, %v482_v62, 920167782  ;;  %v491_v11 = vsel %vm489_vm7, %v479_v60, 2102212464 }
  0xa0   :  { %v499_v7 = vsel %vm489_vm7, %v485_v63, 1326507024  ;;  %v496_v15 = vsel %vm488_vm6, %v479_v60, %v495_v6  ;;  %v470_v19 = vshrl.u32 %v4029_v41, %v469_v36  ;;  %v165_v22 = vshrl.u32 %v4031_v47, %v4184_v61 }
  0xa1   :  { %v500_v17 = vsel %vm488_vm6, %v482_v62, %v499_v7  ;;  %v497_v20 = vsel %vm487_vm5, %v494_v1, %v496_v15  ;;  %v492_v30 = vsel %vm488_vm6, %v476_v59, %v491_v11  ;;  %v4217_v32 = vor.u32 %v162_v18, %v161_v8 }
  0xa2   :  { %v501_v21 = vsel %vm487_vm5, %v498_v3, %v500_v17  ;;  %v527_v25 = vand.u32 65535, %v497_v20  ;;  %v528_v26 = vshrl.u32 %v497_v20, 16  ;;  %v490_v28 = vsel %vm486_vm4, %v470_v19, %v473_v58 }
  0xa3   :  { %v505_v23 = vand.u32 65535, %v501_v21  ;;  %v506_v24 = vshrl.u32 %v501_v21, 16  ;;  %v4221_v44 = vor.u32 %v165_v22, %v164_v10  ;;  %v167_v46 = vshll.u32 %v4031_v47, %v4163_v38 }
  0xa4   :  { %v530_v49 = vmul.u32 %v528_v26, %v4155_v34  ;;  %v531_v51 = vmul.u32 %v527_v25, %v4161_v37  ;;  %v168_v33 = vshrl.u32 %v4032_v50, %v4184_v61  ;;  %v529_v55 = vmul.u32 %v527_v25, %v4155_v34 }
  0xa5   :  { %v508_v36 = vmul.u32 %v506_v24, %v4155_v34  ;;  %v509_v42 = vmul.u32 %v505_v23, %v4161_v37  ;;  %v507_v48 = vmul.u32 %v505_v23, %v4155_v34  ;;  %v510_v52 = vmul.u32 %v506_v24, %v4161_v37 }
  0xa6   :  { %v532_v57 = vmul.u32 %v528_v26, %v4161_v37  ;;  %v533_v62 = vshll.u32 %v530_v49, 16  ;;  %v535_v1 = vshll.u32 %v531_v51, 16  ;;  %v170_v3 = vshll.u32 %v4032_v50, %v4163_v38 }
  0xa7   :  { %v511_v54 = vshll.u32 %v508_v36, 16  ;;  %v512_v58 = vshrl.u32 %v508_v36, 16  ;;  %v513_v59 = vshll.u32 %v509_v42, 16  ;;  %v514_v60 = vshrl.u32 %v509_v42, 16 }
  0xa8   :  { %vm537_vm9 = vc.u32 %v529_v55, %v533_v62  ;;  %v539_v7 = vadd.s32 %v533_v62, %v529_v55  ;;  %v171_v8 = vshrl.u32 %v4033_v53, %v4184_v61  ;;  %v173_v10 = vshll.u32 %v4033_v53, %v4163_v38 }
  0xa9   :  { %vm515_vm8 = vc.u32 %v507_v48, %v511_v54  ;;  %v517_v63 = vadd.s32 %v511_v54, %v507_v48  ;;  %v538_v37 = vsel %vm537_vm9, 1, %v4027_v0  ;;  %v169_v17 = vor.u32 %v168_v33, %v167_v46 }
  0xaa   :  { %v516_v6 = vsel %vm515_vm8, 1, %v4027_v0  ;;  %v540_v15 = vadd.s32 %v538_v37, %v532_v57  ;;  %vm541_vm11 = vc.u32 %v539_v7, %v535_v1  ;;  %v172_v20 = vor.u32 %v171_v8, %v170_v3 }
  0xab   :  { %v518_v34 = vadd.s32 %v516_v6, %v510_v52  ;;  %vm519_vm10 = vc.u32 %v517_v63, %v513_v59  ;;  %v542_v19 = vsel %vm541_vm11, 1, %v4027_v0  ;;  %v174_v21 = vshrl.u32 %v4034_v56, %v4184_v61 }
  0xac   :  { %v520_v11 = vsel %vm519_vm10, 1, %v4027_v0  ;;  %v534_v22 = vshrl.u32 %v530_v49, 16  ;;  %v544_v23 = vadd.s32 %v542_v19, %v540_v15  ;;  %vm176_vm12 = vcmp.lt.s32.totalorder %v4215_v31, 1 }
  0xad   :  { %v522_v18 = vadd.s32 %v520_v11, %v518_v34  ;;  %vm178_vm13 = vcmp.lt.s32.totalorder %v4215_v31, 3  ;;  %v175_v38 = vor.u32 %v174_v21, %v173_v10  ;;  %vm177_vm14 = vcmp.lt.s32.totalorder %v4215_v31, 2 }
  0xae   :  { %vm179_vm15 = vcmp.lt.s32.totalorder %v4215_v31, 4  ;;  %v536_v25 = vshrl.u32 %v531_v51, 16  ;;  %v545_v26 = vadd.s32 %v544_v23, %v534_v22  ;;  %v184_v36 = vsel %vm176_vm12, %v4217_v32, %v4221_v44 }
  0xaf   :  { %v523_v24 = vadd.s32 %v522_v18, %v512_v58  ;;  %v185_v42 = vsel %vm179_vm15, %v172_v20, 920167782  ;;  %v4257_v48 = vadd.s32 %v539_v7, %v535_v1  ;;  %v188_v51 = vsel %vm176_vm12, %v4221_v44, %v169_v17 }
  0xb0   :  { %v186_v49 = vsel %vm178_vm13, %v169_v17, %v185_v42  ;;  %v493_v33 = vsel %vm487_vm5, %v490_v28, %v492_v30  ;;  %v546_v52 = vadd.s32 %v545_v26, %v536_v25  ;;  %v189_v55 = vsel %vm179_vm15, %v175_v38, 1326507024 }
  0xb1   :  { %v4255_v46 = vadd.s32 %v523_v24, %v514_v60  ;;  %v187_v54 = vsel %vm177_vm14, %v184_v36, %v186_v49  ;;  %v190_v57 = vsel %vm178_vm13, %v172_v20, %v189_v55  ;;  %v547_v28 = vmul.u32 %v4150_v27, %v493_v33 }
  0xb2   :  { %v217_v58 = vand.u32 65535, %v187_v54  ;;  %v550_v59 = vadd.s32 1, %v546_v52  ;;  %v191_v60 = vsel %vm177_vm14, %v188_v51, %v190_v57  ;;  %v218_v40 = vshrl.u32 %v187_v54, 16 }
  0xb3   :  { %vm549_vm0 = vc.u32 %v4255_v46, %v4257_v48  ;;  %v195_v30 = vand.u32 65535, %v191_v60  ;;  %v196_v62 = vshrl.u32 %v191_v60, 16  ;;  %v612_v7 = vand.u32 2139095040, %v4158_v35 }
  0xb4   :  { %v221_v63 = vmul.u32 %v217_v58, %v4173_v45  ;;  %v551_v1 = vsel %vm549_vm0, %v550_v59, %v546_v52  ;;  %v219_v3 = vmul.u32 %v217_v58, %v4166_v39  ;;  %v220_v6 = vmul.u32 %v218_v40, %v4166_v39 }
  0xb5   :  { %v552_v8 = vadd.s32 %v551_v1, %v547_v28  ;;  %v197_v34 = vmul.u32 %v195_v30, %v4166_v39  ;;  %v198_v37 = vmul.u32 %v196_v62, %v4166_v39  ;;  %v199_v10 = vmul.u32 %v195_v30, %v4173_v45 }
  0xb6   :  { %v160_v27 = vshrl.u32 %v4029_v41, %v4184_v61  ;;  %v222_v11 = vmul.u32 %v218_v40, %v4173_v45  ;;  %v223_v15 = vshll.u32 %v220_v6, 16  ;;  %v225_v18 = vshll.u32 %v221_v63, 16 }
  0xb7   :  { %v553_v19 = vadd.s32 536870912, %v552_v8  ;;  %v200_v20 = vmul.u32 %v196_v62, %v4173_v45  ;;  %v201_v21 = vshll.u32 %v198_v37, 16  ;;  %v203_v22 = vshll.u32 %v199_v10, 16 }
  0xb8   :  { %v181_v23 = vsel %vm179_vm15, %v169_v17, 2102212464  ;;  %vm227_vm1 = vc.u32 %v219_v3, %v223_v15  ;;  %v229_v24 = vadd.s32 %v223_v15, %v219_v3  ;;  %v613_v39 = vshrl.u32 %v612_v7, 23 }
  0xb9   :  { %v4290_v38 = vshrl.u32 %v553_v19, 30  ;;  %vm205_vm2 = vc.u32 %v197_v34, %v201_v21  ;;  %v207_v25 = vadd.s32 %v201_v21, %v197_v34  ;;  %v228_v61 = vsel %vm227_vm1, 1, %v4027_v0 }
  0xba   :  { %v180_v26 = vsel %vm176_vm12, %v160_v27, %v4217_v32  ;;  %v206_v45 = vsel %vm205_vm2, 1, %v4027_v0  ;;  %v230_v36 = vadd.s32 %v228_v61, %v222_v11  ;;  %vm231_vm3 = vc.u32 %v229_v24, %v225_v18 }
  0xbb   :  { %v555_v42 = vshll.u32 %v4290_v38, 30  ;;  %v182_v17 = vsel %vm178_vm13, %v4221_v44, %v181_v23  ;;  %v208_v49 = vadd.s32 %v206_v45, %v200_v20  ;;  %vm209_vm4 = vc.u32 %v207_v25, %v203_v22 }
  0xbc   :  { %v210_v51 = vsel %vm209_vm4, 1, %v4027_v0  ;;  %v224_v33 = vshrl.u32 %v220_v6, 16  ;;  %v232_v52 = vsel %vm231_vm3, 1, %v4027_v0  ;;  %v3452_v54 = vadd.s32 4294967169, %v613_v39 }
  0xbd   :  { %v4303_v55 = vsub.s32 %v552_v8, %v555_v42  ;;  %v202_v32 = vshrl.u32 %v198_v37, 16  ;;  %v212_v57 = vadd.s32 %v210_v51, %v208_v49  ;;  %v234_v58 = vadd.s32 %v232_v52, %v230_v36 }
  0xbe   :  { %v204_v59 = vshrl.u32 %v199_v10, 16  ;;  %v226_v60 = vshrl.u32 %v221_v63, 16  ;;  %v609_v40 = vand.u32 2147483647, %v4158_v35  ;;  %v619_v28 = vadd.s32 1, %v3452_v54 }
  0xbf   :  { %vm557_vm5 = vcmp.lt.s32.totalorder %v4303_v55, 0  ;;  %v558_v44 = vsub.s32 0, %v4303_v55  ;;  %v213_v30 = vadd.s32 %v212_v57, %v202_v32  ;;  %v235_v62 = vadd.s32 %v234_v58, %v224_v33 }
  0xc0   :  { %v183_v1 = vsel %vm177_vm14, %v180_v26, %v182_v17  ;;  %v4310_v3 = vadd.s32 %v229_v24, %v225_v18  ;;  %vm620_vm6 = vcmp.gt.s32.totalorder %v619_v28, 0  ;;  %v616_v37 = vand.u32 8388607, %v609_v40 }
  0xc1   :  { %v559_v6 = vsel %vm557_vm5, %v558_v44, %v4303_v55  ;;  %v4313_v7 = vadd.s32 %v213_v30, %v204_v59  ;;  %v236_v63 = vadd.s32 %v235_v62, %v226_v60  ;;  %v621_v8 = vsel %vm620_vm6, %v619_v28, 0 }
  0xc2   :  { %v560_v34 = vclz %v559_v6  ;;  %v623_v10 = vand.u32 31, %v621_v8  ;;  %v237_v11 = vmul.u32 %v4152_v29, %v183_v1  ;;  %v617_v20 = vor.u32 8388608, %v616_v37 }
  0xc3   :  { %vm239_vm7 = vc.u32 %v4313_v7, %v4310_v3  ;;  %v240_v27 = vadd.s32 1, %v236_v63  ;;  %v4328_v61 = vshrl.u32 %v621_v8, 5  ;;  %vm1399_vm9 = vcmp.gt.f32.partialorder %v4120_v2, 0.5 }
  0xc4   :  { %v3450_v31 = vadd.s32 4294967294, %v560_v34  ;;  %v4320_v15 = vsub.s32 32, %v623_v10  ;;  %v626_v26 = vshll.u32 %v4029_v41, %v623_v10  ;;  %v629_v45 = vshll.u32 %v4030_v43, %v623_v10 }
  0xc5   :  { %v241_v18 = vsel %vm239_vm7, %v240_v27, %v236_v63  ;;  %v632_v36 = vshll.u32 %v4031_v47, %v623_v10  ;;  %v635_v42 = vshll.u32 %v4032_v50, %v623_v10  ;;  %v638_v51 = vshll.u32 %v4033_v53, %v623_v10 }
  0xc6   :  { %vm3451_vm8 = vcmp.lt.s32.totalorder %v3450_v31, 0  ;;  %v242_v19 = vadd.s32 %v241_v18, %v237_v11  ;;  %v627_v22 = vshrl.u32 %v4030_v43, %v4320_v15  ;;  %v630_v23 = vshrl.u32 %v4031_v47, %v4320_v15 }
  0xc7   :  { %v563_v21 = vsel %vm3451_vm8, 0, %v3450_v31  ;;  %v636_v24 = vshrl.u32 %v4033_v53, %v4320_v15  ;;  %v633_v29 = vshrl.u32 %v4032_v50, %v4320_v15  ;;  %v639_v33 = vshrl.u32 %v4034_v56, %v4320_v15 }
  0xc8   :  { %v568_v39 = vsub.s32 4294967266, %v563_v21  ;;  %v243_v25 = vadd.s32 536870912, %v242_v19  ;;  %v564_v52 = vsub.s32 32, %v563_v21  ;;  %v4341_v54 = vor.u32 %v627_v22, %v626_v26 }
  0xc9   :  { %v4343_v32 = vor.u32 %v630_v23, %v629_v45  ;;  %v637_v57 = vor.u32 %v636_v24, %v635_v42  ;;  %v634_v59 = vor.u32 %v633_v29, %v632_v36  ;;  %v548_v60 = vadd.s32 %v4257_v48, %v4255_v46 }
  0xca   :  { %v569_v17 = vadd.s32 127, %v568_v39  ;;  %v4336_v49 = vshrl.u32 %v243_v25, 30  ;;  %v640_v44 = vor.u32 %v639_v33, %v638_v51  ;;  %vm641_vm10 = vcmp.lt.s32.totalorder %v4328_v61, 1 }
  0xcb   :  { %vm644_vm11 = vcmp.lt.s32.totalorder %v4328_v61, 4  ;;  %v4353_v62 = vshll.u32 %v617_v20, 8  ;;  %v565_v1 = vshll.u32 %v4303_v55, %v563_v21  ;;  %v566_v6 = vshrl.u32 %v548_v60, %v564_v52  ;;  %v124_v21 = vpop.permute.xlu1 %123 }
  0xcc   :  { %v245_v58 = vshll.u32 %v4336_v49, 30  ;;  %v570_v28 = vshll.u32 %v569_v17, 23  ;;  %v649_v63 = vsel %vm641_vm10, %v4341_v54, %v4343_v32  ;;  %v650_v46 = vsel %vm644_vm11, %v637_v57, 920167782 }
  0xcd   :  { %vm643_vm13 = vcmp.lt.s32.totalorder %v4328_v61, 3  ;;  %v653_v8 = vsel %vm641_vm10, %v4343_v32, %v634_v59  ;;  %vm642_vm14 = vcmp.lt.s32.totalorder %v4328_v61, 2  ;;  %v654_v37 = vsel %vm644_vm11, %v640_v44, 1326507024 }
  0xce   :  { %v4349_v30 = vsub.s32 %v242_v19, %v245_v58  ;;  %v571_v55 = vor.u32 4788187, %v570_v28  ;;  %v651_v34 = vsel %vm643_vm13, %v634_v59, %v650_v46  ;;  %vm1400_vm15 = vcmp.gt.f32.partialorder %v4129_v4, 0.5 }
  0xcf   :  { %v652_v27 = vsel %vm642_vm14, %v649_v63, %v651_v34  ;;  %v655_v31 = vsel %vm643_vm13, %v637_v57, %v654_v37  ;;  %v567_v11 = vor.u32 %v566_v6, %v565_v1  ;;  %v658_v22 = vand.u32 65535, %v4353_v62 }
  0xd0   :  { %vm247_vm12 = vcmp.lt.s32.totalorder %v4349_v30, 0  ;;  %v248_v48 = vsub.s32 0, %v4349_v30  ;;  %v656_v19 = vsel %vm642_vm14, %v653_v8, %v655_v31  ;;  %v683_v20 = vshrl.u32 %v652_v27, 16 }
  0xd1   :  { %v659_v23 = vshrl.u32 %v4353_v62, 16  ;;  %v660_v4 = vand.u32 65535, %v656_v19  ;;  %v661_v24 = vshrl.u32 %v656_v19, 16  ;;  %v4386_v39 = vsel %vm1399_vm9, 1.0, %v4028_v5 }
  0xd2   :  { %v249_v10 = vsel %vm247_vm12, %v248_v48, %v4349_v30  ;;  %v4389_v25 = vsel %vm1400_vm15, 1.0, %v4028_v5  ;;  %v572_v29 = vand.u32 2147483647, %v571_v55  ;;  %v238_v45 = vadd.s32 %v4310_v3, %v4313_v7 }
  0xd3   :  { %v250_v18 = vclz %v249_v10  ;;  %v663_v36 = vmul.u32 %v661_v24, %v658_v22  ;;  %v664_v42 = vmul.u32 %v660_v4, %v659_v23  ;;  %v4394_v17 = vmul.f32 %v4134_v9, %v124_v21 }
  0xd4   :  { %v574_v51 = vcvt.s32.f32 %v567_v11  ;;  %v682_v33 = vand.u32 65535, %v652_v27  ;;  %v685_v52 = vmul.u32 %v683_v20, %v658_v22  ;;  %v625_v57 = vshrl.u32 %v4029_v41, %v4320_v15 }
  0xd5   :  { %v3444_v26 = vadd.s32 4294967294, %v250_v18  ;;  %v662_v58 = vmul.u32 %v660_v4, %v658_v22  ;;  %v666_v60 = vshll.u32 %v663_v36, 16  ;;  %v646_v3 = vsel %vm644_vm11, %v634_v59, 2102212464 }
  0xd6   :  { %v575_v28 = vmul.f32 %v574_v51, %v572_v29  ;;  %v665_v7 = vmul.u32 %v661_v24, %v659_v23  ;;  %v668_v6 = vshll.u32 %v664_v42, 16  ;;  %v686_v48 = vmul.u32 %v682_v33, %v659_v23 }
  0xd7   :  { %vm3445_vm0 = vcmp.lt.s32.totalorder %v3444_v26, 0  ;;  %vm670_vm1 = vc.u32 %v662_v58, %v666_v60  ;;  %v672_v9 = vadd.s32 %v666_v60, %v662_v58  ;;  %v688_v8 = vshll.u32 %v685_v52, 16 }
  0xd8   :  { %v253_v2 = vsel %vm3445_vm0, 0, %v3444_v26  ;;  %v671_v46 = vsel %vm670_vm1, 1, %v4027_v0  ;;  %v684_v15 = vmul.u32 %v682_v33, %v658_v22  ;;  %v302_v34 = vand.u32 2139095040, %v4394_v17 }
  0xd9   :  { %v254_v44 = vsub.s32 32, %v253_v2  ;;  %v258_v1 = vsub.s32 4294967266, %v253_v2  ;;  %v673_v55 = vadd.s32 %v671_v46, %v665_v7  ;;  %vm674_vm2 = vc.u32 %v672_v9, %v668_v6 }
  0xda   :  { %v675_v27 = vsel %vm674_vm2, 1, %v4027_v0  ;;  %v687_v31 = vmul.u32 %v683_v20, %v659_v23  ;;  %v255_v59 = vshll.u32 %v4349_v30, %v253_v2  ;;  %v667_v11 = vshrl.u32 %v663_v36, 16 }
  0xdb   :  { %v259_v63 = vadd.s32 127, %v258_v1  ;;  %v256_v37 = vshrl.u32 %v238_v45, %v254_v44  ;;  %v677_v18 = vadd.s32 %v675_v27, %v673_v55  ;;  %vm692_vm3 = vc.u32 %v684_v15, %v688_v8 }
  0xdc   :  { %v690_v21 = vshll.u32 %v686_v48, 16  ;;  %v693_v4 = vsel %vm692_vm3, 1, %v4027_v0  ;;  %v694_v24 = vadd.s32 %v688_v8, %v684_v15  ;;  %v299_v22 = vand.u32 2147483647, %v4394_v17 }
  0xdd   :  { %v260_v10 = vshll.u32 %v259_v63, 23  ;;  %v678_v29 = vadd.s32 %v677_v18, %v667_v11  ;;  %v695_v26 = vadd.s32 %v693_v4, %v687_v31  ;;  %v303_v51 = vshrl.u32 %v302_v34, 23 }
  0xde   :  { %v257_v45 = vor.u32 %v256_v37, %v255_v59  ;;  %v645_v20 = vsel %vm641_vm10, %v625_v57, %v4341_v54  ;;  %v647_v30 = vsel %vm643_vm13, %v4343_v32, %v646_v3  ;;  %vm696_vm4 = vc.u32 %v694_v24, %v690_v21 }
  0xdf   :  { %v261_v19 = vor.u32 4788187, %v260_v10  ;;  %v576_v23 = vxor.u32 2147483648, %v575_v28  ;;  %v669_v36 = vshrl.u32 %v664_v42, 16  ;;  %v697_v33 = vsel %vm696_vm4, 1, %v4027_v0 }
  0xe0   :  { %v3446_v2 = vadd.s32 4294967169, %v303_v51  ;;  %v689_v60 = vshrl.u32 %v685_v52, 16  ;;  %v699_v44 = vadd.s32 %v697_v33, %v695_v26  ;;  %v3806_v1 = vpack.i.bf16 %v4389_v25, %v4386_v39 }
  0xe1   :  { %v262_v58 = vand.u32 2147483647, %v261_v19  ;;  %vm456_vm5 = vcmp.lt.s32.totalorder %v4137_v12, 0  ;;  %v4416_v7 = vadd.s32 %v678_v29, %v669_v36  ;;  %v264_v57 = vcvt.s32.f32 %v257_v45 }
  0xe2   :  { %v309_v54 = vadd.s32 1, %v3446_v2  ;;  %v691_v6 = vshrl.u32 %v686_v48, 16  ;;  %v700_v32 = vadd.s32 %v699_v44, %v689_v60  ;;  %v306_v42 = vand.u32 8388607, %v299_v22  ;;  %3807 = vperm.xlu2 %3800, %v3806_v1  }
  0xe3   :  { %v577_v3 = vsel %vm456_vm5, %v576_v23, %v575_v28  ;;  %v648_v52 = vsel %vm642_vm14, %v645_v20, %v647_v30  ;;  %v4424_v9 = vadd.s32 %v694_v24, %v690_v21  ;;  %v265_v39 = vmul.f32 %v264_v57, %v262_v58 }
  0xe4   :  { %vm310_vm6 = vcmp.gt.s32.totalorder %v309_v54, 0  ;;  %v701_v25 = vadd.s32 %v700_v32, %v691_v6  ;;  %vm4428_vm7 = vcmp.le.f32.partialorder %v454_v14, 0.7853982  ;;  %vm146_vm8 = vcmp.lt.s32.totalorder %v4140_v13, 0 }
  0xe5   :  { %v311_v63 = vsel %vm310_vm6, %v309_v54, 0  ;;  %vm704_vm9 = vc.u32 %v4416_v7, %v4424_v9  ;;  %v4438_v61 = vsel %vm4428_vm7, %v4137_v12, %v577_v3  ;;  %v702_v48 = vmul.u32 %v4353_v62, %v648_v52 }
  0xe6   :  { %v313_v28 = vand.u32 31, %v311_v63  ;;  %v705_v8 = vadd.s32 1, %v701_v25  ;;  %v307_v55 = vor.u32 8388608, %v306_v42  ;;  %v4441_v15 = vshrl.u32 %v311_v63, 5 }
  0xe7   :  { %v266_v10 = vxor.u32 2147483648, %v265_v39  ;;  %v4452_v21 = vmul.f32 %v4438_v61, %v4438_v61  ;;  %vm4472_vm13 = vcmp.le.f32.partialorder %v144_v16, 0.7853982 }
  0xe8   :  { %v314_v14 = vsub.s32 32, %v313_v28  ;;  %v316_v34 = vshll.u32 %v4029_v41, %v313_v28  ;;  %v319_v37 = vshll.u32 %v4030_v43, %v313_v28  ;;  %v706_v27 = vsel %vm704_vm9, %v705_v8, %v701_v25 }
  0xe9   :  { %v322_v31 = vshll.u32 %v4031_v47, %v313_v28  ;;  %v325_v59 = vshll.u32 %v4032_v50, %v313_v28  ;;  %v707_v11 = vadd.s32 %v706_v27, %v702_v48  ;;  %v328_v19 = vshll.u32 %v4033_v53, %v313_v28 }
  0xea   :  { %v317_v18 = vshrl.u32 %v4030_v43, %v314_v14  ;;  %v320_v62 = vshrl.u32 %v4031_v47, %v314_v14  ;;  %v323_v4 = vshrl.u32 %v4032_v50, %v314_v14  ;;  %v326_v24 = vshrl.u32 %v4033_v53, %v314_v14 }
  0xeb   :  { %v329_v29 = vshrl.u32 %v4034_v56, %v314_v14  ;;  %v708_v26 = vadd.s32 536870912, %v707_v11  ;;  %vm331_vm10 = vcmp.lt.s32.totalorder %v4441_v15, 1  ;;  %v267_v43 = vsel %vm146_vm8, %v266_v10, %v265_v39 }
  0xec   :  { %v4457_v51 = vor.u32 %v317_v18, %v316_v34  ;;  %v4459_v45 = vor.u32 %v320_v62, %v319_v37  ;;  %v324_v47 = vor.u32 %v323_v4, %v322_v31  ;;  %v327_v20 = vor.u32 %v326_v24, %v325_v59 }
  0xed   :  { %v4464_v30 = vshll.u32 %v307_v55, 8  ;;  %v4466_v23 = vshrl.u32 %v708_v26, 30  ;;  %v330_v50 = vor.u32 %v329_v29, %v328_v19  ;;  %vm333_vm11 = vcmp.lt.s32.totalorder %v4441_v15, 3 }
  0xee   :  { %vm334_vm12 = vcmp.lt.s32.totalorder %v4441_v15, 4  ;;  %vm332_vm14 = vcmp.lt.s32.totalorder %v4441_v15, 2  ;;  %v339_v56 = vsel %vm331_vm10, %v4457_v51, %v4459_v45  ;;  %v4484_v36 = vsel %vm4472_vm13, %v4140_v13, %v267_v43 }
  0xef   :  { %v710_v33 = vshll.u32 %v4466_v23, 30  ;;  %v340_v16 = vsel %vm334_vm12, %v327_v20, 920167782  ;;  %v590_v2 = vmul.f32 -0.00019511016, %v4452_v21  ;;  %v343_v60 = vsel %vm331_vm10, %v4459_v45, %v324_v47 }
  0xf0   :  { %v341_v58 = vsel %vm333_vm11, %v324_v47, %v340_v16  ;;  %v344_v54 = vsel %vm334_vm12, %v330_v50, 1326507024  ;;  %v348_v57 = vand.u32 65535, %v4464_v30  ;;  %v4502_v6 = vmul.f32 %v4484_v36, %v4484_v36 }
  0xf1   :  { %v711_v44 = vsub.s32 %v707_v11, %v710_v33  ;;  %v342_v1 = vsel %vm332_vm14, %v339_v56, %v341_v58  ;;  %v345_v32 = vsel %vm333_vm11, %v327_v20, %v344_v54  ;;  %v349_v42 = vshrl.u32 %v4464_v30, 16 }
  0xf2   :  { %v372_v3 = vand.u32 65535, %v342_v1  ;;  %v346_v39 = vsel %vm332_vm14, %v343_v60, %v345_v32  ;;  %v373_v25 = vshrl.u32 %v342_v1, 16  ;;  %v591_v63 = vadd.f32 0.008332121, %v590_v2 }
  0xf3   :  { %vm712_vm15 = vcmp.lt.s32.totalorder %v711_v44, 0  ;;  %v713_v52 = vsub.s32 0, %v711_v44  ;;  %v350_v28 = vand.u32 65535, %v346_v39  ;;  %v351_v48 = vshrl.u32 %v346_v39, 16 }
  0xf4   :  { %v703_v8 = vadd.s32 %v4424_v9, %v4416_v7  ;;  %v375_v34 = vmul.u32 %v373_v25, %v348_v57  ;;  %v376_v37 = vmul.u32 %v372_v3, %v349_v42  ;;  %v280_v10 = vmul.f32 -0.00019511016, %v4502_v6 }
  0xf5   :  { %v714_v55 = vsel %vm712_vm15, %v713_v52, %v711_v44  ;;  %v353_v31 = vmul.u32 %v351_v48, %v348_v57  ;;  %v354_v59 = vmul.u32 %v350_v28, %v349_v42  ;;  %v315_v11 = vshrl.u32 %v4029_v41, %v314_v14 }
  0xf6   :  { %v715_v27 = vclz %v714_v55  ;;  %v374_v18 = vmul.u32 %v372_v3, %v348_v57  ;;  %v377_v62 = vmul.u32 %v373_v25, %v349_v42  ;;  %v378_v19 = vshll.u32 %v375_v34, 16 }
  0xf7   :  { %v352_v24 = vmul.u32 %v350_v28, %v348_v57  ;;  %v355_v29 = vmul.u32 %v351_v48, %v349_v42  ;;  %v356_v26 = vshll.u32 %v353_v31, 16  ;;  %v358_v43 = vshll.u32 %v354_v59, 16 }
  0xf8   :  { %v3453_v4 = vadd.s32 4294967294, %v715_v27  ;;  %v380_v20 = vshll.u32 %v376_v37, 16  ;;  %vm382_vm0 = vc.u32 %v374_v18, %v378_v19  ;;  %v384_v7 = vadd.s32 %v378_v19, %v374_v18 }
  0xf9   :  { %vm360_vm2 = vc.u32 %v352_v24, %v356_v26  ;;  %v362_v9 = vadd.s32 %v356_v26, %v352_v24  ;;  %v383_v50 = vsel %vm382_vm0, 1, %v4027_v0  ;;  %v336_v2 = vsel %vm334_vm12, %v324_v47, 2102212464 }
  0xfa   :  { %vm3454_vm1 = vcmp.lt.s32.totalorder %v3453_v4, 0  ;;  %v361_v33 = vsel %vm360_vm2, 1, %v4027_v0  ;;  %v385_v41 = vadd.s32 %v383_v50, %v377_v62  ;;  %vm386_vm3 = vc.u32 %v384_v7, %v380_v20 }
  0xfb   :  { %v718_v56 = vsel %vm3454_vm1, 0, %v3453_v4  ;;  %v363_v58 = vadd.s32 %v361_v33, %v355_v29  ;;  %vm364_vm4 = vc.u32 %v362_v9, %v358_v43  ;;  %v379_v1 = vshrl.u32 %v375_v34, 16 }
  0xfc   :  { %v719_v14 = vsub.s32 32, %v718_v56  ;;  %v723_v16 = vsub.s32 4294967266, %v718_v56  ;;  %v720_v60 = vshll.u32 %v711_v44, %v718_v56  ;;  %v387_v54 = vsel %vm386_vm3, 1, %v4027_v0 }
  0xfd   :  { %v365_v42 = vsel %vm364_vm4, 1, %v4027_v0  ;;  %v389_v3 = vadd.s32 %v387_v54, %v385_v41  ;;  %v335_v52 = vsel %vm331_vm10, %v315_v11, %v4457_v51  ;;  %v337_v39 = vsel %vm333_vm11, %v4459_v45, %v336_v2 }
  0xfe   :  { %v721_v57 = vshrl.u32 %v703_v8, %v719_v14  ;;  %v724_v32 = vadd.s32 127, %v723_v16  ;;  %v357_v47 = vshrl.u32 %v353_v31, 16  ;;  %v367_v25 = vadd.s32 %v365_v42, %v363_v58 }
  0xff   :  { %v381_v48 = vshrl.u32 %v376_v37, 16  ;;  %v390_v55 = vadd.s32 %v389_v3, %v379_v1  ;;  %v359_v34 = vshrl.u32 %v354_v59, 16  ;;  %v338_v0 = vsel %vm332_vm14, %v335_v52, %v337_v39 }
 0x100   :  { %v722_v44 = vor.u32 %v721_v57, %v720_v60  ;;  %v725_v28 = vshll.u32 %v724_v32, 23  ;;  %v368_v8 = vadd.s32 %v367_v25, %v357_v47  ;;  %v578_v62 = vsub.s32 4, %v4290_v38 }
 0x101   :  { %v391_v18 = vadd.s32 %v390_v55, %v381_v48  ;;  %v592_v51 = vmul.f32 %v591_v63, %v4452_v21  ;;  %v4531_v45 = vadd.s32 %v384_v7, %v380_v20  ;;  %v281_v31 = vadd.f32 0.008332121, %v280_v10 }
 0x102   :  { %v726_v27 = vor.u32 4788187, %v725_v28  ;;  %v4529_v11 = vadd.s32 %v368_v8, %v359_v34  ;;  %v729_v4 = vcvt.s32.f32 %v722_v44  ;;  %v392_v59 = vmul.u32 %v4464_v30, %v338_v0 }
 0x103   :  { %v395_v37 = vadd.s32 1, %v391_v18  ;;  %v733_v24 = vsub.s32 4, %v4466_v23  ;;  %v593_v26 = vadd.f32 -0.16666654, %v592_v51  ;;  %v579_v63 = vsel %vm456_vm5, %v578_v62, %v4290_v38 }
 0x104   :  { %v727_v19 = vand.u32 2147483647, %v726_v27  ;;  %vm394_vm6 = vc.u32 %v4529_v11, %v4531_v45  ;;  %v282_v10 = vmul.f32 %v281_v31, %v4502_v6  ;;  %vm611_vm9 = vcmp.lt.s32.totalorder %v4158_v35, 0 }
 0x105   :  { %v396_v29 = vsel %vm394_vm6, %v395_v37, %v391_v18  ;;  %vm610_vm10 = vcmp.le.f32.partialorder %v609_v40, 0.7853982  ;;  %v734_v9 = vsel %vm611_vm9, %v733_v24, %v4466_v23  ;;  %v581_v50 = vsel %vm4428_vm7, 0, %v579_v63 }
 0x106   :  { %v730_v15 = vmul.f32 %v729_v4, %v727_v19  ;;  %v397_v43 = vadd.s32 %v396_v29, %v392_v59  ;;  %v594_v56 = vmul.f32 %v593_v26, %v4452_v21  ;;  %v268_v41 = vsub.s32 4, %v4336_v49 }
 0x107   :  { %v283_v14 = vadd.f32 -0.16666654, %v282_v10  ;;  %v736_v2 = vsel %vm610_vm10, 0, %v734_v9  ;;  %v583_v58 = vmul.f32 -0.001358992, %v4452_v21  ;;  %v598_v46 = vadd.s32 3, %v581_v50 }
 0x108   :  { %v731_v20 = vxor.u32 2147483648, %v730_v15  ;;  %v398_v7 = vadd.s32 536870912, %v397_v43  ;;  %v595_v60 = vadd.f32 1.0, %v594_v56  ;;  %v273_v57 = vmul.f32 -0.001358992, %v4502_v6 }
 0x109   :  { %v584_v54 = vadd.f32 0.041655596, %v583_v58  ;;  %v269_v32 = vsel %vm146_vm8, %v268_v41, %v4336_v49  ;;  %v284_v42 = vmul.f32 %v283_v14, %v4502_v6  ;;  %v753_v52 = vadd.s32 3, %v736_v2  ;;  %v4583_v56 = vld [vmem:[#allocation6] ss:$0 sm:$0xff] }
 0x10a   :  { %v732_v30 = vsel %vm611_vm9, %v731_v20, %v730_v15  ;;  %v4549_v38 = vshrl.u32 %v398_v7, 30  ;;  %v1224_v25 = vand.u32 3, %v581_v50  ;;  %v599_v28 = vand.u32 3, %v598_v46 }
 0x10b   :  { %v735_v33 = vsel %vm610_vm10, %v4158_v35, %v732_v30  ;;  %v585_v47 = vmul.f32 %v584_v54, %v4452_v21  ;;  %v274_v48 = vadd.f32 0.041655596, %v273_v57  ;;  %v596_v55 = vmul.f32 %v595_v60, %v4438_v61 }
 0x10c   :  { %v4552_v16 = vmul.f32 %v735_v33, %v735_v33  ;;  %v400_v40 = vshll.u32 %v4549_v38, 30  ;;  %v4567_v34 = vsel %vm4472_vm13, 0, %v269_v32  ;;  %v285_v27 = vadd.f32 1.0, %v284_v42 }
 0x10d   :  { %v586_v8 = vadd.f32 -0.4999988, %v585_v47  ;;  %vm597_vm7 = vweird.f32 %v4137_v12  ;;  %v4570_v62 = vand.u32 3, %v736_v2  ;;  %v4573_v31 = vand.u32 3, %v753_v52 }
 0x10e   :  { %v745_v23 = vmul.f32 -0.00019511016, %v4552_v16  ;;  %v401_v1 = vsub.s32 %v397_v43, %v400_v40  ;;  %vm1225_vm8 = vcmp.lt.s32.totalorder %v1224_v25, 2  ;;  %vm1226_vm11 = vcmp.eq.s32.totalorder %v1224_v25, 0 }
 0x10f   :  { %v587_v51 = vmul.f32 %v586_v8, %v4452_v21  ;;  %vm600_vm12 = vcmp.lt.s32.totalorder %v599_v28, 2  ;;  %v275_v19 = vmul.f32 %v274_v48, %v4502_v6  ;;  %vm601_vm13 = vcmp.eq.s32.totalorder %v599_v28, 0  ;;  %v143_v21 = vld [vmem:[#allocation6] sm:$0x1] }
 0x110   :  { %v746_v3 = vadd.f32 0.008332121, %v745_v23  ;;  %vm402_vm5 = vcmp.lt.s32.totalorder %v401_v1, 0  ;;  %v403_v39 = vsub.s32 0, %v401_v1  ;;  %vm604_vm14 = vcmp.eq.s32.totalorder %v599_v28, 2 }
 0x111   :  { %v588_v4 = vadd.f32 1.0, %v587_v51  ;;  %v738_v37 = vmul.f32 -0.001358992, %v4552_v16  ;;  %v393_v15 = vadd.s32 %v4531_v45, %v4529_v11  ;;  %v602_v24 = vxor.u32 2147483648, %v596_v55 }
 0x112   :  { %v747_v44 = vmul.f32 %v746_v3, %v4552_v16  ;;  %v404_v49 = vsel %vm402_vm5, %v403_v39, %v401_v1  ;;  %vm1229_vm0 = vcmp.eq.s32.totalorder %v1224_v25, 2  ;;  %v276_v7 = vadd.f32 -0.4999988, %v275_v19  ;;  %v3803_v25 = vpop.permute.xlu2 %3802 }
 0x113   :  { %v405_v18 = vclz %v404_v49  ;;  %v605_v26 = vxor.u32 2147483648, %v588_v4  ;;  %v739_v43 = vadd.f32 0.041655596, %v738_v37  ;;  %v603_v30 = vsel %vm601_vm13, %v588_v4, %v602_v24 }
 0x114   :  { %v748_v0 = vadd.f32 -0.16666654, %v747_v44  ;;  %v771_v11 = vsub.f32 1.0, %v143_v21  ;;  %v1228_v58 = vsel %vm1226_vm11, %v588_v4, %v602_v24  ;;  %vm752_vm1 = vweird.f32 %v4158_v35 }
 0x115   :  { %v3447_v53 = vadd.s32 4294967294, %v405_v18  ;;  %v606_v9 = vsel %vm604_vm14, %v605_v26, %v596_v55  ;;  %v740_v50 = vmul.f32 %v739_v43, %v4552_v16  ;;  %v1231_v23 = vsel %vm1229_vm0, %v605_v26, %v596_v55 }
 0x116   :  { %v749_v61 = vmul.f32 %v748_v0, %v4552_v16  ;;  %v607_v2 = vsel %vm600_vm12, %v603_v30, %v606_v9  ;;  %v1232_v57 = vsel %vm1225_vm8, %v1228_v58, %v1231_v23  ;;  %vm301_vm2 = vcmp.lt.s32.totalorder %v4394_v17, 0  ;;  %v1437_v9 = vld [vmem:[%s5196_s1 + $0x10] sm:$0xff]  ;;  %v1438_v23 = vld [vmem:[%s5196_s1 + $0x18] sm:$0xff] }
 0x117   :  { %vm3448_vm15 = vcmp.lt.s32.totalorder %v3447_v53, 0  ;;  %v741_v40 = vadd.f32 -0.4999988, %v740_v50  ;;  %v1233_v42 = vsel %vm597_vm7, nan, %v1232_v57  ;;  %v4597_v3 = vperm.slane %v771_v11, 0 }
 0x118   :  { %v750_v59 = vadd.f32 1.0, %v749_v61  ;;  %v408_v29 = vsel %vm3448_vm15, 0, %v3447_v53  ;;  %v4600_v52 = vmul.f32 %v285_v27, %v4484_v36  ;;  %vm4604_vm3 = vcmp.le.f32.partialorder %v299_v22, 0.7853982 }
 0x119   :  { %v409_v10 = vsub.s32 32, %v408_v29  ;;  %v413_v20 = vsub.s32 4294967266, %v408_v29  ;;  %v410_v45 = vshll.u32 %v401_v1, %v408_v29  ;;  %v742_v1 = vmul.f32 %v741_v40, %v4552_v16  ;;  %v3736_v40 = vld [vmem:[#allocation8 + $0x30] sm:$0xff] }
 0x11a   :  { %v751_v63 = vmul.f32 %v750_v59, %v735_v33  ;;  %v608_v33 = vsel %vm597_vm7, nan, %v607_v2  ;;  %vm755_vm4 = vcmp.lt.s32.totalorder %v4573_v31, 2  ;;  %vm756_vm6 = vcmp.eq.s32.totalorder %v4573_v31, 0 }
 0x11b   :  { %v411_v41 = vshrl.u32 %v393_v15, %v409_v10  ;;  %v414_v14 = vadd.s32 127, %v413_v20  ;;  %v769_v32 = vmul.f32 %v4583_v56, %v608_v33  ;;  %v743_v16 = vadd.f32 1.0, %v742_v1  ;;  %v3731_v10 = vld [vmem:[#allocation8 + $0x28] sm:$0xff]  ;;  %v3737_v20 = vld [vmem:[#allocation8 + $0x38] sm:$0xff]  ;;  %v3730_v33 = vld [vmem:[#allocation8 + $0x20] sm:$0xff] }
 0x11c   :  { %v757_v54 = vxor.u32 2147483648, %v751_v63  ;;  %vm1380_vm9 = vcmp.eq.s32.totalorder %v4570_v62, 0  ;;  %v1393_v12 = vmul.f32 %v4597_v3, %v1233_v42  ;;  %v288_v36 = vadd.s32 3, %v4567_v34  ;;  %1678 = vmatpush.bf16.msra.mxu1 %v3731_v10  ;;  %1767 = vmatpush.bf16.msra.mxu3 %v3737_v20 }
 0x11d   :  { %v412_v46 = vor.u32 %v411_v41, %v410_v45  ;;  %v415_v60 = vshll.u32 %v414_v14, 23  ;;  %v3804_v48 = vunpack.i.l.bf16 %v3803_v25  ;;  %v277_v22 = vmul.f32 %v276_v7, %v4502_v6  ;;  %v3732_v45 = vld [vmem:[#allocation8] sm:$0xff] }
 0x11e   :  { %v758_v55 = vsel %vm756_vm6, %v743_v16, %v757_v54  ;;  %v760_v49 = vxor.u32 2147483648, %v743_v16  ;;  %v1382_v8 = vsel %vm1380_vm9, %v743_v16, %v757_v54  ;;  %v1397_v27 = vadd.f32 %v1393_v12, %v769_v32  ;;  %v3739_v54 = vld [vmem:[#allocation8 + $0x48] sm:$0xff] }
 0x11f   :  { %v416_v47 = vor.u32 4788187, %v415_v60  ;;  %v419_v28 = vcvt.s32.f32 %v412_v46  ;;  %vm759_vm10 = vcmp.eq.s32.totalorder %v4573_v31, 2  ;;  %vm1379_vm5 = vcmp.lt.s32.totalorder %v4570_v62, 2  ;;  %v3735_v60 = vld [vmem:[#allocation8 + $0x18] sm:$0xff] }
 0x120   :  { %vm1383_vm7 = vcmp.eq.s32.totalorder %v4570_v62, 2  ;;  %v761_v18 = vsel %vm759_vm10, %v760_v49, %v751_v63  ;;  %v4617_v61 = vand.u32 3, %v288_v36  ;;  %v4620_v53 = vand.u32 3, %v4567_v34  ;;  %1679 = vmatpush.bf16.msra.mxu1 %v3730_v33  ;;  %1768 = vmatpush.bf16.msra.mxu3 %v3736_v40 }
 0x121   :  { %v417_v44 = vand.u32 2147483647, %v416_v47  ;;  %v1385_v51 = vsel %vm1383_vm7, %v760_v49, %v751_v63  ;;  %v762_v6 = vsel %vm755_vm4, %v758_v55, %v761_v18  ;;  %v4627_v37 = vstv %s5195_s0  ;;  %v3733_v63 = vld [vmem:[#allocation8 + $0x8] sm:$0xff]  ;;  %v3738_v55 = vld [vmem:[#allocation8 + $0x40] sm:$0xff] }
 0x122   :  { %v1386_v4 = vsel %vm1379_vm5, %v1382_v8, %v1385_v51  ;;  %v763_v62 = vsel %vm752_vm1, nan, %v762_v6  ;;  %v1433_v15 = vmul.f32 %v3804_v48, %v1397_v27  ;;  %v278_v21 = vadd.f32 1.0, %v277_v22  ;;  %1634 = vmatpush.bf16.msra.mxu0 %v3733_v63  ;;  %3780 = vmatpush.bf16.msra.mxu2 %v3733_v63  ;;  %v3734_v22 = vld [vmem:[#allocation8 + $0x10] sm:$0xff] }
 0x123   :  { %v420_v0 = vmul.f32 %v419_v28, %v417_v44  ;;  %v1387_v59 = vsel %vm752_vm1, nan, %v1386_v4  ;;  %v770_v31 = vmul.f32 %v4583_v56, %v763_v62  ;;  %v3805_v29 = vunpack.i.h.bf16 %v3803_v25 }
 0x124   :  { %v1394_v24 = vmul.f32 %v4597_v3, %v1387_v59  ;;  %v423_v26 = vsub.s32 4, %v4549_v38  ;;  %v292_v35 = vxor.u32 2147483648, %v4600_v52  ;;  %vm917_vm8 = vcmp.lt.s32.totalorder %v4620_v53, 2 }
 0x125   :  { %v421_v19 = vxor.u32 2147483648, %v420_v0  ;;  %v1443_v50 = vmul.f32 %v4627_v37, %v1433_v15  ;;  %vm291_vm11 = vcmp.eq.s32.totalorder %v4617_v61, 0  ;;  %v295_v11 = vxor.u32 2147483648, %v278_v21 }
 0x126   :  { %v1398_v30 = vadd.f32 %v1394_v24, %v770_v31  ;;  %vm918_vm12 = vcmp.eq.s32.totalorder %v4620_v53, 0  ;;  %v424_v58 = vsel %vm301_vm2, %v423_v26, %v4549_v38  ;;  %v293_v46 = vsel %vm291_vm11, %v278_v21, %v292_v35  ;;  %1635 = vmatpush.bf16.msra.mxu0 %v3732_v45  ;;  %3781 = vmatpush.bf16.msra.mxu2 %v3732_v45 }
 0x127   :  { %v422_v34 = vsel %vm301_vm2, %v421_v19, %v420_v0  ;;  %vm294_vm13 = vcmp.eq.s32.totalorder %v4617_v61, 2  ;;  %vm921_vm14 = vcmp.eq.s32.totalorder %v4620_v53, 2  ;;  %v920_v42 = vsel %vm918_vm12, %v278_v21, %v292_v35 }
 0x128   :  { %v4641_v43 = vsel %vm4604_vm3, %v4394_v17, %v422_v34  ;;  %v1434_v14 = vmul.f32 %v3805_v29, %v1398_v30  ;;  %v1447_v47 = vadd.f32 %v1443_v50, %v1437_v9  ;;  %vm290_vm15 = vcmp.lt.s32.totalorder %v4617_v61, 2 }
 0x129   :  { %v427_v7 = vmul.f32 %v4641_v43, %v4641_v43  ;;  %v296_v38 = vsel %vm294_vm13, %v295_v11, %v4600_v52  ;;  %v923_v16 = vsel %vm921_vm14, %v295_v11, %v4600_v52  ;;  %v426_v12 = vsel %vm4604_vm3, 0, %v424_v58 }
 0x12a   :  { %v1444_v1 = vmul.f32 %v4627_v37, %v1434_v14  ;;  %v297_v28 = vsel %vm290_vm15, %v293_v46, %v296_v38  ;;  %v924_v48 = vsel %vm917_vm8, %v920_v42, %v923_v16  ;;  %vm1621_vm0 = vcmask 261120   ;;  %1714 = vmatpush.bf16.msrb.mxu2 %v3735_v60  ;;  %1820 = vmatpush.bf16.msrb.mxu0 %v3739_v54  ;;  %v1435_v14 = vld [vmem:[%s5196_s1] sm:$0xff] }
 0x12b   :  { %v435_v41 = vmul.f32 -0.00019511016, %v427_v7  ;;  %v428_v2 = vmul.f32 -0.001358992, %v427_v7  ;;  %vm287_vm1 = vweird.f32 %v4140_v13  ;;  %v443_v39 = vadd.s32 3, %v426_v12 }
 0x12c   :  { %v1448_v36 = vadd.f32 %v1444_v1, %v1438_v23  ;;  %v298_v0 = vsel %vm287_vm1, nan, %v297_v28  ;;  %v925_v51 = vsel %vm287_vm1, nan, %v924_v48  ;;  %v1070_v19 = vand.u32 3, %v426_v12 }
 0x12d   :  { %v436_v57 = vadd.f32 0.008332121, %v435_v41  ;;  %v429_v32 = vadd.f32 0.041655596, %v428_v2  ;;  %v444_v6 = vand.u32 3, %v443_v39  ;;  %v767_v4 = vmul.f32 %v4583_v56, %v298_v0 }
 0x12e   :  { %v1599_v49 = vpack.c.bf16 %v1448_v36, %v1447_v47  ;;  %1715 = vmatpush.bf16.msrb.mxu2 %v3734_v22  ;;  %1821 = vmatpush.bf16.msrb.mxu0 %v3738_v55  ;;  %v1391_v62 = vmul.f32 %v4597_v3, %v925_v51  ;;  %vm1071_vm2 = vcmp.lt.s32.totalorder %v1070_v19, 2  ;;  %vm1072_vm3 = vcmp.eq.s32.totalorder %v1070_v19, 0 }
 0x12f   :  { %v437_v25 = vmul.f32 %v436_v57, %v427_v7  ;;  %v430_v44 = vmul.f32 %v429_v32, %v427_v7  ;;  %vm1075_vm4 = vcmp.eq.s32.totalorder %v1070_v19, 2  ;;  %vm445_vm6 = vcmp.lt.s32.totalorder %v444_v6, 2 }
 0x130   :  { %3488 = vmatmul.msk.bf16.vlgmr.msra.gmra.mxu2 %vm1621_vm0, %v1599_v49  ;;  %vm446_vm9 = vcmp.eq.s32.totalorder %v444_v6, 0  ;;  %vm449_vm10 = vcmp.eq.s32.totalorder %v444_v6, 2  ;;  %v1395_v21 = vadd.f32 %v1391_v62, %v767_v4  ;;  %vm442_vm5 = vweird.f32 %v4394_v17  ;;  %v1436_v17 = vld [vmem:[%s5196_s1 + $0x8] sm:$0xff] }
 0x131   :  { %v438_v52 = vadd.f32 -0.16666654, %v437_v25  ;;  %v431_v8 = vadd.f32 -0.4999988, %v430_v44  ;;  %v1449_v46 = vlaneseq }
 0x133   :  { %v439_v27 = vmul.f32 %v438_v52, %v427_v7  ;;  %v432_v18 = vmul.f32 %v431_v8, %v427_v7  ;;  %v4702_v1 = vshrl.u32 %v1449_v46, 7 }
 0x135   :  { %v440_v61 = vadd.f32 1.0, %v439_v27  ;;  %v433_v53 = vadd.f32 1.0, %v432_v18  ;;  %v1452_v42 = vadd.s32 16, %v4702_v1  ;;  %v1451_v47 = vadd.s32 8, %v4702_v1 }
 0x136   :  { %v1458_v38 = vand.u32 15, %v4702_v1  ;;  %v1453_v48 = vadd.s32 24, %v4702_v1  ;;  %vm1651_vm7 = vcmp.lt.s32.totalorder %v4702_v1, 2  ;;  %vm1731_vm13 = vcmp.lt.s32.totalorder %v4702_v1, 1 }
 0x137   :  { %v441_v59 = vmul.f32 %v440_v61, %v4641_v43  ;;  %v450_v13 = vxor.u32 2147483648, %v433_v53  ;;  %v1472_v25 = vand.u32 15, %v1452_v42  ;;  %v1465_v44 = vand.u32 15, %v1451_v47 }
 0x138   :  { %v1502_v28 = vadd.s32 4294967294, %v1458_v38  ;;  %v1479_v61 = vand.u32 15, %v1453_v48  ;;  %vm1784_vm14 = vcmp.lt.s32.totalorder %v4702_v1, 7 }
 0x139   :  { %v447_v15 = vxor.u32 2147483648, %v441_v59  ;;  %v451_v31 = vsel %vm449_vm10, %v450_v13, %v441_v59  ;;  %v1077_v29 = vsel %vm1075_vm4, %v450_v13, %v441_v59  ;;  %v1504_v22 = vadd.s32 4294967294, %v1472_v25 }
 0x13a   :  { %v1551_v55 = vadd.s32 1, %v1465_v44  ;;  %vm1506_vm8 = vcmp.ge.s32.totalorder %v1502_v28, 0  ;;  %v1528_v39 = vadd.s32 4294967295, %v1472_v25  ;;  %v1526_v13 = vadd.s32 4294967295, %v1458_v38 }
 0x13b   :  { %v448_v34 = vsel %vm446_vm9, %v433_v53, %v447_v15  ;;  %v1074_v24 = vsel %vm1072_vm3, %v433_v53, %v447_v15  ;;  %vm1508_vm11 = vcmp.ge.s32.totalorder %v1504_v22, 0  ;;  %v4724_v15 = vsel %vm1506_vm8, 1.0, %v4028_v5 }
 0x13c   :  { %v3808_v26 = vpop.permute.xlu2 %3807  ;;  %v452_v35 = vsel %vm445_vm6, %v448_v34, %v451_v31  ;;  %v1078_v63 = vsel %vm1071_vm2, %v1074_v24, %v1077_v29  ;;  %vm1559_vm12 = vcmp.lt.s32.totalorder %v1551_v55, 16  ;;  %vm1532_vm15 = vcmp.ge.s32.totalorder %v1528_v39, 0 }
 0x13d   :  { %v3809_v10 = vunpack.i.l.bf16 %v3808_v26  ;;  %v453_v43 = vsel %vm442_vm5, nan, %v452_v35  ;;  %v1079_v20 = vsel %vm442_vm5, nan, %v1078_v63  ;;  %v3810_v9 = vunpack.i.h.bf16 %v3808_v26 }
 0x13e   :  { %v768_v7 = vmul.f32 %v4583_v56, %v453_v43  ;;  %v1392_v30 = vmul.f32 %v4597_v3, %v1079_v20  ;;  %v1553_v29 = vadd.s32 1, %v1479_v61  ;;  %v4734_v35 = vsel %vm1508_vm11, 1.0, %v4028_v5 }
 0x13f   :  { %v1431_v50 = vmul.f32 %v3809_v10, %v1395_v21  ;;  %v1575_v21 = vadd.s32 2, %v1465_v44  ;;  %v4740_v10 = vsel %vm1559_vm12, 1.0, %v4028_v5  ;;  %v4745_v20 = vsel %vm1532_vm15, 1.0, %v4028_v5 }
 0x140   :  { %v1396_v11 = vadd.f32 %v1392_v30, %v768_v7  ;;  %vm1530_vm1 = vcmp.ge.s32.totalorder %v1526_v13, 0  ;;  %vm1837_vm3 = vcmp.lt.s32.totalorder %v4702_v1, 6  ;;  %vm1561_vm4 = vcmp.lt.s32.totalorder %v1553_v29, 16 }
 0x141   :  { %v1441_v41 = vmul.f32 %v4627_v37, %v1431_v50  ;;  %vm1583_vm2 = vcmp.lt.s32.totalorder %v1575_v21, 16  ;;  %v4778_v22 = vsel %vm1561_vm4, 1.0, %v4028_v5 }
 0x142   :  { %v1432_v45 = vmul.f32 %v3810_v9, %v1396_v11  ;;  %v4761_v46 = vsel %vm1583_vm2, 1.0, %v4028_v5 }
 0x143   :  { %v1445_v56 = vadd.f32 %v1441_v41, %v1435_v14  ;;  %v1577_v41 = vadd.s32 2, %v1479_v61 }
 0x144   :  { %v1442_v2 = vmul.f32 %v4627_v37, %v1432_v45 }
 0x145   :  { %vm1585_vm6 = vcmp.lt.s32.totalorder %v1577_v41, 16 }
 0x146   :  { %v1446_v33 = vadd.f32 %v1442_v2, %v1436_v17 }
 0x148   :  { %v1598_v40 = vpack.c.bf16 %v1446_v33, %v1445_v56  ;;  %v4757_v56 = vsel %vm1530_vm1, 1.0, %v4028_v5 }
 0x14a   :  { %3487 = vmatmul.msk.bf16.vlgmr.msra.gmra.mxu0 %vm1621_vm0, %v1598_v40  ;;  %3497 = vmatmul.msk.bf16.vlgmr.msra.gmra.mxu1 %vm1621_vm0, %v1598_v40 }
 0x14b   :  { %3517 = vmatmul.msk.bf16.vlgmr.msra.gmra.mxu3 %vm1621_vm0, %v1598_v40  ;;  %3507 = vmatmul.msk.bf16.vlgmr.msrb.gmra.mxu2 %vm1621_vm0, %v1598_v40 }
 0x15a   :  { %3498 = vmatmul.msk.bf16.gmra.mxu1 %vm1621_vm0, %v1599_v49  ;;  %3527 = vmatmul.msk.bf16.vlgmr.msrb.gmra.mxu0 %vm1621_vm0, %v1598_v40 }
 0x15b   :  { %3518 = vmatmul.msk.bf16.gmra.mxu3 %vm1621_vm0, %v1599_v49  ;;  %3508 = vmatmul.msk.bf16.gmra.mxu2 %vm1621_vm0, %v1599_v49 }
 0x16a   :  { %3528 = vmatmul.msk.bf16.gmra.mxu0 %vm1621_vm0, %v1599_v49 }
 0x1b3   :  { %v1642_v3 = vpop.f32.mrf.mxu2 }
 0x1b4   :  { %v1649_v49 = vrot.slane %v1642_v3, 6 }
 0x1bb   :  { %v1644_v37 = vpop.f32.mrf.mxu2 }
 0x1bc   :  { %v1650_v0 = vrot.slane %v1644_v37, 6 }
 0x1be   :  { %v1652_v9 = vsel %vm1651_vm7, %v1649_v49, %v1650_v0 }
 0x1c7   :  { %v1637_v58 = vpop.f32.mrf.mxu0  ;;  %v4696_v23 = vpop.f32.mrf.mxu1 }
 0x1c8   :  { %v1647_v27 = vrot.slane %v1637_v58, 6 }
 0x1ca   :  { %v1655_v34 = vsel %vm1651_vm7, %v1650_v0, %v1647_v27 }
 0x1cb   :  { %v1656_v30 = vmul.f32 %v4724_v15, %v1655_v34 }
 0x1ce   :  { %v4698_v60 = vpop.f32.mrf.mxu3  ;;  %v4700_v54 = vpop.f32.mrf.mxu2 }
 0x1cf   :  { %v1639_v57 = vpop.f32.mrf.mxu0  ;;  %v1683_v32 = vpop.f32.mrf.mxu1  ;;  %v1727_v19 = vrot.slane %v4700_v54, 7  ;;  %v1780_v38 = vrot.slane %v4698_v60, 1 }
 0x1d0   :  { %v1648_v52 = vrot.slane %v1639_v57, 6  ;;  %v1682_v57 = vadd.f32 %v4696_v23, %v1656_v30  ;;  %v3813_v23 = vld [vmem:[%s5201_s6] ss:$0 sm:$0xff] }
 0x1d2   :  { %v1654_v4 = vsel %vm1651_vm7, %v1647_v27, %v1648_v52  ;;  %v1653_v63 = vsel %vm1651_vm7, %v1648_v52, %v1649_v49 }
 0x1d3   :  { %v1684_v26 = vadd.f32 %v1683_v32, %v1654_v4  ;;  %v1658_v11 = vmul.f32 %v4734_v35, %v1653_v63 }
 0x1d6   :  { %v4707_v16 = vpop.f32.mrf.mxu3  ;;  %v1719_v12 = vpop.f32.mrf.mxu2 }
 0x1d7   :  { %v4709_v36 = vpop.f32.mrf.mxu0  ;;  %v1686_v8 = vpop.f32.mrf.mxu1  ;;  %v1728_v51 = vrot.slane %v1719_v12, 7  ;;  %v1781_v31 = vrot.slane %v4707_v16, 1 }
 0x1d8   :  { %v1687_v32 = vadd.f32 %v1686_v8, %v1658_v11  ;;  %v1833_v49 = vrot.slane %v4709_v36, 2 }
 0x1d9   :  { %v1734_v24 = vsel %vm1731_vm13, %v1727_v19, %v1728_v51  ;;  %v1787_v52 = vsel %vm1784_vm14, %v1780_v38, %v1781_v31 }
 0x1da   :  { %v1741_v50 = vadd.f32 %v1734_v24, %v1684_v26 }
 0x1de   :  { %v4713_v18 = vpop.f32.mrf.mxu3  ;;  %v1722_v53 = vpop.f32.mrf.mxu2 }
 0x1df   :  { %v4716_v6 = vpop.f32.mrf.mxu0  ;;  %v1782_v62 = vrot.slane %v4713_v18, 1  ;;  %v1729_v59 = vrot.slane %v1722_v53, 7  ;;  %v1688_v3 = vpop.f32.mrf.mxu1 }
 0x1e0   :  { %v1834_v37 = vrot.slane %v4716_v6, 2  ;;  %v1689_v44 = vadd.f32 %v1688_v3, %v1652_v9  ;;  %v4791_v6 = vsel %vm1585_vm6, 1.0, %v4028_v5 }
 0x1e1   :  { %v1786_v43 = vsel %vm1784_vm14, %v1781_v31, %v1782_v62  ;;  %v1733_v7 = vsel %vm1731_vm13, %v1728_v51, %v1729_v59 }
 0x1e2   :  { %v1790_v17 = vmul.f32 %v4740_v10, %v1786_v43  ;;  %v1738_v33 = vmul.f32 %v4745_v20, %v1733_v7  ;;  %v1840_v18 = vsel %vm1837_vm3, %v1833_v49, %v1834_v37 }
 0x1e4   :  { %v1794_v42 = vadd.f32 %v1790_v17, %v1741_v50  ;;  %v1742_v48 = vadd.f32 %v1738_v33, %v1687_v32 }
 0x1e6   :  { %v1777_v45 = vpop.f32.mrf.mxu3  ;;  %v1724_v14 = vpop.f32.mrf.mxu2 }
 0x1e7   :  { %v1828_v2 = vpop.f32.mrf.mxu0  ;;  %v1730_v40 = vrot.slane %v1724_v14, 7  ;;  %v1783_v58 = vrot.slane %v1777_v45, 1 }
 0x1e8   :  { %v1835_v54 = vrot.slane %v1828_v2, 2 }
 0x1e9   :  { %v1735_v47 = vsel %vm1731_vm13, %v1730_v40, %v1727_v19  ;;  %v1732_v12 = vsel %vm1731_vm13, %v1729_v59, %v1730_v40  ;;  %v1788_v60 = vsel %vm1784_vm14, %v1783_v58, %v1780_v38  ;;  %v1785_v27 = vsel %vm1784_vm14, %v1782_v62, %v1783_v58 }
 0x1ea   :  { %v1839_v16 = vsel %vm1837_vm3, %v1834_v37, %v1835_v54  ;;  %v1736_v25 = vmul.f32 %v4757_v56, %v1735_v47  ;;  %v1743_v39 = vadd.f32 %v1732_v12, %v1689_v44  ;;  %v1792_v51 = vmul.f32 %v4778_v22, %v1788_v60 }
 0x1eb   :  { %v1843_v28 = vmul.f32 %v4761_v46, %v1839_v16  ;;  %v1795_v19 = vadd.f32 %v1785_v27, %v1742_v48  ;;  %v3743_v27 = vld [vmem:[#allocation8 + $0x58] sm:$0xff] }
 0x1ec   :  { %v1740_v55 = vadd.f32 %v1736_v25, %v1682_v57  ;;  %v1796_v13 = vadd.f32 %v1792_v51, %v1743_v39  ;;  %v3747_v51 = vld [vmem:[#allocation8 + $0x88] sm:$0xff]  ;;  %1996 = vmatpush.bf16.msrb.mxu1 %v3743_v27 }
 0x1ed   :  { %v1847_v8 = vadd.f32 %v1843_v28, %v1794_v42  ;;  %2127 = vmatpush.bf16.msra.mxu0 %v3747_v51 }
 0x1ee   :  { %v1793_v0 = vadd.f32 %v1787_v52, %v1740_v55 }
 0x1ef   :  { %v1830_v61 = vpop.f32.mrf.mxu0  ;;  %v1853_v53 = vadd.f32 %v3813_v23, %v1847_v8 }
 0x1f0   :  { %v1836_v4 = vrot.slane %v1830_v61, 2  ;;  %v1846_v59 = vadd.f32 %v1840_v18, %v1793_v0  ;;  %v3741_v0 = vld [vmem:[#allocation8 + $0x78] sm:$0xff]  ;;  %v3745_v18 = vld [vmem:[#allocation8 + $0x68] sm:$0xff] }
 0x1f1   :  { %v1857_v36 = vmax.f32 %v1853_v53, 0.0  ;;  %2039 = vmatpush.bf16.msra.mxu2 %v3741_v0  ;;  %v3742_v53 = vld [vmem:[#allocation8 + $0x50] sm:$0xff]  ;;  %2075 = vmatpush.bf16.msrb.mxu3 %v3745_v18 }
 0x1f2   :  { %v1838_v21 = vsel %vm1837_vm3, %v1835_v54, %v1836_v4  ;;  %v1841_v62 = vsel %vm1837_vm3, %v1836_v4, %v1833_v49  ;;  %v1852_v34 = vadd.f32 %v3813_v23, %v1846_v59  ;;  %v3744_v59 = vld [vmem:[#allocation8 + $0x60] sm:$0xff]  ;;  %1997 = vmatpush.bf16.msrb.mxu1 %v3742_v53 }
 0x1f3   :  { %v1845_v31 = vmul.f32 %v4791_v6, %v1841_v62  ;;  %v1863_v24 = vsel %vm1621_vm0, %v1857_v36, 0.0  ;;  %v1848_v29 = vadd.f32 %v1838_v21, %v1795_v19  ;;  %v3740_v19 = vld [vmem:[#allocation8 + $0x70] sm:$0xff] }
 0x1f4   :  { %1864 = vadd.xlane.f32.xlu1 %v1863_v24  ;;  %v1856_v26 = vmax.f32 %v1852_v34, 0.0 }
 0x1f5   :  { %v1854_v5 = vadd.f32 %v3813_v23, %v1848_v29  ;;  %v1849_v63 = vadd.f32 %v1845_v31, %v1796_v13  ;;  %2040 = vmatpush.bf16.msra.mxu2 %v3740_v19  ;;  %2076 = vmatpush.bf16.msrb.mxu3 %v3744_v59 }
 0x1f6   :  { %v1860_v43 = vsel %vm1621_vm0, %v1856_v26, 0.0 }
 0x1f7   :  { %v1858_v7 = vmax.f32 %v1854_v5, 0.0  ;;  %1861 = vadd.xlane.f32.xlu0 %v1860_v43  ;;  %v1855_v9 = vadd.f32 %v3813_v23, %v1849_v63 }
 0x1f9   :  { %v1866_v30 = vsel %vm1621_vm0, %v1858_v7, 0.0  ;;  %v1859_v50 = vmax.f32 %v1855_v9, 0.0 }
 0x1fa   :  { %1867 = vadd.xlane.f32.xlu2 %v1866_v30  ;;  %v3749_v30 = vld [vmem:[#allocation8 + $0x98] sm:$0xff] }
 0x1fb   :  { %v1869_v11 = vsel %vm1621_vm0, %v1859_v50, 0.0  ;;  %2179 = vmatpush.bf16.msra.mxu1 %v3749_v30 }
 0x202   :  { %1870 = vadd.xlane.f32.xlu2 %v1869_v11 }
 0x267   :  { %v1865_v45 = vpop.xlane.xlu1 %1864 }
 0x268   :  { %v1873_v41 = vmul.f32 0.03125, %v1865_v45  ;;  %v3748_v45 = vld [vmem:[#allocation8 + $0x90] sm:$0xff] }
 0x269   :  { %2180 = vmatpush.bf16.msra.mxu1 %v3748_v45 }
 0x26a   :  { %v4802_v14 = vsub.f32 %v1857_v36, %v1873_v41  ;;  %v1862_v17 = vpop.xlane.xlu0 %1861  ;;  %v3746_v36 = vld [vmem:[#allocation8 + $0x80] sm:$0xff]  ;;  %v3814_v41 = vld [vmem:[%s5202_s7] ss:$0 sm:$0xff] }
 0x26b   :  { %v1872_v2 = vmul.f32 0.03125, %v1862_v17  ;;  %2128 = vmatpush.bf16.msra.mxu0 %v3746_v36 }
 0x26c   :  { %v1881_v33 = vmul.f32 %v4802_v14, %v4802_v14 }
 0x26d   :  { %v1868_v40 = vpop.xlane.xlu2 %1867  ;;  %v4806_v3 = vsub.f32 %v1856_v26, %v1872_v2 }
 0x26e   :  { %v1887_v37 = vsel %vm1621_vm0, %v1881_v33, 0.0  ;;  %v1874_v58 = vmul.f32 0.03125, %v1868_v40 }
 0x26f   :  { %1888 = vadd.xlane.f32.xlu1 %v1887_v37  ;;  %v1880_v54 = vmul.f32 %v4806_v3, %v4806_v3 }
 0x270   :  { %v4811_v57 = vsub.f32 %v1858_v7, %v1874_v58 }
 0x271   :  { %v1884_v32 = vsel %vm1621_vm0, %v1880_v54, 0.0  ;;  %v3815_v54 = vld [vmem:[#allocation9] ss:$0 sm:$0xff] }
 0x272   :  { %v1882_v42 = vmul.f32 %v4811_v57, %v4811_v57  ;;  %1885 = vadd.xlane.f32.xlu0 %v1884_v32 }
 0x274   :  { %v1890_v47 = vsel %vm1621_vm0, %v1882_v42, 0.0 }
 0x275   :  { %1891 = vadd.xlane.f32.xlu2 %v1890_v47  ;;  %v1871_v38 = vpop.xlane.xlu2 %1870 }
 0x276   :  { %v1875_v16 = vmul.f32 0.03125, %v1871_v38 }
 0x278   :  { %v4817_v12 = vsub.f32 %v1859_v50, %v1875_v16 }
 0x27a   :  { %v1883_v25 = vmul.f32 %v4817_v12, %v4817_v12 }
 0x27c   :  { %v1893_v44 = vsel %vm1621_vm0, %v1883_v25, 0.0 }
 0x27d   :  { %1894 = vadd.xlane.f32.xlu0 %v1893_v44 }
 0x2e2   :  { %v1889_v28 = vpop.xlane.xlu1 %1888 }
 0x2e3   :  { %v1897_v48 = vmul.f32 0.03125, %v1889_v28 }
 0x2e5   :  { %v1901_v23 = vadd.f32 1e-12, %v1897_v48  ;;  %v1886_v60 = vpop.xlane.xlu0 %1885 }
 0x2e6   :  { %v1896_v55 = vmul.f32 0.03125, %v1886_v60 }
 0x2e7   :  { %3828 = vrsqrt.f32 %v1901_v23  ;;  %vm1920_vm10 = vweird.f32 %v1901_v23 }
 0x2e8   :  { %v1892_v52 = vpop.xlane.xlu2 %1891  ;;  %v1900_v49 = vadd.f32 1e-12, %v1896_v55 }
 0x2e9   :  { %v1898_v8 = vmul.f32 0.03125, %v1892_v52 }
 0x2ea   :  { %3830 = vrsqrt.f32 %v1900_v49  ;;  %vm1910_vm11 = vweird.f32 %v1900_v49 }
 0x2eb   :  { %v4822_v39 = vadd.f32 1e-12, %v1898_v8 }
 0x2ed   :  { %v3829_v61 = vpop.eup %3828  ;;  %3832 = vrsqrt.f32 %v4822_v39  ;;  %vm1930_vm2 = vweird.f32 %v4822_v39 }
 0x2ee   :  { %v1915_v4 = vmul.f32 %v3829_v61, %v1901_v23  ;;  %vm1921_vm9 = vweird.f32 %v3829_v61 }
 0x2ef   :  { %vm1922_vm5 = vmor %vm1920_vm10, %vm1921_vm9 }
 0x2f0   :  { %v3831_v13 = vpop.eup %3830  ;;  %v1916_v21 = vmul.f32 %v3829_v61, %v1915_v4  ;;  %v1895_v62 = vpop.xlane.xlu0 %1894 }
 0x2f1   :  { %v1905_v34 = vmul.f32 %v3831_v13, %v1900_v49  ;;  %v1899_v31 = vmul.f32 0.03125, %v1895_v62  ;;  %vm1911_vm8 = vweird.f32 %v3831_v13 }
 0x2f2   :  { %v1917_v24 = vmul.f32 0.5, %v1916_v21  ;;  %vm1912_vm12 = vmor %vm1910_vm11, %vm1911_vm8 }
 0x2f3   :  { %v3833_v29 = vpop.eup %3832  ;;  %v1906_v26 = vmul.f32 %v3831_v13, %v1905_v34  ;;  %v1903_v5 = vadd.f32 1e-12, %v1899_v31 }
 0x2f4   :  { %v1918_v63 = vsub.f32 1.5, %v1917_v24  ;;  %v1925_v43 = vmul.f32 %v3833_v29, %v4822_v39  ;;  %vm1931_vm15 = vweird.f32 %v3833_v29 }
 0x2f5   :  { %v1907_v7 = vmul.f32 0.5, %v1906_v26  ;;  %3834 = vrsqrt.f32 %v1903_v5  ;;  %vm1932_vm4 = vmor %vm1930_vm2, %vm1931_vm15  ;;  %vm1940_vm6 = vweird.f32 %v1903_v5 }
 0x2f6   :  { %v1919_v9 = vmul.f32 %v3829_v61, %v1918_v63  ;;  %v1926_v50 = vmul.f32 %v3833_v29, %v1925_v43 }
 0x2f7   :  { %v1908_v11 = vsub.f32 1.5, %v1907_v7 }
 0x2f8   :  { %v1923_v17 = vsel %vm1922_vm5, %v3829_v61, %v1919_v9  ;;  %v1927_v33 = vmul.f32 0.5, %v1926_v50 }
 0x2f9   :  { %v1945_v2 = vmul.f32 %v1923_v17, %v4802_v14  ;;  %v1909_v40 = vmul.f32 %v3831_v13, %v1908_v11 }
 0x2fa   :  { %v1928_v38 = vsub.f32 1.5, %v1927_v33 }
 0x2fb   :  { %v3835_v37 = vpop.eup %3834  ;;  %v1913_v58 = vsel %vm1912_vm12, %v3831_v13, %v1909_v40  ;;  %v1951_v32 = vmul.f32 %v3814_v41, %v1945_v2 }
 0x2fc   :  { %v1944_v42 = vmul.f32 %v1913_v58, %v4806_v3  ;;  %v1935_v47 = vmul.f32 %v3835_v37, %v1903_v5  ;;  %v1929_v23 = vmul.f32 %v3833_v29, %v1928_v38  ;;  %vm1941_vm1 = vweird.f32 %v3835_v37 }
 0x2fd   :  { %v1957_v44 = vadd.f32 %v3815_v54, %v1951_v32  ;;  %vm1942_vm9 = vmor %vm1940_vm6, %vm1941_vm1 }
 0x2fe   :  { %v1950_v16 = vmul.f32 %v3814_v41, %v1944_v42  ;;  %v1936_v25 = vmul.f32 %v3835_v37, %v1935_v47  ;;  %v1933_v3 = vsel %vm1932_vm4, %v3833_v29, %v1929_v23  ;;  %v3816_v47 = vld [vmem:[%s5201_s6 + $0x1] ss:$0 sm:$0xff] }
 0x2ff   :  { %v1946_v8 = vmul.f32 %v1933_v3, %v4811_v57 }
 0x300   :  { %v1956_v28 = vadd.f32 %v3815_v54, %v1950_v16  ;;  %v1937_v48 = vmul.f32 0.5, %v1936_v25 }
 0x301   :  { %v1952_v39 = vmul.f32 %v3814_v41, %v1946_v8 }
 0x302   :  { %v1938_v14 = vsub.f32 1.5, %v1937_v48  ;;  %v1960_v60 = vpack.c.bf16 %v1957_v44, %v1956_v28 }
 0x303   :  { %v1958_v18 = vadd.f32 %v3815_v54, %v1952_v39 }
 0x304   :  { %v1939_v55 = vmul.f32 %v3835_v37, %v1938_v14  ;;  %3537 = vmatmul.msk.bf16.vlgmr.msrb.gmra.mxu1 %vm1621_vm0, %v1960_v60  ;;  %3547 = vmatmul.msk.bf16.vlgmr.msra.gmra.mxu2 %vm1621_vm0, %v1960_v60 }
 0x305   :  { %3557 = vmatmul.msk.bf16.vlgmr.msrb.gmra.mxu3 %vm1621_vm0, %v1960_v60  ;;  %3567 = vmatmul.msk.bf16.vlgmr.msra.gmra.mxu0 %vm1621_vm0, %v1960_v60 }
 0x306   :  { %v1943_v52 = vsel %vm1942_vm9, %v3835_v37, %v1939_v55 }
 0x307   :  { %v1947_v49 = vmul.f32 %v1943_v52, %v4817_v12 }
 0x309   :  { %v1953_v27 = vmul.f32 %v3814_v41, %v1947_v49 }
 0x30b   :  { %v1959_v0 = vadd.f32 %v3815_v54, %v1953_v27 }
 0x30d   :  { %v1961_v51 = vpack.c.bf16 %v1959_v0, %v1958_v18 }
 0x314   :  { %3538 = vmatmul.msk.bf16.gmra.mxu1 %vm1621_vm0, %v1961_v51  ;;  %3548 = vmatmul.msk.bf16.gmra.mxu2 %vm1621_vm0, %v1961_v51 }
 0x315   :  { %3558 = vmatmul.msk.bf16.gmra.mxu3 %vm1621_vm0, %v1961_v51  ;;  %3568 = vmatmul.msk.bf16.gmra.mxu0 %vm1621_vm0, %v1961_v51 }
 0x324   :  { %3577 = vmatmul.msk.bf16.vlgmr.msra.gmra.mxu1 %vm1621_vm0, %v1960_v60 }
 0x334   :  { %3578 = vmatmul.msk.bf16.gmra.mxu1 %vm1621_vm0, %v1961_v51 }
 0x381   :  { %v1999_v12 = vpop.f32.mrf.mxu1 }
 0x382   :  { %v4844_v4 = vpop.f32.mrf.mxu0  ;;  %v2009_v62 = vrot.slane %v1999_v12, 6 }
 0x383   :  { %v2140_v11 = vrot.slane %v4844_v4, 1 }
 0x387   :  { %v2042_v59 = vpop.f32.mrf.mxu2 }
 0x388   :  { %v2078_v61 = vpop.f32.mrf.mxu3 }
 0x389   :  { %v2001_v57 = vpop.f32.mrf.mxu1  ;;  %v2088_v26 = vrot.slane %v2078_v61, 7 }
 0x38a   :  { %v2132_v34 = vpop.f32.mrf.mxu0  ;;  %v2010_v2 = vrot.slane %v2001_v57, 6 }
 0x38b   :  { %v2141_v9 = vrot.slane %v2132_v34, 1 }
 0x38c   :  { %v2015_v28 = vsel %vm1651_vm7, %v2009_v62, %v2010_v2 }
 0x38d   :  { %v2146_v33 = vsel %vm1784_vm14, %v2140_v11, %v2141_v9 }
 0x38f   :  { %v2044_v31 = vpop.f32.mrf.mxu2 }
 0x390   :  { %v2080_v53 = vpop.f32.mrf.mxu3  ;;  %v2045_v14 = vadd.f32 %v2044_v31, %v2015_v28 }
 0x391   :  { %v2004_v19 = vpop.f32.mrf.mxu1  ;;  %v2089_v38 = vrot.slane %v2080_v53, 7 }
 0x392   :  { %v2135_v45 = vpop.f32.mrf.mxu0  ;;  %v2011_v37 = vrot.slane %v2004_v19, 6 }
 0x393   :  { %v2142_v58 = vrot.slane %v2135_v45, 1  ;;  %v2094_v55 = vsel %vm1731_vm13, %v2088_v26, %v2089_v38 }
 0x394   :  { %v2014_v23 = vsel %vm1651_vm7, %v2010_v2, %v2011_v37  ;;  %v2101_v51 = vadd.f32 %v2094_v55, %v2045_v14 }
 0x395   :  { %v2145_v48 = vsel %vm1784_vm14, %v2141_v9, %v2142_v58  ;;  %v2019_v49 = vmul.f32 %v4734_v35, %v2014_v23 }
 0x396   :  { %v2149_v52 = vmul.f32 %v4740_v10, %v2145_v48 }
 0x397   :  { %v2047_v17 = vpop.f32.mrf.mxu2 }
 0x398   :  { %v2083_v36 = vpop.f32.mrf.mxu3  ;;  %v2048_v4 = vadd.f32 %v2047_v17, %v2019_v49 }
 0x399   :  { %v2006_v13 = vpop.f32.mrf.mxu1  ;;  %v2090_v16 = vrot.slane %v2083_v36, 7 }
 0x39a   :  { %v2012_v21 = vrot.slane %v2006_v13, 6  ;;  %v2137_v8 = vpop.f32.mrf.mxu0  ;;  %v2153_v13 = vadd.f32 %v2149_v52, %v2101_v51 }
 0x39b   :  { %v2093_v3 = vsel %vm1731_vm13, %v2089_v38, %v2090_v16  ;;  %v2143_v57 = vrot.slane %v2137_v8, 1 }
 0x39c   :  { %v2016_v24 = vsel %vm1651_vm7, %v2012_v21, %v2009_v62  ;;  %v2098_v12 = vmul.f32 %v4745_v20, %v2093_v3  ;;  %v2013_v53 = vsel %vm1651_vm7, %v2011_v37, %v2012_v21 }
 0x39d   :  { %v2017_v5 = vmul.f32 %v4724_v15, %v2016_v24  ;;  %v2147_v24 = vsel %vm1784_vm14, %v2143_v57, %v2140_v11 }
 0x39e   :  { %v2102_v34 = vadd.f32 %v2098_v12, %v2048_v4 }
 0x39f   :  { %v2043_v50 = vadd.f32 %v2042_v59, %v2017_v5  ;;  %v2049_v0 = vpop.f32.mrf.mxu2  ;;  %v2144_v5 = vsel %vm1784_vm14, %v2142_v58, %v2143_v57 }
 0x3a0   :  { %v2085_v29 = vpop.f32.mrf.mxu3  ;;  %v2050_v59 = vadd.f32 %v2049_v0, %v2013_v53 }
 0x3a1   :  { %v2091_v63 = vrot.slane %v2085_v29, 7  ;;  %v2182_v43 = vpop.f32.mrf.mxu1 }
 0x3a2   :  { %v2192_v54 = vrot.slane %v2182_v43, 2 }
 0x3a3   :  { %v2095_v7 = vsel %vm1731_vm13, %v2091_v63, %v2088_v26  ;;  %v2092_v62 = vsel %vm1731_vm13, %v2090_v16, %v2091_v63 }
 0x3a4   :  { %v2096_v30 = vmul.f32 %v4757_v56, %v2095_v7  ;;  %v2103_v29 = vadd.f32 %v2092_v62, %v2050_v59  ;;  %v2151_v7 = vmul.f32 %v4778_v22, %v2147_v24  ;;  %v3752_v24 = vld [vmem:[#allocation8 + $0xa0] sm:$0xff] }
 0x3a6   :  { %v2100_v41 = vadd.f32 %v2096_v30, %v2043_v50  ;;  %v2154_v30 = vadd.f32 %v2144_v5, %v2102_v34  ;;  %v2155_v17 = vadd.f32 %v2151_v7, %v2103_v29  ;;  %v3755_v34 = vld [vmem:[#allocation8 + $0xb8] sm:$0xff]  ;;  %v3750_v29 = vld [vmem:[#allocation8 + $0xc0] sm:$0xff]  ;;  %v3754_v5 = vld [vmem:[#allocation8 + $0xb0] sm:$0xff] }
 0x3a7   :  { %2433 = vmatpush.bf16.msrb.mxu0 %v3755_v34 }
 0x3a8   :  { %v2152_v42 = vadd.f32 %v2146_v33, %v2100_v41 }
 0x3a9   :  { %v2184_v40 = vpop.f32.mrf.mxu1 }
 0x3aa   :  { %v2193_v32 = vrot.slane %v2184_v40, 2 }
 0x3ab   :  { %2434 = vmatpush.bf16.msrb.mxu0 %v3754_v5 }
 0x3ac   :  { %v2198_v25 = vsel %vm1837_vm3, %v2192_v54, %v2193_v32 }
 0x3ad   :  { %v2204_v44 = vadd.f32 %v2198_v25, %v2152_v42 }
 0x3af   :  { %v2210_v60 = vadd.f32 %v3816_v47, %v2204_v44 }
 0x3b1   :  { %v2187_v27 = vpop.f32.mrf.mxu1  ;;  %v2214_v39 = vmax.f32 %v2210_v60, 0.0 }
 0x3b2   :  { %v2194_v18 = vrot.slane %v2187_v27, 2 }
 0x3b3   :  { %v2218_v61 = vsel %vm1621_vm0, %v2214_v39, 0.0 }
 0x3b4   :  { %v2197_v19 = vsel %vm1837_vm3, %v2193_v32, %v2194_v18  ;;  %2219 = vadd.xlane.f32.xlu1 %v2218_v61 }
 0x3b5   :  { %v2201_v36 = vmul.f32 %v4761_v46, %v2197_v19 }
 0x3b7   :  { %v2205_v31 = vadd.f32 %v2201_v36, %v2153_v13  ;;  %v3753_v36 = vld [vmem:[#allocation8 + $0xa8] sm:$0xff] }
 0x3b8   :  { %v3751_v13 = vld [vmem:[#allocation8 + $0xc8] sm:$0xff]  ;;  %2354 = vmatpush.bf16.msrb.mxu2 %v3753_v36 }
 0x3b9   :  { %v2189_v26 = vpop.f32.mrf.mxu1  ;;  %v2211_v21 = vadd.f32 %v3816_v47, %v2205_v31  ;;  %v3757_v31 = vld [vmem:[#allocation8 + $0xd8] sm:$0xff]  ;;  %2397 = vmatpush.bf16.msra.mxu3 %v3751_v13 }
 0x3ba   :  { %v2195_v43 = vrot.slane %v2189_v26, 2  ;;  %2485 = vmatpush.bf16.msrb.mxu1 %v3757_v31 }
 0x3bb   :  { %v2215_v9 = vmax.f32 %v2211_v21, 0.0 }
 0x3bc   :  { %v2196_v50 = vsel %vm1837_vm3, %v2194_v18, %v2195_v43  ;;  %v2199_v63 = vsel %vm1837_vm3, %v2195_v43, %v2192_v54  ;;  %v3756_v43 = vld [vmem:[#allocation8 + $0xd0] sm:$0xff]  ;;  %2355 = vmatpush.bf16.msrb.mxu2 %v3752_v24 }
 0x3bd   :  { %v2203_v45 = vmul.f32 %v4791_v6, %v2199_v63  ;;  %v2221_v11 = vsel %vm1621_vm0, %v2215_v9, 0.0  ;;  %v2206_v41 = vadd.f32 %v2196_v50, %v2154_v30  ;;  %2398 = vmatpush.bf16.msra.mxu3 %v3750_v29 }
 0x3be   :  { %2222 = vadd.xlane.f32.xlu2 %v2221_v11  ;;  %2486 = vmatpush.bf16.msrb.mxu1 %v3756_v43 }
 0x3bf   :  { %v2212_v2 = vadd.f32 %v3816_v47, %v2206_v41  ;;  %v2207_v33 = vadd.f32 %v2203_v45, %v2155_v17 }
 0x3c1   :  { %v2216_v40 = vmax.f32 %v2212_v2, 0.0  ;;  %v2213_v37 = vadd.f32 %v3816_v47, %v2207_v33 }
 0x3c3   :  { %v2224_v58 = vsel %vm1621_vm0, %v2216_v40, 0.0  ;;  %v2217_v32 = vmax.f32 %v2213_v37, 0.0  ;;  %v3759_v37 = vld [vmem:[#allocation8 + $0xe8] sm:$0xff] }
 0x3c4   :  { %2225 = vadd.xlane.f32.xlu0 %v2224_v58  ;;  %2537 = vmatpush.bf16.msra.mxu2 %v3759_v37 }
 0x3c5   :  { %v2227_v42 = vsel %vm1621_vm0, %v2217_v32, 0.0 }
 0x3c6   :  { %2228 = vadd.xlane.f32.xlu1 %v2227_v42 }
 0x427   :  { %v2220_v38 = vpop.xlane.xlu1 %2219 }
 0x428   :  { %v2230_v54 = vmul.f32 0.03125, %v2220_v38  ;;  %v3758_v38 = vld [vmem:[#allocation8 + $0xe0] sm:$0xff] }
 0x429   :  { %2538 = vmatpush.bf16.msra.mxu2 %v3758_v38 }
 0x42a   :  { %v4894_v16 = vsub.f32 %v2214_v39, %v2230_v54 }
 0x42c   :  { %v2238_v25 = vmul.f32 %v4894_v16, %v4894_v16 }
 0x42e   :  { %v2242_v44 = vsel %vm1621_vm0, %v2238_v25, 0.0  ;;  %v3817_v25 = vld [vmem:[%s5202_s7 + $0x1] ss:$0 sm:$0xff] }
 0x42f   :  { %2243 = vadd.xlane.f32.xlu2 %v2242_v44 }
 0x431   :  { %v2223_v28 = vpop.xlane.xlu2 %2222 }
 0x432   :  { %v2231_v48 = vmul.f32 0.03125, %v2223_v28 }
 0x434   :  { %v4899_v47 = vsub.f32 %v2215_v9, %v2231_v48 }
 0x436   :  { %v2239_v23 = vmul.f32 %v4899_v47, %v4899_v47 }
 0x437   :  { %v2226_v14 = vpop.xlane.xlu0 %2225 }
 0x438   :  { %v2232_v60 = vmul.f32 0.03125, %v2226_v14  ;;  %v2245_v55 = vsel %vm1621_vm0, %v2239_v23, 0.0 }
 0x439   :  { %2246 = vadd.xlane.f32.xlu0 %v2245_v55  ;;  %v2229_v3 = vpop.xlane.xlu1 %2228 }
 0x43a   :  { %v4904_v52 = vsub.f32 %v2216_v40, %v2232_v60  ;;  %v2233_v49 = vmul.f32 0.03125, %v2229_v3  ;;  %v3818_v3 = vld [vmem:[#allocation9 + $0x1] ss:$0 sm:$0xff] }
 0x43c   :  { %v4906_v8 = vsub.f32 %v2217_v32, %v2233_v49  ;;  %v2240_v27 = vmul.f32 %v4904_v52, %v4904_v52 }
 0x43e   :  { %v2248_v39 = vsel %vm1621_vm0, %v2240_v27, 0.0  ;;  %v2241_v0 = vmul.f32 %v4906_v8, %v4906_v8 }
 0x43f   :  { %2249 = vadd.xlane.f32.xlu1 %v2248_v39 }
 0x440   :  { %v2251_v18 = vsel %vm1621_vm0, %v2241_v0, 0.0 }
 0x441   :  { %2252 = vadd.xlane.f32.xlu2 %v2251_v18 }
 0x4a2   :  { %v2244_v51 = vpop.xlane.xlu2 %2243 }
 0x4a3   :  { %v2254_v12 = vmul.f32 0.03125, %v2244_v51 }
 0x4a5   :  { %v2258_v61 = vadd.f32 1e-12, %v2254_v12 }
 0x4a7   :  { %3836 = vrsqrt.f32 %v2258_v61  ;;  %vm2268_vm5 = vweird.f32 %v2258_v61 }
 0x4ac   :  { %v2247_v57 = vpop.xlane.xlu0 %2246 }
 0x4ad   :  { %v3837_v53 = vpop.eup %3836  ;;  %v2255_v19 = vmul.f32 0.03125, %v2247_v57 }
 0x4ae   :  { %v2263_v4 = vmul.f32 %v3837_v53, %v2258_v61  ;;  %vm2269_vm10 = vweird.f32 %v3837_v53 }
 0x4af   :  { %v2259_v59 = vadd.f32 1e-12, %v2255_v19  ;;  %vm2270_vm8 = vmor %vm2268_vm5, %vm2269_vm10 }
 0x4b0   :  { %v2264_v62 = vmul.f32 %v3837_v53, %v2263_v4 }
 0x4b1   :  { %3838 = vrsqrt.f32 %v2259_v59  ;;  %vm2278_vm12 = vweird.f32 %v2259_v59 }
 0x4b2   :  { %v2265_v26 = vmul.f32 0.5, %v2264_v62  ;;  %v2250_v21 = vpop.xlane.xlu1 %2249 }
 0x4b3   :  { %v2256_v7 = vmul.f32 0.03125, %v2250_v21 }
 0x4b4   :  { %v2266_v30 = vsub.f32 1.5, %v2265_v26  ;;  %v2253_v9 = vpop.xlane.xlu2 %2252 }
 0x4b5   :  { %v2260_v50 = vadd.f32 1e-12, %v2256_v7  ;;  %v2257_v63 = vmul.f32 0.03125, %v2253_v9 }
 0x4b6   :  { %v2267_v41 = vmul.f32 %v3837_v53, %v2266_v30 }
 0x4b7   :  { %v3839_v45 = vpop.eup %3838  ;;  %3840 = vrsqrt.f32 %v2260_v50  ;;  %v2261_v11 = vadd.f32 1e-12, %v2257_v63  ;;  %vm2288_vm9 = vweird.f32 %v2260_v50 }
 0x4b8   :  { %v2273_v17 = vmul.f32 %v3839_v45, %v2259_v59  ;;  %v2271_v33 = vsel %vm2270_vm8, %v3837_v53, %v2267_v41  ;;  %vm2279_vm11 = vweird.f32 %v3839_v45 }
 0x4b9   :  { %3842 = vrsqrt.f32 %v2261_v11  ;;  %v2302_v44 = vmul.f32 %v2271_v33, %v4894_v16  ;;  %vm2280_vm15 = vmor %vm2278_vm12, %vm2279_vm11  ;;  %vm2298_vm4 = vweird.f32 %v2261_v11 }
 0x4ba   :  { %v2274_v2 = vmul.f32 %v3839_v45, %v2273_v17 }
 0x4bb   :  { %v2308_v49 = vmul.f32 %v3817_v25, %v2302_v44 }
 0x4bc   :  { %v2275_v40 = vmul.f32 0.5, %v2274_v2 }
 0x4bd   :  { %v3841_v58 = vpop.eup %3840  ;;  %v2314_v12 = vadd.f32 %v3818_v3, %v2308_v49 }
 0x4be   :  { %v2276_v32 = vsub.f32 1.5, %v2275_v40  ;;  %v2283_v42 = vmul.f32 %v3841_v58, %v2260_v50  ;;  %vm2289_vm2 = vweird.f32 %v3841_v58 }
 0x4bf   :  { %v3843_v54 = vpop.eup %3842  ;;  %vm2290_vm10 = vmor %vm2288_vm9, %vm2289_vm2 }
 0x4c0   :  { %v2277_v28 = vmul.f32 %v3839_v45, %v2276_v32  ;;  %v2284_v48 = vmul.f32 %v3841_v58, %v2283_v42  ;;  %v2293_v23 = vmul.f32 %v3843_v54, %v2261_v11  ;;  %vm2299_vm1 = vweird.f32 %v3843_v54 }
 0x4c1   :  { %vm2300_vm6 = vmor %vm2298_vm4, %vm2299_vm1 }
 0x4c2   :  { %v2281_v14 = vsel %vm2280_vm15, %v3839_v45, %v2277_v28  ;;  %v2285_v60 = vmul.f32 0.5, %v2284_v48  ;;  %v2294_v55 = vmul.f32 %v3843_v54, %v2293_v23 }
 0x4c3   :  { %v2303_v27 = vmul.f32 %v2281_v14, %v4899_v47 }
 0x4c4   :  { %v2286_v39 = vsub.f32 1.5, %v2285_v60  ;;  %v2295_v0 = vmul.f32 0.5, %v2294_v55 }
 0x4c5   :  { %v2309_v18 = vmul.f32 %v3817_v25, %v2303_v27  ;;  %v3819_v27 = vld [vmem:[%s5201_s6 + $0x2] ss:$0 sm:$0xff] }
 0x4c6   :  { %v2296_v51 = vsub.f32 1.5, %v2295_v0  ;;  %v2287_v61 = vmul.f32 %v3841_v58, %v2286_v39 }
 0x4c7   :  { %v2315_v16 = vadd.f32 %v3818_v3, %v2309_v18 }
 0x4c8   :  { %v2297_v57 = vmul.f32 %v3843_v54, %v2296_v51  ;;  %v2291_v47 = vsel %vm2290_vm10, %v3841_v58, %v2287_v61 }
 0x4c9   :  { %v2318_v53 = vpack.c.bf16 %v2315_v16, %v2314_v12  ;;  %v2304_v59 = vmul.f32 %v2291_v47, %v4904_v52 }
 0x4ca   :  { %v2301_v19 = vsel %vm2300_vm6, %v3843_v54, %v2297_v57 }
 0x4cb   :  { %3587 = vmatmul.msk.bf16.vlgmr.msrb.gmra.mxu2 %vm1621_vm0, %v2318_v53  ;;  %3597 = vmatmul.msk.bf16.vlgmr.msra.gmra.mxu3 %vm1621_vm0, %v2318_v53  ;;  %v2305_v4 = vmul.f32 %v2301_v19, %v4906_v8  ;;  %v2310_v13 = vmul.f32 %v3817_v25, %v2304_v59 }
 0x4cc   :  { %3607 = vmatmul.msk.bf16.vlgmr.msrb.gmra.mxu0 %vm1621_vm0, %v2318_v53  ;;  %3617 = vmatmul.msk.bf16.vlgmr.msrb.gmra.mxu1 %vm1621_vm0, %v2318_v53 }
 0x4cd   :  { %v2311_v36 = vmul.f32 %v3817_v25, %v2305_v4  ;;  %v2316_v34 = vadd.f32 %v3818_v3, %v2310_v13 }
 0x4cf   :  { %v2317_v62 = vadd.f32 %v3818_v3, %v2311_v36 }
 0x4d1   :  { %v2319_v31 = vpack.c.bf16 %v2317_v62, %v2316_v34 }
 0x4db   :  { %3588 = vmatmul.msk.bf16.gmra.mxu2 %vm1621_vm0, %v2319_v31  ;;  %3598 = vmatmul.msk.bf16.gmra.mxu3 %vm1621_vm0, %v2319_v31 }
 0x4dc   :  { %3608 = vmatmul.msk.bf16.gmra.mxu0 %vm1621_vm0, %v2319_v31  ;;  %3618 = vmatmul.msk.bf16.gmra.mxu1 %vm1621_vm0, %v2319_v31 }
 0x4eb   :  { %3627 = vmatmul.msk.bf16.vlgmr.msra.gmra.mxu2 %vm1621_vm0, %v2318_v53 }
 0x4fb   :  { %3628 = vmatmul.msk.bf16.gmra.mxu2 %vm1621_vm0, %v2319_v31 }
 0x549   :  { %v2436_v8 = vpop.f32.mrf.mxu0  ;;  %v4933_v5 = vpop.f32.mrf.mxu1 }
 0x54a   :  { %v2446_v17 = vrot.slane %v2436_v8, 7  ;;  %v2498_v38 = vrot.slane %v4933_v5, 1 }
 0x54e   :  { %v2357_v24 = vpop.f32.mrf.mxu2  ;;  %v2400_v43 = vpop.f32.mrf.mxu3 }
 0x54f   :  { %v2367_v30 = vrot.slane %v2357_v24, 6 }
 0x551   :  { %v2438_v52 = vpop.f32.mrf.mxu0  ;;  %v2490_v45 = vpop.f32.mrf.mxu1 }
 0x552   :  { %v2499_v58 = vrot.slane %v2490_v45, 1  ;;  %v2447_v39 = vrot.slane %v2438_v52, 7 }
 0x554   :  { %v2504_v28 = vsel %vm1784_vm14, %v2498_v38, %v2499_v58  ;;  %v2452_v19 = vsel %vm1731_vm13, %v2446_v17, %v2447_v39 }
 0x556   :  { %v2359_v29 = vpop.f32.mrf.mxu2  ;;  %v2402_v2 = vpop.f32.mrf.mxu3 }
 0x557   :  { %v2368_v42 = vrot.slane %v2359_v29, 6 }
 0x559   :  { %v4931_v26 = vpop.f32.mrf.mxu0  ;;  %v2493_v54 = vpop.f32.mrf.mxu1  ;;  %v2373_v23 = vsel %vm1651_vm7, %v2367_v30, %v2368_v42 }
 0x55a   :  { %v2500_v14 = vrot.slane %v2493_v54, 1  ;;  %v2403_v51 = vadd.f32 %v2402_v2, %v2373_v23  ;;  %v2448_v16 = vrot.slane %v4931_v26, 7 }
 0x55c   :  { %v2503_v61 = vsel %vm1784_vm14, %v2499_v58, %v2500_v14  ;;  %v2459_v47 = vadd.f32 %v2452_v19, %v2403_v51  ;;  %v2451_v62 = vsel %vm1731_vm13, %v2447_v39, %v2448_v16 }
 0x55d   :  { %v2507_v4 = vmul.f32 %v4740_v10, %v2503_v61 }
 0x55e   :  { %v2362_v21 = vpop.f32.mrf.mxu2  ;;  %v2405_v60 = vpop.f32.mrf.mxu3 }
 0x55f   :  { %v2369_v44 = vrot.slane %v2362_v21, 6  ;;  %v2456_v21 = vmul.f32 %v4745_v20, %v2451_v62 }
 0x561   :  { %v2443_v50 = vpop.f32.mrf.mxu0  ;;  %v2372_v0 = vsel %vm1651_vm7, %v2368_v42, %v2369_v44  ;;  %v2495_v59 = vpop.f32.mrf.mxu1 }
 0x562   :  { %v2449_v11 = vrot.slane %v2443_v50, 7  ;;  %v2377_v57 = vmul.f32 %v4734_v35, %v2372_v0  ;;  %v2501_v52 = vrot.slane %v2495_v59, 1 }
 0x564   :  { %v2453_v40 = vsel %vm1731_vm13, %v2449_v11, %v2446_v17  ;;  %v2406_v8 = vadd.f32 %v2405_v60, %v2377_v57  ;;  %v2502_v2 = vsel %vm1784_vm14, %v2500_v14, %v2501_v52 }
 0x565   :  { %v2454_v32 = vmul.f32 %v4757_v56, %v2453_v40 }
 0x566   :  { %v2364_v7 = vpop.f32.mrf.mxu2  ;;  %v2407_v29 = vpop.f32.mrf.mxu3 }
 0x567   :  { %v2370_v9 = vrot.slane %v2364_v7, 6  ;;  %v2511_v7 = vadd.f32 %v2507_v4, %v2459_v47 }
 0x569   :  { %v2374_v63 = vsel %vm1651_vm7, %v2370_v9, %v2367_v30  ;;  %v2371_v34 = vsel %vm1651_vm7, %v2369_v44, %v2370_v9  ;;  %v2460_v30 = vadd.f32 %v2456_v21, %v2406_v8  ;;  %v2505_v9 = vsel %vm1784_vm14, %v2501_v52, %v2498_v38 }
 0x56a   :  { %v2375_v41 = vmul.f32 %v4724_v15, %v2374_v63  ;;  %v2408_v5 = vadd.f32 %v2407_v29, %v2371_v34  ;;  %v2450_v63 = vsel %vm1731_vm13, %v2448_v16, %v2449_v11  ;;  %v2509_v40 = vmul.f32 %v4778_v22, %v2505_v9  ;;  %v3767_v9 = vld [vmem:[#allocation8 + $0x128] sm:$0xff] }
 0x56b   :  { %2843 = vmatpush.bf16.msrb.mxu2 %v3767_v9 }
 0x56c   :  { %v2401_v37 = vadd.f32 %v2400_v43, %v2375_v41  ;;  %v2461_v45 = vadd.f32 %v2450_v63, %v2408_v5  ;;  %v3762_v63 = vld [vmem:[#allocation8 + $0xf0] sm:$0xff] }
 0x56e   :  { %v2540_v33 = vpop.f32.mrf.mxu2  ;;  %v2458_v25 = vadd.f32 %v2454_v32, %v2401_v37  ;;  %v2512_v37 = vadd.f32 %v2502_v2, %v2460_v30  ;;  %v2513_v38 = vadd.f32 %v2509_v40, %v2461_v45  ;;  %v3760_v45 = vld [vmem:[#allocation8 + $0x110] sm:$0xff]  ;;  %v3764_v2 = vld [vmem:[#allocation8 + $0x100] sm:$0xff] }
 0x56f   :  { %v2550_v55 = vrot.slane %v2540_v33, 2 }
 0x570   :  { %v2510_v49 = vadd.f32 %v2504_v28, %v2458_v25 }
 0x576   :  { %v2542_v48 = vpop.f32.mrf.mxu2 }
 0x577   :  { %v2551_v3 = vrot.slane %v2542_v48, 2 }
 0x579   :  { %v2556_v18 = vsel %vm1837_vm3, %v2550_v55, %v2551_v3 }
 0x57a   :  { %v2562_v12 = vadd.f32 %v2556_v18, %v2510_v49 }
 0x57c   :  { %v2568_v53 = vadd.f32 %v3819_v27, %v2562_v12 }
 0x57e   :  { %v2545_v36 = vpop.f32.mrf.mxu2  ;;  %v2572_v13 = vmax.f32 %v2568_v53, 0.0 }
 0x57f   :  { %v2552_v31 = vrot.slane %v2545_v36, 2 }
 0x580   :  { %v2576_v24 = vsel %vm1621_vm0, %v2572_v13, 0.0 }
 0x581   :  { %v2555_v26 = vsel %vm1837_vm3, %v2551_v3, %v2552_v31  ;;  %2577 = vadd.xlane.f32.xlu0 %v2576_v24 }
 0x582   :  { %v2559_v43 = vmul.f32 %v4761_v46, %v2555_v26 }
 0x584   :  { %v2563_v50 = vadd.f32 %v2559_v43, %v2511_v7  ;;  %v3763_v43 = vld [vmem:[#allocation8 + $0xf8] sm:$0xff] }
 0x585   :  { %v3761_v7 = vld [vmem:[#allocation8 + $0x118] sm:$0xff]  ;;  %2712 = vmatpush.bf16.msrb.mxu3 %v3763_v43 }
 0x586   :  { %v2547_v41 = vpop.f32.mrf.mxu2  ;;  %v2569_v17 = vadd.f32 %v3819_v27, %v2563_v50  ;;  %v3765_v50 = vld [vmem:[#allocation8 + $0x108] sm:$0xff]  ;;  %2755 = vmatpush.bf16.msra.mxu0 %v3761_v7 }
 0x587   :  { %v2553_v33 = vrot.slane %v2547_v41, 2  ;;  %2791 = vmatpush.bf16.msra.mxu1 %v3765_v50 }
 0x588   :  { %v2573_v58 = vmax.f32 %v2569_v17, 0.0 }
 0x589   :  { %v2554_v32 = vsel %vm1837_vm3, %v2552_v31, %v2553_v33  ;;  %v2557_v42 = vsel %vm1837_vm3, %v2553_v33, %v2550_v55  ;;  %v3766_v33 = vld [vmem:[#allocation8 + $0x120] sm:$0xff]  ;;  %2713 = vmatpush.bf16.msrb.mxu3 %v3762_v63 }
 0x58a   :  { %v2561_v11 = vmul.f32 %v4791_v6, %v2557_v42  ;;  %v2579_v54 = vsel %vm1621_vm0, %v2573_v58, 0.0  ;;  %v2564_v25 = vadd.f32 %v2554_v32, %v2512_v37  ;;  %2756 = vmatpush.bf16.msra.mxu0 %v3760_v45  ;;  %2844 = vmatpush.bf16.msrb.mxu2 %v3766_v33 }
 0x58b   :  { %2580 = vadd.xlane.f32.xlu1 %v2579_v54  ;;  %2792 = vmatpush.bf16.msra.mxu1 %v3764_v2 }
 0x58c   :  { %v2570_v44 = vadd.f32 %v3819_v27, %v2564_v25  ;;  %v2565_v28 = vadd.f32 %v2561_v11, %v2513_v38 }
 0x58e   :  { %v2574_v48 = vmax.f32 %v2570_v44, 0.0  ;;  %v2571_v23 = vadd.f32 %v3819_v27, %v2565_v28 }
 0x590   :  { %v2582_v14 = vsel %vm1621_vm0, %v2574_v48, 0.0  ;;  %v2575_v60 = vmax.f32 %v2571_v23, 0.0  ;;  %v3769_v23 = vld [vmem:[#allocation8 + $0x138] sm:$0xff] }
 0x591   :  { %2583 = vadd.xlane.f32.xlu2 %v2582_v14  ;;  %2895 = vmatpush.bf16.msra.mxu3 %v3769_v23 }
 0x592   :  { %v2585_v3 = vsel %vm1621_vm0, %v2575_v60, 0.0 }
 0x593   :  { %2586 = vadd.xlane.f32.xlu0 %v2585_v3 }
 0x5f4   :  { %v2578_v49 = vpop.xlane.xlu0 %2577 }
 0x5f5   :  { %v2588_v55 = vmul.f32 0.03125, %v2578_v49  ;;  %v3768_v49 = vld [vmem:[#allocation8 + $0x130] sm:$0xff] }
 0x5f6   :  { %2896 = vmatpush.bf16.msra.mxu3 %v3768_v49 }
 0x5f7   :  { %v4984_v39 = vsub.f32 %v2572_v13, %v2588_v55 }
 0x5f9   :  { %v2596_v0 = vmul.f32 %v4984_v39, %v4984_v39 }
 0x5fb   :  { %v2600_v18 = vsel %vm1621_vm0, %v2596_v0, 0.0  ;;  %v3820_v0 = vld [vmem:[%s5202_s7 + $0x2] ss:$0 sm:$0xff] }
 0x5fc   :  { %2601 = vadd.xlane.f32.xlu1 %v2600_v18 }
 0x5fe   :  { %v2581_v51 = vpop.xlane.xlu1 %2580 }
 0x5ff   :  { %v2589_v12 = vmul.f32 0.03125, %v2581_v51 }
 0x601   :  { %v4989_v27 = vsub.f32 %v2573_v58, %v2589_v12 }
 0x603   :  { %v2597_v16 = vmul.f32 %v4989_v27, %v4989_v27 }
 0x604   :  { %v2584_v61 = vpop.xlane.xlu2 %2583 }
 0x605   :  { %v2590_v57 = vmul.f32 0.03125, %v2584_v61  ;;  %v2603_v53 = vsel %vm1621_vm0, %v2597_v16, 0.0 }
 0x606   :  { %2604 = vadd.xlane.f32.xlu2 %v2603_v53  ;;  %v2587_v19 = vpop.xlane.xlu0 %2586 }
 0x607   :  { %v4994_v47 = vsub.f32 %v2574_v48, %v2590_v57  ;;  %v2591_v4 = vmul.f32 0.03125, %v2587_v19  ;;  %v3821_v19 = vld [vmem:[#allocation9 + $0x2] ss:$0 sm:$0xff] }
 0x609   :  { %v4996_v59 = vsub.f32 %v2575_v60, %v2591_v4  ;;  %v2598_v36 = vmul.f32 %v4994_v47, %v4994_v47 }
 0x60b   :  { %v2606_v13 = vsel %vm1621_vm0, %v2598_v36, 0.0  ;;  %v2599_v62 = vmul.f32 %v4996_v59, %v4996_v59 }
 0x60c   :  { %2607 = vadd.xlane.f32.xlu0 %v2606_v13 }
 0x60d   :  { %v2609_v34 = vsel %vm1621_vm0, %v2599_v62, 0.0 }
 0x60e   :  { %2610 = vadd.xlane.f32.xlu1 %v2609_v34 }
 0x66f   :  { %v2602_v31 = vpop.xlane.xlu1 %2601 }
 0x670   :  { %v2612_v8 = vmul.f32 0.03125, %v2602_v31 }
 0x672   :  { %v2616_v24 = vadd.f32 1e-12, %v2612_v8 }
 0x674   :  { %3844 = vrsqrt.f32 %v2616_v24  ;;  %vm2626_vm8 = vweird.f32 %v2616_v24 }
 0x679   :  { %v2605_v52 = vpop.xlane.xlu2 %2604 }
 0x67a   :  { %v3845_v29 = vpop.eup %3844  ;;  %v2613_v26 = vmul.f32 0.03125, %v2605_v52 }
 0x67b   :  { %v2621_v21 = vmul.f32 %v3845_v29, %v2616_v24  ;;  %vm2627_vm5 = vweird.f32 %v3845_v29 }
 0x67c   :  { %v2617_v5 = vadd.f32 1e-12, %v2613_v26  ;;  %vm2628_vm11 = vmor %vm2626_vm8, %vm2627_vm5 }
 0x67d   :  { %v2622_v30 = vmul.f32 %v3845_v29, %v2621_v21 }
 0x67e   :  { %3846 = vrsqrt.f32 %v2617_v5  ;;  %vm2636_vm15 = vweird.f32 %v2617_v5 }
 0x67f   :  { %v2623_v41 = vmul.f32 0.5, %v2622_v30  ;;  %v2608_v17 = vpop.xlane.xlu0 %2607 }
 0x680   :  { %v2614_v40 = vmul.f32 0.03125, %v2608_v17 }
 0x681   :  { %v2624_v37 = vsub.f32 1.5, %v2623_v41  ;;  %v2611_v58 = vpop.xlane.xlu1 %2610 }
 0x682   :  { %v2618_v32 = vadd.f32 1e-12, %v2614_v40  ;;  %v2615_v42 = vmul.f32 0.03125, %v2611_v58 }
 0x683   :  { %v2625_v54 = vmul.f32 %v3845_v29, %v2624_v37 }
 0x684   :  { %v3847_v38 = vpop.eup %3846  ;;  %3848 = vrsqrt.f32 %v2618_v32  ;;  %v2619_v11 = vadd.f32 1e-12, %v2615_v42  ;;  %vm2646_vm10 = vweird.f32 %v2618_v32 }
 0x685   :  { %v2631_v25 = vmul.f32 %v3847_v38, %v2617_v5  ;;  %v2629_v28 = vsel %vm2628_vm11, %v3845_v29, %v2625_v54  ;;  %vm2637_vm12 = vweird.f32 %v3847_v38 }
 0x686   :  { %3850 = vrsqrt.f32 %v2619_v11  ;;  %v2660_v18 = vmul.f32 %v2629_v28, %v4984_v39  ;;  %vm2638_vm1 = vmor %vm2636_vm15, %vm2637_vm12  ;;  %vm2656_vm6 = vweird.f32 %v2619_v11 }
 0x687   :  { %v2632_v44 = vmul.f32 %v3847_v38, %v2631_v25 }
 0x688   :  { %v2666_v4 = vmul.f32 %v3820_v0, %v2660_v18 }
 0x689   :  { %v2633_v48 = vmul.f32 0.5, %v2632_v44 }
 0x68a   :  { %v3849_v14 = vpop.eup %3848  ;;  %v2672_v8 = vadd.f32 %v3821_v19, %v2666_v4  ;;  %v3822_v4 = vld [vmem:[%s5201_s6 + $0x3] ss:$0 sm:$0xff] }
 0x68b   :  { %v2634_v60 = vsub.f32 1.5, %v2633_v48  ;;  %v2641_v3 = vmul.f32 %v3849_v14, %v2618_v32  ;;  %vm2647_vm4 = vweird.f32 %v3849_v14 }
 0x68c   :  { %v3851_v55 = vpop.eup %3850  ;;  %vm2648_vm5 = vmor %vm2646_vm10, %vm2647_vm4 }
 0x68d   :  { %v2635_v51 = vmul.f32 %v3847_v38, %v2634_v60  ;;  %v2642_v12 = vmul.f32 %v3849_v14, %v2641_v3  ;;  %v2651_v16 = vmul.f32 %v3851_v55, %v2619_v11  ;;  %vm2657_vm2 = vweird.f32 %v3851_v55 }
 0x68e   :  { %vm2658_vm9 = vmor %vm2656_vm6, %vm2657_vm2 }
 0x68f   :  { %v2639_v61 = vsel %vm2638_vm1, %v3847_v38, %v2635_v51  ;;  %v2643_v57 = vmul.f32 0.5, %v2642_v12  ;;  %v2652_v53 = vmul.f32 %v3851_v55, %v2651_v16 }
 0x690   :  { %v2661_v36 = vmul.f32 %v2639_v61, %v4989_v27 }
 0x691   :  { %v2644_v13 = vsub.f32 1.5, %v2643_v57  ;;  %v2653_v62 = vmul.f32 0.5, %v2652_v53 }
 0x692   :  { %v2667_v34 = vmul.f32 %v3820_v0, %v2661_v36 }
 0x693   :  { %v2654_v31 = vsub.f32 1.5, %v2653_v62  ;;  %v2645_v24 = vmul.f32 %v3849_v14, %v2644_v13 }
 0x694   :  { %v2673_v39 = vadd.f32 %v3821_v19, %v2667_v34 }
 0x695   :  { %v2655_v52 = vmul.f32 %v3851_v55, %v2654_v31  ;;  %v2649_v27 = vsel %vm2648_vm5, %v3849_v14, %v2645_v24 }
 0x696   :  { %v2676_v29 = vpack.c.bf16 %v2673_v39, %v2672_v8  ;;  %v2662_v5 = vmul.f32 %v2649_v27, %v4994_v47 }
 0x697   :  { %v2659_v26 = vsel %vm2658_vm9, %v3851_v55, %v2655_v52 }
 0x698   :  { %3637 = vmatmul.msk.bf16.vlgmr.msrb.gmra.mxu3 %vm1621_vm0, %v2676_v29  ;;  %3647 = vmatmul.msk.bf16.vlgmr.msra.gmra.mxu0 %vm1621_vm0, %v2676_v29  ;;  %v2663_v21 = vmul.f32 %v2659_v26, %v4996_v59  ;;  %v2668_v7 = vmul.f32 %v3820_v0, %v2662_v5 }
 0x699   :  { %3657 = vmatmul.msk.bf16.vlgmr.msra.gmra.mxu1 %vm1621_vm0, %v2676_v29  ;;  %3667 = vmatmul.msk.bf16.vlgmr.msrb.gmra.mxu2 %vm1621_vm0, %v2676_v29 }
 0x69a   :  { %v2669_v43 = vmul.f32 %v3820_v0, %v2663_v21  ;;  %v2674_v50 = vadd.f32 %v3821_v19, %v2668_v7 }
 0x69c   :  { %v2675_v30 = vadd.f32 %v3821_v19, %v2669_v43 }
 0x69e   :  { %v2677_v9 = vpack.c.bf16 %v2675_v30, %v2674_v50 }
 0x6a8   :  { %3638 = vmatmul.msk.bf16.gmra.mxu3 %vm1621_vm0, %v2677_v9  ;;  %3648 = vmatmul.msk.bf16.gmra.mxu0 %vm1621_vm0, %v2677_v9 }
 0x6a9   :  { %3658 = vmatmul.msk.bf16.gmra.mxu1 %vm1621_vm0, %v2677_v9  ;;  %3668 = vmatmul.msk.bf16.gmra.mxu2 %vm1621_vm0, %v2677_v9 }
 0x6b8   :  { %3677 = vmatmul.msk.bf16.vlgmr.msra.gmra.mxu3 %vm1621_vm0, %v2676_v29 }
 0x6c8   :  { %3678 = vmatmul.msk.bf16.gmra.mxu3 %vm1621_vm0, %v2677_v9 }
 0x715   :  { %v2758_v33 = vpop.f32.mrf.mxu0 }
 0x716   :  { %v2794_v59 = vpop.f32.mrf.mxu1 }
 0x717   :  { %v2804_v25 = vrot.slane %v2794_v59, 7 }
 0x71b   :  { %v2715_v63 = vpop.f32.mrf.mxu3 }
 0x71c   :  { %v5023_v2 = vpop.f32.mrf.mxu2  ;;  %v2725_v37 = vrot.slane %v2715_v63, 6 }
 0x71d   :  { %v2760_v44 = vpop.f32.mrf.mxu0  ;;  %v2856_v3 = vrot.slane %v5023_v2, 1 }
 0x71e   :  { %v2796_v47 = vpop.f32.mrf.mxu1 }
 0x71f   :  { %v2805_v34 = vrot.slane %v2796_v47, 7 }
 0x721   :  { %v2810_v43 = vsel %vm1731_vm13, %v2804_v25, %v2805_v34 }
 0x723   :  { %v2717_v45 = vpop.f32.mrf.mxu3 }
 0x724   :  { %v2848_v38 = vpop.f32.mrf.mxu2  ;;  %v2726_v0 = vrot.slane %v2717_v45, 6 }
 0x725   :  { %v2857_v14 = vrot.slane %v2848_v38, 1  ;;  %v2763_v12 = vpop.f32.mrf.mxu0 }
 0x726   :  { %v5021_v41 = vpop.f32.mrf.mxu1  ;;  %v2731_v36 = vsel %vm1651_vm7, %v2725_v37, %v2726_v0 }
 0x727   :  { %v2862_v18 = vsel %vm1784_vm14, %v2856_v3, %v2857_v14  ;;  %v2761_v39 = vadd.f32 %v2760_v44, %v2731_v36  ;;  %v2806_v52 = vrot.slane %v5021_v41, 7 }
 0x729   :  { %v2817_v50 = vadd.f32 %v2810_v43, %v2761_v39  ;;  %v2809_v59 = vsel %vm1731_vm13, %v2805_v34, %v2806_v52 }
 0x72b   :  { %v2720_v17 = vpop.f32.mrf.mxu3 }
 0x72c   :  { %v2851_v49 = vpop.f32.mrf.mxu2  ;;  %v2727_v16 = vrot.slane %v2720_v17, 6 }
 0x72d   :  { %v2858_v61 = vrot.slane %v2851_v49, 1  ;;  %v2765_v63 = vpop.f32.mrf.mxu0 }
 0x72e   :  { %v2801_v32 = vpop.f32.mrf.mxu1  ;;  %v2730_v31 = vsel %vm1651_vm7, %v2726_v0, %v2727_v16 }
 0x72f   :  { %v2807_v11 = vrot.slane %v2801_v32, 7  ;;  %v2861_v8 = vsel %vm1784_vm14, %v2857_v14, %v2858_v61  ;;  %v2735_v29 = vmul.f32 %v4734_v35, %v2730_v31 }
 0x730   :  { %v2865_v26 = vmul.f32 %v4740_v10, %v2861_v8 }
 0x731   :  { %v2811_v48 = vsel %vm1731_vm13, %v2807_v11, %v2804_v25  ;;  %v2764_v41 = vadd.f32 %v2763_v12, %v2735_v29 }
 0x732   :  { %v2812_v60 = vmul.f32 %v4757_v56, %v2811_v48 }
 0x733   :  { %v2722_v40 = vpop.f32.mrf.mxu3 }
 0x734   :  { %v2728_v58 = vrot.slane %v2722_v40, 6  ;;  %v2853_v27 = vpop.f32.mrf.mxu2  ;;  %v2814_v40 = vmul.f32 %v4745_v20, %v2809_v59 }
 0x735   :  { %v2859_v47 = vrot.slane %v2853_v27, 1 }
 0x736   :  { %v2732_v42 = vsel %vm1651_vm7, %v2728_v58, %v2725_v37  ;;  %v2729_v7 = vsel %vm1651_vm7, %v2727_v16, %v2728_v58  ;;  %v2808_v58 = vsel %vm1731_vm13, %v2806_v52, %v2807_v11 }
 0x737   :  { %v2733_v54 = vmul.f32 %v4724_v15, %v2732_v42  ;;  %v2766_v17 = vadd.f32 %v2765_v63, %v2729_v7  ;;  %v2860_v32 = vsel %vm1784_vm14, %v2858_v61, %v2859_v47  ;;  %v2863_v42 = vsel %vm1784_vm14, %v2859_v47, %v2856_v3 }
 0x738   :  { %v2867_v48 = vmul.f32 %v4778_v22, %v2863_v42  ;;  %v3772_v42 = vld [vmem:[#allocation8 + $0x140] sm:$0xff] }
 0x739   :  { %v2759_v23 = vadd.f32 %v2758_v33, %v2733_v54  ;;  %v2869_v33 = vadd.f32 %v2865_v26, %v2817_v50  ;;  %v2819_v38 = vadd.f32 %v2808_v58, %v2766_v17  ;;  %v2818_v54 = vadd.f32 %v2814_v40, %v2764_v41  ;;  %v3771_v40 = vld [vmem:[#allocation8 + $0x168] sm:$0xff]  ;;  %v3775_v58 = vld [vmem:[#allocation8 + $0x158] sm:$0xff] }
 0x73a   :  { %3113 = vmatpush.bf16.msrb.mxu1 %v3771_v40  ;;  %3149 = vmatpush.bf16.msra.mxu2 %v3775_v58 }
 0x73b   :  { %v2898_v28 = vpop.f32.mrf.mxu3  ;;  %v2816_v55 = vadd.f32 %v2812_v60, %v2759_v23  ;;  %v2870_v23 = vadd.f32 %v2860_v32, %v2818_v54  ;;  %v2871_v0 = vadd.f32 %v2867_v48, %v2819_v38  ;;  %v3777_v32 = vld [vmem:[#allocation8 + $0x178] sm:$0xff]  ;;  %v3770_v38 = vld [vmem:[#allocation8 + $0x160] sm:$0xff] }
 0x73c   :  { %v2908_v57 = vrot.slane %v2898_v28, 2  ;;  %3201 = vmatpush.bf16.msrb.mxu3 %v3777_v32 }
 0x73d   :  { %v2868_v19 = vadd.f32 %v2862_v18, %v2816_v55 }
 0x73e   :  { %3114 = vmatpush.bf16.msrb.mxu1 %v3770_v38 }
 0x743   :  { %v2900_v51 = vpop.f32.mrf.mxu3 }
 0x744   :  { %v2909_v53 = vrot.slane %v2900_v51, 2 }
 0x746   :  { %v2914_v13 = vsel %vm1837_vm3, %v2908_v57, %v2909_v53 }
 0x747   :  { %v2920_v62 = vadd.f32 %v2914_v13, %v2868_v19 }
 0x749   :  { %v2926_v24 = vadd.f32 %v3822_v4, %v2920_v62 }
 0x74b   :  { %v2903_v21 = vpop.f32.mrf.mxu3  ;;  %v2930_v5 = vmax.f32 %v2926_v24, 0.0 }
 0x74c   :  { %v2910_v30 = vrot.slane %v2903_v21, 2 }
 0x74d   :  { %v2934_v9 = vsel %vm1621_vm0, %v2930_v5, 0.0 }
 0x74e   :  { %v2913_v45 = vsel %vm1837_vm3, %v2909_v53, %v2910_v30  ;;  %2935 = vadd.xlane.f32.xlu2 %v2934_v9 }
 0x74f   :  { %v2917_v2 = vmul.f32 %v4761_v46, %v2913_v45 }
 0x751   :  { %v2921_v37 = vadd.f32 %v2917_v2, %v2869_v33  ;;  %v3773_v33 = vld [vmem:[#allocation8 + $0x148] sm:$0xff] }
 0x752   :  { %3070 = vmatpush.bf16.msrb.mxu0 %v3773_v33 }
 0x753   :  { %v2905_v25 = vpop.f32.mrf.mxu3  ;;  %v2927_v44 = vadd.f32 %v3822_v4, %v2921_v37 }
 0x754   :  { %v2911_v28 = vrot.slane %v2905_v25, 2 }
 0x755   :  { %v2931_v14 = vmax.f32 %v2927_v44, 0.0  ;;  %v3774_v44 = vld [vmem:[#allocation8 + $0x150] sm:$0xff] }
 0x756   :  { %v2912_v60 = vsel %vm1837_vm3, %v2910_v30, %v2911_v28  ;;  %v2915_v11 = vsel %vm1837_vm3, %v2911_v28, %v2908_v57  ;;  %v3776_v28 = vld [vmem:[#allocation8 + $0x170] sm:$0xff]  ;;  %3071 = vmatpush.bf16.msrb.mxu0 %v3772_v42  ;;  %3150 = vmatpush.bf16.msra.mxu2 %v3774_v44 }
 0x757   :  { %v2919_v49 = vmul.f32 %v4791_v6, %v2915_v11  ;;  %v2937_v55 = vsel %vm1621_vm0, %v2931_v14, 0.0  ;;  %v2922_v3 = vadd.f32 %v2912_v60, %v2870_v23  ;;  %3202 = vmatpush.bf16.msrb.mxu3 %v3776_v28 }
 0x758   :  { %2938 = vadd.xlane.f32.xlu0 %v2937_v55 }
 0x759   :  { %v2928_v18 = vadd.f32 %v3822_v4, %v2922_v3  ;;  %v2923_v51 = vadd.f32 %v2919_v49, %v2871_v0 }
 0x75b   :  { %v2932_v12 = vmax.f32 %v2928_v18, 0.0  ;;  %v2929_v16 = vadd.f32 %v3822_v4, %v2923_v51 }
 0x75d   :  { %v2940_v61 = vsel %vm1621_vm0, %v2932_v12, 0.0  ;;  %v2933_v53 = vmax.f32 %v2929_v16, 0.0  ;;  %v3779_v16 = vld [vmem:[#allocation8 + $0x188] sm:$0xff] }
 0x75e   :  { %2941 = vadd.xlane.f32.xlu1 %v2940_v61  ;;  %3253 = vmatpush.bf16.msra.mxu0 %v3779_v16 }
 0x75f   :  { %v2943_v19 = vsel %vm1621_vm0, %v2933_v53, 0.0 }
 0x760   :  { %2944 = vadd.xlane.f32.xlu2 %v2943_v19 }
 0x7c1   :  { %v2936_v36 = vpop.xlane.xlu2 %2935 }
 0x7c2   :  { %v2946_v57 = vmul.f32 0.03125, %v2936_v36  ;;  %v3778_v36 = vld [vmem:[#allocation8 + $0x180] sm:$0xff] }
 0x7c3   :  { %3254 = vmatpush.bf16.msra.mxu0 %v3778_v36 }
 0x7c4   :  { %v5074_v13 = vsub.f32 %v2930_v5, %v2946_v57 }
 0x7c6   :  { %v2954_v62 = vmul.f32 %v5074_v13, %v5074_v13 }
 0x7c8   :  { %v2958_v34 = vsel %vm1621_vm0, %v2954_v62, 0.0  ;;  %v3823_v62 = vld [vmem:[%s5202_s7 + $0x3] ss:$0 sm:$0xff] }
 0x7c9   :  { %2959 = vadd.xlane.f32.xlu0 %v2958_v34 }
 0x7cb   :  { %v2939_v31 = vpop.xlane.xlu0 %2938 }
 0x7cc   :  { %v2947_v8 = vmul.f32 0.03125, %v2939_v31 }
 0x7ce   :  { %v5079_v4 = vsub.f32 %v2931_v14, %v2947_v8 }
 0x7d0   :  { %v2955_v39 = vmul.f32 %v5079_v4, %v5079_v4 }
 0x7d1   :  { %v2942_v24 = vpop.xlane.xlu1 %2941 }
 0x7d2   :  { %v2948_v52 = vmul.f32 0.03125, %v2942_v24  ;;  %v2961_v29 = vsel %vm1621_vm0, %v2955_v39, 0.0 }
 0x7d3   :  { %2962 = vadd.xlane.f32.xlu1 %v2961_v29  ;;  %v2945_v26 = vpop.xlane.xlu2 %2944 }
 0x7d4   :  { %v5084_v27 = vsub.f32 %v2932_v12, %v2948_v52  ;;  %v2949_v21 = vmul.f32 0.03125, %v2945_v26  ;;  %v3824_v26 = vld [vmem:[#allocation9 + $0x3] ss:$0 sm:$0xff] }
 0x7d6   :  { %v5086_v5 = vsub.f32 %v2933_v53, %v2949_v21  ;;  %v2956_v43 = vmul.f32 %v5084_v27, %v5084_v27 }
 0x7d8   :  { %v2964_v7 = vsel %vm1621_vm0, %v2956_v43, 0.0  ;;  %v2957_v30 = vmul.f32 %v5086_v5, %v5086_v5 }
 0x7d9   :  { %2965 = vadd.xlane.f32.xlu2 %v2964_v7 }
 0x7da   :  { %v2967_v50 = vsel %vm1621_vm0, %v2957_v30, 0.0 }
 0x7db   :  { %2968 = vadd.xlane.f32.xlu0 %v2967_v50 }
 0x83c   :  { %v2960_v9 = vpop.xlane.xlu0 %2959 }
 0x83d   :  { %v2970_v59 = vmul.f32 0.03125, %v2960_v9 }
 0x83f   :  { %v2974_v63 = vadd.f32 1e-12, %v2970_v59 }
 0x841   :  { %3852 = vrsqrt.f32 %v2974_v63  ;;  %vm2984_vm11 = vweird.f32 %v2974_v63 }
 0x846   :  { %v2963_v47 = vpop.xlane.xlu1 %2962 }
 0x847   :  { %v3853_v45 = vpop.eup %3852  ;;  %v2971_v41 = vmul.f32 0.03125, %v2963_v47 }
 0x848   :  { %v2979_v17 = vmul.f32 %v3853_v45, %v2974_v63  ;;  %vm2985_vm8 = vweird.f32 %v3853_v45 }
 0x849   :  { %v2975_v2 = vadd.f32 1e-12, %v2971_v41  ;;  %vm2986_vm12 = vmor %vm2984_vm11, %vm2985_vm8 }
 0x84a   :  { %v2980_v37 = vmul.f32 %v3853_v45, %v2979_v17 }
 0x84b   :  { %3854 = vrsqrt.f32 %v2975_v2  ;;  %vm2994_vm1 = vweird.f32 %v2975_v2 }
 0x84c   :  { %v2981_v54 = vmul.f32 0.5, %v2980_v37  ;;  %v2966_v25 = vpop.xlane.xlu2 %2965 }
 0x84d   :  { %v2972_v48 = vmul.f32 0.03125, %v2966_v25 }
 0x84e   :  { %v2982_v23 = vsub.f32 1.5, %v2981_v54  ;;  %v2969_v14 = vpop.xlane.xlu0 %2968 }
 0x84f   :  { %v2976_v60 = vadd.f32 1e-12, %v2972_v48  ;;  %v2973_v11 = vmul.f32 0.03125, %v2969_v14 }
 0x850   :  { %v2983_v3 = vmul.f32 %v3853_v45, %v2982_v23 }
 0x851   :  { %v3855_v49 = vpop.eup %3854  ;;  %3856 = vrsqrt.f32 %v2976_v60  ;;  %v2977_v55 = vadd.f32 1e-12, %v2973_v11  ;;  %vm3004_vm5 = vweird.f32 %v2976_v60 }
 0x852   :  { %v2989_v0 = vmul.f32 %v3855_v49, %v2975_v2  ;;  %v2987_v51 = vsel %vm2986_vm12, %v3853_v45, %v2983_v3  ;;  %vm2995_vm15 = vweird.f32 %v3855_v49 }
 0x853   :  { %3858 = vrsqrt.f32 %v2977_v55  ;;  %v3018_v34 = vmul.f32 %v2987_v51, %v5074_v13  ;;  %vm2996_vm2 = vmor %vm2994_vm1, %vm2995_vm15  ;;  %vm3014_vm9 = vweird.f32 %v2977_v55 }
 0x854   :  { %v2990_v18 = vmul.f32 %v3855_v49, %v2989_v0 }
 0x855   :  { %v3024_v21 = vmul.f32 %v3823_v62, %v3018_v34 }
 0x856   :  { %v2991_v12 = vmul.f32 0.5, %v2990_v18 }
 0x857   :  { %v3857_v61 = vpop.eup %3856  ;;  %v3030_v59 = vadd.f32 %v3824_v26, %v3024_v21 }
 0x858   :  { %v2992_v53 = vsub.f32 1.5, %v2991_v12  ;;  %v2999_v19 = vmul.f32 %v3857_v61, %v2976_v60  ;;  %vm3005_vm6 = vweird.f32 %v3857_v61 }
 0x859   :  { %v3859_v57 = vpop.eup %3858  ;;  %vm3006_vm8 = vmor %vm3004_vm5, %vm3005_vm6 }
 0x85a   :  { %v2993_v31 = vmul.f32 %v3855_v49, %v2992_v53  ;;  %v3000_v8 = vmul.f32 %v3857_v61, %v2999_v19  ;;  %v3009_v39 = vmul.f32 %v3859_v57, %v2977_v55  ;;  %vm3015_vm4 = vweird.f32 %v3859_v57 }
 0x85b   :  { %vm3016_vm10 = vmor %vm3014_vm9, %vm3015_vm4 }
 0x85c   :  { %v2997_v24 = vsel %vm2996_vm2, %v3855_v49, %v2993_v31  ;;  %v3001_v52 = vmul.f32 0.5, %v3000_v8  ;;  %v3010_v29 = vmul.f32 %v3859_v57, %v3009_v39  ;;  %v3825_v39 = vld [vmem:[%s5201_s6 + $0x4] ss:$0 sm:$0xff] }
 0x85d   :  { %v3019_v43 = vmul.f32 %v2997_v24, %v5079_v4 }
 0x85e   :  { %v3002_v7 = vsub.f32 1.5, %v3001_v52  ;;  %v3011_v30 = vmul.f32 0.5, %v3010_v29 }
 0x85f   :  { %v3025_v50 = vmul.f32 %v3823_v62, %v3019_v43 }
 0x860   :  { %v3012_v9 = vsub.f32 1.5, %v3011_v30  ;;  %v3003_v63 = vmul.f32 %v3857_v61, %v3002_v7 }
 0x861   :  { %v3031_v13 = vadd.f32 %v3824_v26, %v3025_v50 }
 0x862   :  { %v3013_v47 = vmul.f32 %v3859_v57, %v3012_v9  ;;  %v3007_v4 = vsel %vm3006_vm8, %v3857_v61, %v3003_v63 }
 0x863   :  { %v3034_v45 = vpack.c.bf16 %v3031_v13, %v3030_v59  ;;  %v3020_v2 = vmul.f32 %v3007_v4, %v5084_v27 }
 0x864   :  { %v3017_v41 = vsel %vm3016_vm10, %v3859_v57, %v3013_v47 }
 0x865   :  { %3687 = vmatmul.msk.bf16.vlgmr.msrb.gmra.mxu0 %vm1621_vm0, %v3034_v45  ;;  %3697 = vmatmul.msk.bf16.vlgmr.msrb.gmra.mxu1 %vm1621_vm0, %v3034_v45  ;;  %v3021_v17 = vmul.f32 %v3017_v41, %v5086_v5  ;;  %v3026_v40 = vmul.f32 %v3823_v62, %v3020_v2 }
 0x866   :  { %3707 = vmatmul.msk.bf16.vlgmr.msra.gmra.mxu2 %vm1621_vm0, %v3034_v45  ;;  %3717 = vmatmul.msk.bf16.vlgmr.msrb.gmra.mxu3 %vm1621_vm0, %v3034_v45 }
 0x867   :  { %v3027_v33 = vmul.f32 %v3823_v62, %v3021_v17  ;;  %v3032_v58 = vadd.f32 %v3824_v26, %v3026_v40 }
 0x869   :  { %v3033_v37 = vadd.f32 %v3824_v26, %v3027_v33 }
 0x86b   :  { %v3035_v32 = vpack.c.bf16 %v3033_v37, %v3032_v58 }
 0x875   :  { %3688 = vmatmul.msk.bf16.gmra.mxu0 %vm1621_vm0, %v3035_v32  ;;  %3698 = vmatmul.msk.bf16.gmra.mxu1 %vm1621_vm0, %v3035_v32 }
 0x876   :  { %3708 = vmatmul.msk.bf16.gmra.mxu2 %vm1621_vm0, %v3035_v32  ;;  %3718 = vmatmul.msk.bf16.gmra.mxu3 %vm1621_vm0, %v3035_v32 }
 0x885   :  { %3727 = vmatmul.msk.bf16.vlgmr.msra.gmra.mxu0 %vm1621_vm0, %v3034_v45 }
 0x895   :  { %3728 = vmatmul.msk.bf16.gmra.mxu0 %vm1621_vm0, %v3035_v32 }
 0x8e2   :  { %v3073_v5 = vpop.f32.mrf.mxu0  ;;  %v3116_v44 = vpop.f32.mrf.mxu1 }
 0x8e3   :  { %v3083_v60 = vrot.slane %v3073_v5, 6 }
 0x8e9   :  { %v3152_v42 = vpop.f32.mrf.mxu2  ;;  %v3204_v54 = vpop.f32.mrf.mxu3 }
 0x8ea   :  { %v3075_v27 = vpop.f32.mrf.mxu0  ;;  %v3162_v55 = vrot.slane %v3152_v42, 7  ;;  %v3118_v51 = vpop.f32.mrf.mxu1  ;;  %v3214_v57 = vrot.slane %v3204_v54, 1 }
 0x8eb   :  { %v3084_v26 = vrot.slane %v3075_v27, 6 }
 0x8ed   :  { %v3089_v2 = vsel %vm1651_vm7, %v3083_v60, %v3084_v26 }
 0x8ee   :  { %v3119_v42 = vadd.f32 %v3118_v51, %v3089_v2 }
 0x8f1   :  { %v3154_v38 = vpop.f32.mrf.mxu2  ;;  %v3206_v14 = vpop.f32.mrf.mxu3 }
 0x8f2   :  { %v3078_v25 = vpop.f32.mrf.mxu0  ;;  %v3215_v19 = vrot.slane %v3206_v14, 1  ;;  %v3121_v52 = vpop.f32.mrf.mxu1  ;;  %v3163_v30 = vrot.slane %v3154_v38, 7 }
 0x8f3   :  { %v3085_v24 = vrot.slane %v3078_v25, 6 }
 0x8f4   :  { %v3220_v34 = vsel %vm1784_vm14, %v3214_v57, %v3215_v19  ;;  %v3168_v27 = vsel %vm1731_vm13, %v3162_v55, %v3163_v30 }
 0x8f5   :  { %v3088_v50 = vsel %vm1651_vm7, %v3084_v26, %v3085_v24  ;;  %v3175_v14 = vadd.f32 %v3168_v27, %v3119_v42 }
 0x8f6   :  { %v3093_v45 = vmul.f32 %v4734_v35, %v3088_v50 }
 0x8f8   :  { %v3122_v32 = vadd.f32 %v3121_v52, %v3093_v45 }
 0x8f9   :  { %v3157_v28 = vpop.f32.mrf.mxu2  ;;  %v3209_v61 = vpop.f32.mrf.mxu3 }
 0x8fa   :  { %v3080_v48 = vpop.f32.mrf.mxu0  ;;  %v3164_v21 = vrot.slane %v3157_v28, 7  ;;  %v3216_v63 = vrot.slane %v3209_v61, 1  ;;  %v3123_v37 = vpop.f32.mrf.mxu1 }
 0x8fb   :  { %v3086_v23 = vrot.slane %v3080_v48, 6 }
 0x8fc   :  { %v3167_v13 = vsel %vm1731_vm13, %v3163_v30, %v3164_v21  ;;  %v3219_v40 = vsel %vm1784_vm14, %v3215_v19, %v3216_v63 }
 0x8fd   :  { %v3090_v11 = vsel %vm1651_vm7, %v3086_v23, %v3083_v60  ;;  %v3087_v4 = vsel %vm1651_vm7, %v3085_v24, %v3086_v23  ;;  %v3172_v33 = vmul.f32 %v4745_v20, %v3167_v13  ;;  %v3223_v54 = vmul.f32 %v4740_v10, %v3219_v40 }
 0x8fe   :  { %v3091_v3 = vmul.f32 %v4724_v15, %v3090_v11  ;;  %v3124_v5 = vadd.f32 %v3123_v37, %v3087_v4 }
 0x900   :  { %v3117_v53 = vadd.f32 %v3116_v44, %v3091_v3  ;;  %v3176_v44 = vadd.f32 %v3172_v33, %v3122_v32 }
 0x901   :  { %v3159_v49 = vpop.f32.mrf.mxu2  ;;  %v3211_v43 = vpop.f32.mrf.mxu3 }
 0x902   :  { %v3165_v0 = vrot.slane %v3159_v49, 7  ;;  %v3256_v18 = vpop.f32.mrf.mxu0  ;;  %v3217_v47 = vrot.slane %v3211_v43, 1 }
 0x903   :  { %v3266_v31 = vrot.slane %v3256_v18, 2  ;;  %v3227_v18 = vadd.f32 %v3223_v54, %v3175_v14 }
 0x904   :  { %v3169_v12 = vsel %vm1731_vm13, %v3165_v0, %v3162_v55  ;;  %v3166_v58 = vsel %vm1731_vm13, %v3164_v21, %v3165_v0  ;;  %v3221_v35 = vsel %vm1784_vm14, %v3217_v47, %v3214_v57  ;;  %v3218_v38 = vsel %vm1784_vm14, %v3216_v63, %v3217_v47  ;;  %v3395_v63 = vld [vmem:[%s5205_s10] sm:$0xff] }
 0x905   :  { %v3170_v16 = vmul.f32 %v4757_v56, %v3169_v12  ;;  %v3177_v25 = vadd.f32 %v3166_v58, %v3124_v5  ;;  %v3225_v28 = vmul.f32 %v4778_v22, %v3221_v35  ;;  %v3228_v60 = vadd.f32 %v3218_v38, %v3176_v44 }
 0x907   :  { %v3174_v36 = vadd.f32 %v3170_v16, %v3117_v53  ;;  %v3229_v10 = vadd.f32 %v3225_v28, %v3177_v25 }
 0x909   :  { %v3226_v15 = vadd.f32 %v3220_v34, %v3174_v36 }
 0x90a   :  { %v3258_v62 = vpop.f32.mrf.mxu0 }
 0x90b   :  { %v3267_v8 = vrot.slane %v3258_v62, 2 }
 0x90d   :  { %v3272_v56 = vsel %vm1837_vm3, %v3266_v31, %v3267_v8 }
 0x90e   :  { %v3278_v29 = vadd.f32 %v3272_v56, %v3226_v15 }
 0x910   :  { %v3284_v7 = vadd.f32 %v3825_v39, %v3278_v29 }
 0x912   :  { %v3261_v9 = vpop.f32.mrf.mxu0  ;;  %v3288_v59 = vmax.f32 %v3284_v7, 0.0 }
 0x913   :  { %v3268_v17 = vrot.slane %v3261_v9, 2 }
 0x914   :  { %v3292_v41 = vsel %vm1621_vm0, %v3288_v59, 0.0 }
 0x915   :  { %3293 = vadd.xlane.f32.xlu0 %v3292_v41  ;;  %v3271_v20 = vsel %vm1837_vm3, %v3267_v8, %v3268_v17 }
 0x916   :  { %v3275_v11 = vmul.f32 %v4761_v46, %v3271_v20 }
 0x918   :  { %v3279_v22 = vadd.f32 %v3275_v11, %v3227_v18 }
 0x91a   :  { %v3263_v48 = vpop.f32.mrf.mxu0  ;;  %v3285_v46 = vadd.f32 %v3825_v39, %v3279_v22 }
 0x91b   :  { %v3269_v23 = vrot.slane %v3263_v48, 2 }
 0x91c   :  { %v3289_v1 = vmax.f32 %v3285_v46, 0.0 }
 0x91d   :  { %v3270_v49 = vsel %vm1837_vm3, %v3268_v17, %v3269_v23  ;;  %v3273_v55 = vsel %vm1837_vm3, %v3269_v23, %v3266_v31 }
 0x91e   :  { %v3277_v3 = vmul.f32 %v4791_v6, %v3273_v55  ;;  %v3280_v0 = vadd.f32 %v3270_v49, %v3228_v60  ;;  %v3295_v57 = vsel %vm1621_vm0, %v3289_v1, 0.0 }
 0x920   :  { %v3286_v51 = vadd.f32 %v3825_v39, %v3280_v0  ;;  %v3281_v12 = vadd.f32 %v3277_v3, %v3229_v10 }
 0x922   :  { %v3290_v16 = vmax.f32 %v3286_v51, 0.0  ;;  %v3287_v61 = vadd.f32 %v3825_v39, %v3281_v12 }
 0x924   :  { %v3298_v53 = vsel %vm1621_vm0, %v3290_v16, 0.0  ;;  %v3291_v19 = vmax.f32 %v3287_v61, 0.0 }
 0x925   :  { %3299 = vadd.xlane.f32.xlu1 %v3298_v53 }
 0x926   :  { %v3301_v36 = vsel %vm1621_vm0, %v3291_v19, 0.0 }
 0x927   :  { %3302 = vadd.xlane.f32.xlu2 %v3301_v36 }
 0x92d   :  { %3296 = vadd.xlane.f32.xlu1 %v3295_v57 }
 0x988   :  { %v3294_v6 = vpop.xlane.xlu0 %3293 }
 0x989   :  { %v3304_v62 = vmul.f32 0.03125, %v3294_v6 }
 0x98b   :  { %v5158_v34 = vsub.f32 %v3288_v59, %v3304_v62  ;;  %v3827_v62 = vld [vmem:[#allocation9 + $0x4] ss:$0 sm:$0xff] }
 0x98d   :  { %v3312_v31 = vmul.f32 %v5158_v34, %v5158_v34 }
 0x98f   :  { %v3316_v8 = vsel %vm1621_vm0, %v3312_v31, 0.0 }
 0x990   :  { %3317 = vadd.xlane.f32.xlu1 %v3316_v8 }
 0x998   :  { %v3300_v15 = vpop.xlane.xlu1 %3299 }
 0x999   :  { %v3306_v39 = vmul.f32 0.03125, %v3300_v15 }
 0x99a   :  { %v3303_v24 = vpop.xlane.xlu2 %3302 }
 0x99b   :  { %v5163_v52 = vsub.f32 %v3290_v16, %v3306_v39  ;;  %v3307_v56 = vmul.f32 0.03125, %v3303_v24  ;;  %v3826_v16 = vld [vmem:[%s5202_s7 + $0x4] ss:$0 sm:$0xff]  ;;  %s4035_s7 = smov [#allocation12]  }
 0x99c   :  { %s3429_s29 = sshll.u32 %s4035_s7, 4  ;;  %s3430_s29 = int_to_ptr.vmem [resolvable:$true] %s3429_s29 }
 0x99d   :  { %v5165_v29 = vsub.f32 %v3291_v19, %v3307_v56  ;;  %v3314_v26 = vmul.f32 %v5163_v52, %v5163_v52 }
 0x99f   :  { %v3322_v21 = vsel %vm1621_vm0, %v3314_v26, 0.0  ;;  %v3315_v43 = vmul.f32 %v5165_v29, %v5165_v29 }
 0x9a0   :  { %v3297_v7 = vpop.xlane.xlu1 %3296  ;;  %3323 = vadd.xlane.f32.xlu2 %v3322_v21 }
 0x9a1   :  { %v3305_v30 = vmul.f32 0.03125, %v3297_v7  ;;  %v3325_v50 = vsel %vm1621_vm0, %v3315_v43, 0.0 }
 0x9a2   :  { %3326 = vadd.xlane.f32.xlu0 %v3325_v50 }
 0x9a3   :  { %v5173_v9 = vsub.f32 %v3289_v1, %v3305_v30  ;;  %v3392_v30 = vld [vmem:[#allocation11] sm:$0xf] }
 0x9a5   :  { %v3313_v59 = vmul.f32 %v5173_v9, %v5173_v9 }
 0x9a7   :  { %v3319_v13 = vsel %vm1621_vm0, %v3313_v59, 0.0 }
 0x9a8   :  { %3320 = vadd.xlane.f32.xlu2 %v3319_v13 }
 0x9b6   :  { %3398 = vperm.xlu0 %3798, %v3395_v63  }
 0xa03   :  { %v3318_v47 = vpop.xlane.xlu1 %3317 }
 0xa04   :  { %v3328_v45 = vmul.f32 0.03125, %v3318_v47 }
 0xa06   :  { %v3332_v41 = vadd.f32 1e-12, %v3328_v45 }
 0xa08   :  { %3860 = vrsqrt.f32 %v3332_v41  ;;  %vm3342_vm11 = vweird.f32 %v3332_v41 }
 0xa0e   :  { %v3861_v4 = vpop.eup %3860 }
 0xa0f   :  { %v3337_v40 = vmul.f32 %v3861_v4, %v3332_v41  ;;  %vm3343_vm13 = vweird.f32 %v3861_v4 }
 0xa10   :  { %vm3344_vm15 = vmor %vm3342_vm11, %vm3343_vm13 }
 0xa11   :  { %v3338_v32 = vmul.f32 %v3861_v4, %v3337_v40 }
 0xa13   :  { %v3324_v17 = vpop.xlane.xlu2 %3323  ;;  %v3339_v38 = vmul.f32 0.5, %v3338_v32 }
 0xa14   :  { %v3330_v2 = vmul.f32 0.03125, %v3324_v17 }
 0xa15   :  { %v3327_v33 = vpop.xlane.xlu0 %3326  ;;  %v3340_v48 = vsub.f32 1.5, %v3339_v38 }
 0xa16   :  { %v3334_v37 = vadd.f32 1e-12, %v3330_v2  ;;  %v3331_v58 = vmul.f32 0.03125, %v3327_v33 }
 0xa17   :  { %v3341_v55 = vmul.f32 %v3861_v4, %v3340_v48 }
 0xa18   :  { %3862 = vrsqrt.f32 %v3334_v37  ;;  %v3335_v35 = vadd.f32 1e-12, %v3331_v58  ;;  %vm3362_vm14 = vweird.f32 %v3334_v37 }
 0xa19   :  { %v3345_v61 = vsel %vm3344_vm15, %v3861_v4, %v3341_v55 }
 0xa1a   :  { %3864 = vrsqrt.f32 %v3335_v35  ;;  %vm3372_vm1 = vweird.f32 %v3335_v35  ;;  %v3376_v57 = vmul.f32 %v3345_v61, %v5158_v34 }
 0xa1b   :  { %v3321_v5 = vpop.xlane.xlu2 %3320 }
 0xa1c   :  { %v3329_v42 = vmul.f32 0.03125, %v3321_v5  ;;  %v3382_v56 = vmul.f32 %v3826_v16, %v3376_v57 }
 0xa1e   :  { %v3863_v27 = vpop.eup %3862  ;;  %v3333_v20 = vadd.f32 1e-12, %v3329_v42  ;;  %v3388_v21 = vadd.f32 %v3827_v62, %v3382_v56 }
 0xa1f   :  { %v3357_v54 = vmul.f32 %v3863_v27, %v3334_v37  ;;  %vm3363_vm7 = vweird.f32 %v3863_v27 }
 0xa20   :  { %v3865_v25 = vpop.eup %3864  ;;  %3866 = vrsqrt.f32 %v3333_v20  ;;  %vm3364_vm12 = vmor %vm3362_vm14, %vm3363_vm7  ;;  %vm3352_vm6 = vweird.f32 %v3333_v20 }
 0xa21   :  { %v3358_v44 = vmul.f32 %v3863_v27, %v3357_v54  ;;  %v3367_v28 = vmul.f32 %v3865_v25, %v3335_v35  ;;  %vm3373_vm3 = vweird.f32 %v3865_v25 }
 0xa22   :  { %vm3374_vm2 = vmor %vm3372_vm1, %vm3373_vm3 }
 0xa23   :  { %v3359_v23 = vmul.f32 0.5, %v3358_v44  ;;  %v3368_v14 = vmul.f32 %v3865_v25, %v3367_v28 }
 0xa25   :  { %v3360_v60 = vsub.f32 1.5, %v3359_v23  ;;  %v3369_v11 = vmul.f32 0.5, %v3368_v14 }
 0xa26   :  { %v3867_v49 = vpop.eup %3866 }
 0xa27   :  { %v3361_v3 = vmul.f32 %v3863_v27, %v3360_v60  ;;  %v3370_v0 = vsub.f32 1.5, %v3369_v11  ;;  %v3347_v10 = vmul.f32 %v3867_v49, %v3333_v20  ;;  %vm3353_vm4 = vweird.f32 %v3867_v49 }
 0xa28   :  { %vm3354_vm9 = vmor %vm3352_vm6, %vm3353_vm4  ;;  %v3399_v50 = vpop.permute.xlu0 %3398 }
 0xa29   :  { %v3365_v18 = vsel %vm3364_vm12, %v3863_v27, %v3361_v3  ;;  %v3371_v51 = vmul.f32 %v3865_v25, %v3370_v0  ;;  %v3348_v12 = vmul.f32 %v3867_v49, %v3347_v10 }
 0xa2a   :  { %v3378_v22 = vmul.f32 %v3365_v18, %v5163_v52 }
 0xa2b   :  { %v3375_v53 = vsel %vm3374_vm2, %v3865_v25, %v3371_v51  ;;  %v3349_v19 = vmul.f32 0.5, %v3348_v12 }
 0xa2c   :  { %v3379_v46 = vmul.f32 %v3375_v53, %v5165_v29  ;;  %v3384_v36 = vmul.f32 %v3826_v16, %v3378_v22 }
 0xa2d   :  { %v3350_v1 = vsub.f32 1.5, %v3349_v19 }
 0xa2e   :  { %v3385_v6 = vmul.f32 %v3826_v16, %v3379_v46  ;;  %v3390_v8 = vadd.f32 %v3827_v62, %v3384_v36 }
 0xa2f   :  { %v3351_v31 = vmul.f32 %v3867_v49, %v3350_v1 }
 0xa30   :  { %v3391_v15 = vadd.f32 %v3827_v62, %v3385_v6 }
 0xa31   :  { %v3355_v39 = vsel %vm3354_vm9, %v3867_v49, %v3351_v31 }
 0xa32   :  { %v3377_v24 = vmul.f32 %v3355_v39, %v5173_v9  ;;  %v3394_v52 = vpack.c.bf16 %v3391_v15, %v3390_v8 }
 0xa34   :  { %v3408_v26 = vsel %vm1621_vm0, %v3394_v52, 0  ;;  %v3383_v29 = vmul.f32 %v3826_v16, %v3377_v24 }
 0xa35   :  { %3416 = vmatpush.bf16.xpose.msra.mxu1 %v3408_v26 }
 0xa36   :  { %v3389_v43 = vadd.f32 %v3827_v62, %v3383_v29 }
 0xa38   :  { %v3393_v7 = vpack.c.bf16 %v3389_v43, %v3388_v21 }
 0xa3a   :  { %v3405_v34 = vsel %vm1621_vm0, %v3393_v7, 0 }
 0xa3d   :  { %3417 = vmatpush.bf16.xpose.msra.mxu1 %v3405_v34 }
 0xa44   :  { %3729 = vmatmul.msk.bf16.vlgmr.msra.gmra.mxu1 %vm1621_vm0, %v3392_v30 }
 0xac1   :  { %v3419_v9 = vpop.f32.mrf.mxu1 }
 0xac2   :  { %v3420_v59 = vadd.f32 %v3419_v9, %v3399_v50 }
 0xac4   :  { %3423 = vst.msk [vmem:[#allocation12] sm:$0xff] %vm1621_vm0, %v3420_v59 }
 0xac5   :  { %3434 = dma.vmem_to_hbm [thread:$0]  %s3430_s29, 128, %s3432_s12, [#allocation5]  }
 0xac9   :  { %v3421_v13 = vpop.f32.mrf.mxu1 }
 0xaca   :  { %4018 = dma.done.wait [#allocation5], 128  }
 0xacb   :  { %4019 = vsyncadd [#allocation5], 4294967168 }
 0xacc   :  { %3439 = vsyncpa [#allocation4], 1 }
 0xacd   :  { %3440 = vsyncpa [#allocation7], 1 }
 0xace   :  { %3441 = vsyncpa [#allocation10], 1 }
 0xacf   :  { %3442 = vsyncpa [#allocation5], 1 }

</bundles_post_ra>
